<compile_context>
chip_gen: v6e
topology: v6e:2x2x1
jax: 0.10.0
libtpu: 0.0.40
codegen_flags: <defaults>
</compile_context>

<pallas_src>
import jax
import jax.numpy as jnp
from jax.experimental import pallas as pl
from jax.experimental.pallas import tpu as pltpu


# ----------------------------------------------------------------------------- in-kernel helpers

def _shift_matrices(L, dtype=jnp.float32):
    """(P @ x)[l] = x[l-1] (row 0 zero), (N @ x)[l] = x[l+1] (row L-1 zero)."""
    r = jax.lax.broadcasted_iota(jnp.int32, (L, L), 0)
    c = jax.lax.broadcasted_iota(jnp.int32, (L, L), 1)
    prev_m = (c == r - 1).astype(dtype)
    next_m = (c == r + 1).astype(dtype)
    return prev_m, next_m


def _pool_select_matrices(L, dtype=jnp.float32):
    """Even/odd row selectors: (Se @ y)[i] = y[2i], (So @ y)[i] = y[2i+1]."""
    Lh = L // 2
    r = jax.lax.broadcasted_iota(jnp.int32, (Lh, L), 0)
    c = jax.lax.broadcasted_iota(jnp.int32, (Lh, L), 1)
    even_m = (c == 2 * r).astype(dtype)
    odd_m = (c == 2 * r + 1).astype(dtype)
    return even_m, odd_m


def _conv_gn_relu(x, w_ref, prev_m, next_m, eps=1e-5):
    """x: (L, Cin) f32; w_ref: (3, Cin, Cout) = PyTorch (Cout, Cin, 3) transposed.

    Conv1d(kernel=3, padding=1, bias=False) + GroupNorm(1, affine=False) + ReLU, fused.
    """
    # Zero-padded neighbour rows via exact 0/1 shift matmuls (MXU, direction-unambiguous).
    x_prev = jnp.dot(prev_m, x, preferred_element_type=jnp.float32)   # x[l-1]
    x_next = jnp.dot(next_m, x, preferred_element_type=jnp.float32)   # x[l+1]

    y = (jnp.dot(x_prev, w_ref[0], preferred_element_type=jnp.float32)
         + jnp.dot(x,      w_ref[1], preferred_element_type=jnp.float32)
         + jnp.dot(x_next, w_ref[2], preferred_element_type=jnp.float32))

    # GroupNorm(num_groups=1): normalize over all (L, Cout) of this sample, biased variance.
    n = float(y.size)
    s = jnp.sum(y)
    ss = jnp.sum(y * y)
    mean = s / n
    var = jnp.maximum(ss / n - mean * mean, 0.0)
    y = (y - mean) * jax.lax.rsqrt(var + eps)
    return jnp.maximum(y, 0.0)


def _maxpool2(y, even_m, odd_m):
    """MaxPool1d(kernel=2, stride=2) along L via exact selection matmuls."""
    a = jnp.dot(even_m, y, preferred_element_type=jnp.float32)   # y[2i]
    b = jnp.dot(odd_m, y, preferred_element_type=jnp.float32)    # y[2i+1]
    return jnp.maximum(a, b)


def _make_fused_kernel(reps, seq_len):
    """Whole VGG_core forward for one sample per grid step; activations never leave VMEM."""
    n_w = int(sum(reps))

    def kernel(x_ref, *args):
        w_refs = args[:n_w]
        o_ref = args[n_w]

        x = x_ref[0].astype(jnp.float32)          # (L, Cin)
        L = seq_len
        wi = 0
        for rep in reps:
            prev_m, next_m = _shift_matrices(L)           # hoisted: shared by all reps of block
            even_m, odd_m = _pool_select_matrices(L)
            for _ in range(rep):
                x = _conv_gn_relu(x, w_refs[wi], prev_m, next_m)
                wi += 1
            x = _maxpool2(x, even_m, odd_m)               # fused block epilogue
            L = L // 2

        # F.avg_pool1d(kernel_size=L) + flatten == mean over remaining length.
        o_ref[0] = jnp.mean(x, axis=0, keepdims=True)     # (1, C_out)

    return kernel


# ----------------------------------------------------------------------------- wrapper

@jax.jit
def vgg_core_forward(x_ncl, params):
    """x_ncl: (B, C_in, L) PyTorch-style NCL.  params: per-block lists of (3, Cin, Cout) weights.

    Returns (B, nb_fils*8), matching VGG_core.forward.
    """
    x = jnp.transpose(x_ncl, (0, 2, 1)).astype(jnp.float32)   # NCL -> NLC
    B, L, Cin = x.shape
    reps = tuple(len(ws) for ws in params)
    flat_ws = [w for ws in params for w in ws]
    c_out = flat_ws[-1].shape[2]

    kernel = _make_fused_kernel(reps, L)

    in_specs = [pl.BlockSpec((1, L, Cin), lambda b: (b, 0, 0))]
    for w in flat_ws:
        in_specs.append(pl.BlockSpec(w.shape, lambda b: (0, 0, 0)))

    # Advisory cost estimate (conv taps + shift matmuls + pool selections), f32 bytes.
    flops = 0
    l = L
    for ws in params:
        for w in ws:
            _, ci, co = w.shape
            flops += 2 * B * l * (3 * ci) * co            # three conv taps
            flops += 2 * 2 * B * l * l * ci               # prev/next shift matmuls
        flops += 2 * 2 * B * (l // 2) * l * ws[-1].shape[2]   # even/odd pool selections
        l //= 2
    bytes_accessed = (x.size + sum(w.size for w in flat_ws) + B * c_out) * 4
    transcendentals = B * len(flat_ws)                    # one rsqrt per conv per sample

    out = pl.pallas_call(
        kernel,
        out_shape=jax.ShapeDtypeStruct((B, 1, c_out), jnp.float32),
        grid=(B,),
        in_specs=in_specs,
        out_specs=pl.BlockSpec((1, 1, c_out), lambda b: (b, 0, 0)),
        compiler_params=pltpu.CompilerParams(dimension_semantics=("parallel",)),
        cost_estimate=pl.CostEstimate(flops=flops,
                                      transcendentals=transcendentals,
                                      bytes_accessed=bytes_accessed),
    )(x, *flat_ws)
    return out.reshape(B, c_out)


# ----------------------------------------------------------------------------- params / reference

def init_vgg_core_params(key, in_channels, nb_fils, reps):
    """Deterministic He-normal init (stand-in for modelutils.initialize_weights).

    Weights are stored as (3, Cin, Cout), i.e. PyTorch's (Cout, Cin, 3) transposed.
    GroupNorm(affine=False) has no parameters; convs have bias=False.
    """
    chans = [in_channels, nb_fils, nb_fils * 2, nb_fils * 4, nb_fils * 8, nb_fils * 8]
    params = []
    for bi, rep in enumerate(reps):
        cin, cout = chans[bi], chans[bi + 1]
        ws = []
        ic = cin
        for _ in range(rep):
            key, sub = jax.random.split(key)
            fan_in = ic * 3
            w_pt = jax.random.normal(sub, (cout, ic, 3), jnp.float32) * jnp.sqrt(2.0 / fan_in)
            ws.append(jnp.transpose(w_pt, (2, 1, 0)))     # (3, Cin, Cout)
            ic = cout
        params.append(ws)
    return params


def reference_forward(x_ncl, params, eps=1e-5):
    """Pure-JAX NCL reference reproducing the PyTorch module (for a sanity check)."""
    x = x_ncl.astype(jnp.float32)                         # (B, C, L)
    for ws in params:
        for w in ws:                                      # w: (3, Cin, Cout)
            B, C, L = x.shape
            xp = jnp.pad(x, ((0, 0), (0, 0), (1, 1)))
            y = sum(jnp.einsum('bcl,cd->bdl', xp[:, :, k:k + L], w[k],
                               precision=jax.lax.Precision.HIGHEST)
                    for k in range(3))
            mean = jnp.mean(y, axis=(1, 2), keepdims=True)
            var = jnp.mean((y - mean) ** 2, axis=(1, 2), keepdims=True)
            y = (y - mean) * jax.lax.rsqrt(var + eps)
            x = jnp.maximum(y, 0.0)
        B, C, L = x.shape
        x = jnp.max(x.reshape(B, C, L // 2, 2), axis=-1)  # MaxPool1d(2, 2)
    return jnp.mean(x, axis=-1)                           # avg_pool1d(L) + flatten


# ----------------------------------------------------------------------------- main

if __name__ == "__main__":
    key = jax.random.PRNGKey(0)
    k_param, k_input = jax.random.split(key)

    # Small shapes consistent with the module: batch=2, in_channels=4, seq=64, nb_fils=8
    # -> channel progression 4 -> 8 -> 16 -> 32 -> 64 -> 64; length 64 -> 2 after 5 pools.
    B, C_in, L = 2, 4, 64
    nb_fils = 8
    reps = (1, 1, 2, 2, 2)

    params = init_vgg_core_params(k_param, C_in, nb_fils, reps)
    x = jax.random.normal(k_input, (B, C_in, L), jnp.float32)

    out = vgg_core_forward(x, params)
    out = jax.block_until_ready(out)
    assert out.shape == (B, nb_fils * 8), out.shape

    ref = reference_forward(x, params)
    max_diff = float(jnp.max(jnp.abs(out - ref)))
    assert max_diff < 5e-2, f"kernel/reference mismatch: {max_diff}"

    print("KERNEL_OK")
</pallas_src>

<mosaic_0001>
module attributes {stable_mosaic.version = 11 : i64} {
  func.func @kernel(%arg0: i32, %arg1: memref<1x64x4xf32, #tpu.memory_space<vmem>>, %arg2: memref<3x4x8xf32, #tpu.memory_space<vmem>>, %arg3: memref<3x8x16xf32, #tpu.memory_space<vmem>>, %arg4: memref<3x16x32xf32, #tpu.memory_space<vmem>>, %arg5: memref<3x32x32xf32, #tpu.memory_space<vmem>>, %arg6: memref<3x32x64xf32, #tpu.memory_space<vmem>>, %arg7: memref<3x64x64xf32, #tpu.memory_space<vmem>>, %arg8: memref<3x64x64xf32, #tpu.memory_space<vmem>>, %arg9: memref<3x64x64xf32, #tpu.memory_space<vmem>>, %arg10: memref<1x1x64xf32, #tpu.memory_space<vmem>>) attributes {dimension_semantics = [#tpu.dimension_semantics<parallel>], iteration_bounds = array<i64: 2>, scalar_prefetch = 0 : i64, scratch_operands = 0 : i64, tpu.core_type = #tpu.core_type<tc>, window_params = [{transform_indices = @transform_0, window_bounds = array<i64: 1, 64, 4>}, {pipeline_mode = #tpu.pipeline_mode<synchronous>, transform_indices = @transform_1, window_bounds = array<i64: 3, 4, 8>}, {pipeline_mode = #tpu.pipeline_mode<synchronous>, transform_indices = @transform_2, window_bounds = array<i64: 3, 8, 16>}, {pipeline_mode = #tpu.pipeline_mode<synchronous>, transform_indices = @transform_3, window_bounds = array<i64: 3, 16, 32>}, {pipeline_mode = #tpu.pipeline_mode<synchronous>, transform_indices = @transform_4, window_bounds = array<i64: 3, 32, 32>}, {pipeline_mode = #tpu.pipeline_mode<synchronous>, transform_indices = @transform_5, window_bounds = array<i64: 3, 32, 64>}, {pipeline_mode = #tpu.pipeline_mode<synchronous>, transform_indices = @transform_6, window_bounds = array<i64: 3, 64, 64>}, {pipeline_mode = #tpu.pipeline_mode<synchronous>, transform_indices = @transform_7, window_bounds = array<i64: 3, 64, 64>}, {pipeline_mode = #tpu.pipeline_mode<synchronous>, transform_indices = @transform_8, window_bounds = array<i64: 3, 64, 64>}, {transform_indices = @transform_9, window_bounds = array<i64: 1, 1, 64>}]} {
    %c0 = arith.constant 0 : index
    %c0_0 = arith.constant 0 : index
    %c0_1 = arith.constant 0 : index
    %0 = vector.load %arg1[%c0, %c0_0, %c0_1] : memref<1x64x4xf32, #tpu.memory_space<vmem>>, vector<1x64x4xf32>
    %1 = vector.shape_cast %0 : vector<1x64x4xf32> to vector<64x4xf32>
    %2 = tpu.iota {dimensions = array<i32: 0>} : vector<64x64xi32>
    %3 = tpu.iota {dimensions = array<i32: 1>} : vector<64x64xi32>
    %c1_i32 = arith.constant 1 : i32
    %4 = vector.broadcast %c1_i32 : i32 to vector<64x64xi32>
    %5 = arith.subi %2, %4 : vector<64x64xi32>
    %6 = arith.cmpi eq, %3, %5 : vector<64x64xi32>
    %7 = arith.extui %6 : vector<64x64xi1> to vector<64x64xi32>
    %8 = arith.sitofp %7 : vector<64x64xi32> to vector<64x64xf32>
    %c1_i32_2 = arith.constant 1 : i32
    %9 = vector.broadcast %c1_i32_2 : i32 to vector<64x64xi32>
    %10 = arith.addi %2, %9 : vector<64x64xi32>
    %11 = arith.cmpi eq, %3, %10 : vector<64x64xi32>
    %12 = arith.extui %11 : vector<64x64xi1> to vector<64x64xi32>
    %13 = arith.sitofp %12 : vector<64x64xi32> to vector<64x64xf32>
    %14 = tpu.iota {dimensions = array<i32: 0>} : vector<32x64xi32>
    %15 = tpu.iota {dimensions = array<i32: 1>} : vector<32x64xi32>
    %c2_i32 = arith.constant 2 : i32
    %16 = vector.broadcast %c2_i32 : i32 to vector<32x64xi32>
    %17 = arith.muli %16, %14 : vector<32x64xi32>
    %18 = arith.cmpi eq, %15, %17 : vector<32x64xi32>
    %19 = arith.extui %18 : vector<32x64xi1> to vector<32x64xi32>
    %20 = arith.sitofp %19 : vector<32x64xi32> to vector<32x64xf32>
    %c2_i32_3 = arith.constant 2 : i32
    %21 = vector.broadcast %c2_i32_3 : i32 to vector<32x64xi32>
    %22 = arith.muli %21, %14 : vector<32x64xi32>
    %c1_i32_4 = arith.constant 1 : i32
    %23 = vector.broadcast %c1_i32_4 : i32 to vector<32x64xi32>
    %24 = arith.addi %22, %23 : vector<32x64xi32>
    %25 = arith.cmpi eq, %15, %24 : vector<32x64xi32>
    %26 = arith.extui %25 : vector<32x64xi1> to vector<32x64xi32>
    %27 = arith.sitofp %26 : vector<32x64xi32> to vector<32x64xf32>
    %cst = arith.constant dense<0.000000e+00> : vector<64x4xf32>
    %28 = tpu.matmul %8, %1, %cst {dimension_numbers = #tpu.dot_dimension_numbers<[1], [0], [0], [1], [0, 0, 1, 1], [], []>} : vector<64x64xf32>, vector<64x4xf32>, vector<64x4xf32> -> vector<64x4xf32>
    %cst_5 = arith.constant dense<0.000000e+00> : vector<64x4xf32>
    %29 = tpu.matmul %13, %1, %cst_5 {dimension_numbers = #tpu.dot_dimension_numbers<[1], [0], [0], [1], [0, 0, 1, 1], [], []>} : vector<64x64xf32>, vector<64x4xf32>, vector<64x4xf32> -> vector<64x4xf32>
    %c0_6 = arith.constant 0 : index
    %c0_7 = arith.constant 0 : index
    %c0_8 = arith.constant 0 : index
    %30 = vector.load %arg2[%c0_6, %c0_7, %c0_8] : memref<3x4x8xf32, #tpu.memory_space<vmem>>, vector<1x4x8xf32>
    %31 = vector.shape_cast %30 : vector<1x4x8xf32> to vector<4x8xf32>
    %cst_9 = arith.constant dense<0.000000e+00> : vector<64x8xf32>
    %32 = tpu.matmul %28, %31, %cst_9 {dimension_numbers = #tpu.dot_dimension_numbers<[1], [0], [0], [1], [0, 0, 1, 1], [], []>} : vector<64x4xf32>, vector<4x8xf32>, vector<64x8xf32> -> vector<64x8xf32>
    %c1 = arith.constant 1 : index
    %c0_10 = arith.constant 0 : index
    %c0_11 = arith.constant 0 : index
    %33 = vector.load %arg2[%c1, %c0_10, %c0_11] : memref<3x4x8xf32, #tpu.memory_space<vmem>>, vector<1x4x8xf32>
    %34 = vector.shape_cast %33 : vector<1x4x8xf32> to vector<4x8xf32>
    %cst_12 = arith.constant dense<0.000000e+00> : vector<64x8xf32>
    %35 = tpu.matmul %1, %34, %cst_12 {dimension_numbers = #tpu.dot_dimension_numbers<[1], [0], [0], [1], [0, 0, 1, 1], [], []>} : vector<64x4xf32>, vector<4x8xf32>, vector<64x8xf32> -> vector<64x8xf32>
    %36 = arith.addf %32, %35 : vector<64x8xf32>
    %c2 = arith.constant 2 : index
    %c0_13 = arith.constant 0 : index
    %c0_14 = arith.constant 0 : index
    %37 = vector.load %arg2[%c2, %c0_13, %c0_14] : memref<3x4x8xf32, #tpu.memory_space<vmem>>, vector<1x4x8xf32>
    %38 = vector.shape_cast %37 : vector<1x4x8xf32> to vector<4x8xf32>
    %cst_15 = arith.constant dense<0.000000e+00> : vector<64x8xf32>
    %39 = tpu.matmul %29, %38, %cst_15 {dimension_numbers = #tpu.dot_dimension_numbers<[1], [0], [0], [1], [0, 0, 1, 1], [], []>} : vector<64x4xf32>, vector<4x8xf32>, vector<64x8xf32> -> vector<64x8xf32>
    %40 = arith.addf %36, %39 : vector<64x8xf32>
    %41 = vector.shape_cast %40 : vector<64x8xf32> to vector<1x64x8xf32>
    %cst_16 = arith.constant dense<0.000000e+00> : vector<1xf32>
    %42 = vector.multi_reduction <add>, %41, %cst_16 [1, 2] : vector<1x64x8xf32> to vector<1xf32>
    %43 = vector.shape_cast %42 : vector<1xf32> to vector<1x1x1xf32>
    %44 = vector.extract %43[0, 0, 0] : f32 from vector<1x1x1xf32>
    %45 = arith.mulf %40, %40 : vector<64x8xf32>
    %46 = vector.shape_cast %45 : vector<64x8xf32> to vector<1x64x8xf32>
    %cst_17 = arith.constant dense<0.000000e+00> : vector<1xf32>
    %47 = vector.multi_reduction <add>, %46, %cst_17 [1, 2] : vector<1x64x8xf32> to vector<1xf32>
    %48 = vector.shape_cast %47 : vector<1xf32> to vector<1x1x1xf32>
    %49 = vector.extract %48[0, 0, 0] : f32 from vector<1x1x1xf32>
    %cst_18 = arith.constant 5.120000e+02 : f32
    %50 = arith.divf %44, %cst_18 : f32
    %cst_19 = arith.constant 5.120000e+02 : f32
    %51 = arith.divf %49, %cst_19 : f32
    %52 = arith.mulf %50, %50 : f32
    %53 = arith.subf %51, %52 : f32
    %cst_20 = arith.constant 0.000000e+00 : f32
    %54 = arith.maximumf %53, %cst_20 : f32
    %55 = vector.broadcast %50 : f32 to vector<64x8xf32>
    %56 = arith.subf %40, %55 : vector<64x8xf32>
    %cst_21 = arith.constant 9.99999974E-6 : f32
    %57 = arith.addf %54, %cst_21 : f32
    %58 = math.rsqrt %57 : f32
    %59 = vector.broadcast %58 : f32 to vector<64x8xf32>
    %60 = arith.mulf %56, %59 : vector<64x8xf32>
    %cst_22 = arith.constant 0.000000e+00 : f32
    %61 = vector.broadcast %cst_22 : f32 to vector<64x8xf32>
    %62 = arith.maximumf %60, %61 : vector<64x8xf32>
    %cst_23 = arith.constant dense<0.000000e+00> : vector<32x8xf32>
    %63 = tpu.matmul %20, %62, %cst_23 {dimension_numbers = #tpu.dot_dimension_numbers<[1], [0], [0], [1], [0, 0, 1, 1], [], []>} : vector<32x64xf32>, vector<64x8xf32>, vector<32x8xf32> -> vector<32x8xf32>
    %cst_24 = arith.constant dense<0.000000e+00> : vector<32x8xf32>
    %64 = tpu.matmul %27, %62, %cst_24 {dimension_numbers = #tpu.dot_dimension_numbers<[1], [0], [0], [1], [0, 0, 1, 1], [], []>} : vector<32x64xf32>, vector<64x8xf32>, vector<32x8xf32> -> vector<32x8xf32>
    %65 = arith.maximumf %63, %64 : vector<32x8xf32>
    %66 = tpu.iota {dimensions = array<i32: 0>} : vector<32x32xi32>
    %67 = tpu.iota {dimensions = array<i32: 1>} : vector<32x32xi32>
    %c1_i32_25 = arith.constant 1 : i32
    %68 = vector.broadcast %c1_i32_25 : i32 to vector<32x32xi32>
    %69 = arith.subi %66, %68 : vector<32x32xi32>
    %70 = arith.cmpi eq, %67, %69 : vector<32x32xi32>
    %71 = arith.extui %70 : vector<32x32xi1> to vector<32x32xi32>
    %72 = arith.sitofp %71 : vector<32x32xi32> to vector<32x32xf32>
    %c1_i32_26 = arith.constant 1 : i32
    %73 = vector.broadcast %c1_i32_26 : i32 to vector<32x32xi32>
    %74 = arith.addi %66, %73 : vector<32x32xi32>
    %75 = arith.cmpi eq, %67, %74 : vector<32x32xi32>
    %76 = arith.extui %75 : vector<32x32xi1> to vector<32x32xi32>
    %77 = arith.sitofp %76 : vector<32x32xi32> to vector<32x32xf32>
    %78 = tpu.iota {dimensions = array<i32: 0>} : vector<16x32xi32>
    %79 = tpu.iota {dimensions = array<i32: 1>} : vector<16x32xi32>
    %c2_i32_27 = arith.constant 2 : i32
    %80 = vector.broadcast %c2_i32_27 : i32 to vector<16x32xi32>
    %81 = arith.muli %80, %78 : vector<16x32xi32>
    %82 = arith.cmpi eq, %79, %81 : vector<16x32xi32>
    %83 = arith.extui %82 : vector<16x32xi1> to vector<16x32xi32>
    %84 = arith.sitofp %83 : vector<16x32xi32> to vector<16x32xf32>
    %c2_i32_28 = arith.constant 2 : i32
    %85 = vector.broadcast %c2_i32_28 : i32 to vector<16x32xi32>
    %86 = arith.muli %85, %78 : vector<16x32xi32>
    %c1_i32_29 = arith.constant 1 : i32
    %87 = vector.broadcast %c1_i32_29 : i32 to vector<16x32xi32>
    %88 = arith.addi %86, %87 : vector<16x32xi32>
    %89 = arith.cmpi eq, %79, %88 : vector<16x32xi32>
    %90 = arith.extui %89 : vector<16x32xi1> to vector<16x32xi32>
    %91 = arith.sitofp %90 : vector<16x32xi32> to vector<16x32xf32>
    %cst_30 = arith.constant dense<0.000000e+00> : vector<32x8xf32>
    %92 = tpu.matmul %72, %65, %cst_30 {dimension_numbers = #tpu.dot_dimension_numbers<[1], [0], [0], [1], [0, 0, 1, 1], [], []>} : vector<32x32xf32>, vector<32x8xf32>, vector<32x8xf32> -> vector<32x8xf32>
    %cst_31 = arith.constant dense<0.000000e+00> : vector<32x8xf32>
    %93 = tpu.matmul %77, %65, %cst_31 {dimension_numbers = #tpu.dot_dimension_numbers<[1], [0], [0], [1], [0, 0, 1, 1], [], []>} : vector<32x32xf32>, vector<32x8xf32>, vector<32x8xf32> -> vector<32x8xf32>
    %c0_32 = arith.constant 0 : index
    %c0_33 = arith.constant 0 : index
    %c0_34 = arith.constant 0 : index
    %94 = vector.load %arg3[%c0_32, %c0_33, %c0_34] : memref<3x8x16xf32, #tpu.memory_space<vmem>>, vector<1x8x16xf32>
    %95 = vector.shape_cast %94 : vector<1x8x16xf32> to vector<8x16xf32>
    %cst_35 = arith.constant dense<0.000000e+00> : vector<32x16xf32>
    %96 = tpu.matmul %92, %95, %cst_35 {dimension_numbers = #tpu.dot_dimension_numbers<[1], [0], [0], [1], [0, 0, 1, 1], [], []>} : vector<32x8xf32>, vector<8x16xf32>, vector<32x16xf32> -> vector<32x16xf32>
    %c1_36 = arith.constant 1 : index
    %c0_37 = arith.constant 0 : index
    %c0_38 = arith.constant 0 : index
    %97 = vector.load %arg3[%c1_36, %c0_37, %c0_38] : memref<3x8x16xf32, #tpu.memory_space<vmem>>, vector<1x8x16xf32>
    %98 = vector.shape_cast %97 : vector<1x8x16xf32> to vector<8x16xf32>
    %cst_39 = arith.constant dense<0.000000e+00> : vector<32x16xf32>
    %99 = tpu.matmul %65, %98, %cst_39 {dimension_numbers = #tpu.dot_dimension_numbers<[1], [0], [0], [1], [0, 0, 1, 1], [], []>} : vector<32x8xf32>, vector<8x16xf32>, vector<32x16xf32> -> vector<32x16xf32>
    %100 = arith.addf %96, %99 : vector<32x16xf32>
    %c2_40 = arith.constant 2 : index
    %c0_41 = arith.constant 0 : index
    %c0_42 = arith.constant 0 : index
    %101 = vector.load %arg3[%c2_40, %c0_41, %c0_42] : memref<3x8x16xf32, #tpu.memory_space<vmem>>, vector<1x8x16xf32>
    %102 = vector.shape_cast %101 : vector<1x8x16xf32> to vector<8x16xf32>
    %cst_43 = arith.constant dense<0.000000e+00> : vector<32x16xf32>
    %103 = tpu.matmul %93, %102, %cst_43 {dimension_numbers = #tpu.dot_dimension_numbers<[1], [0], [0], [1], [0, 0, 1, 1], [], []>} : vector<32x8xf32>, vector<8x16xf32>, vector<32x16xf32> -> vector<32x16xf32>
    %104 = arith.addf %100, %103 : vector<32x16xf32>
    %105 = vector.shape_cast %104 : vector<32x16xf32> to vector<1x32x16xf32>
    %cst_44 = arith.constant dense<0.000000e+00> : vector<1xf32>
    %106 = vector.multi_reduction <add>, %105, %cst_44 [1, 2] : vector<1x32x16xf32> to vector<1xf32>
    %107 = vector.shape_cast %106 : vector<1xf32> to vector<1x1x1xf32>
    %108 = vector.extract %107[0, 0, 0] : f32 from vector<1x1x1xf32>
    %109 = arith.mulf %104, %104 : vector<32x16xf32>
    %110 = vector.shape_cast %109 : vector<32x16xf32> to vector<1x32x16xf32>
    %cst_45 = arith.constant dense<0.000000e+00> : vector<1xf32>
    %111 = vector.multi_reduction <add>, %110, %cst_45 [1, 2] : vector<1x32x16xf32> to vector<1xf32>
    %112 = vector.shape_cast %111 : vector<1xf32> to vector<1x1x1xf32>
    %113 = vector.extract %112[0, 0, 0] : f32 from vector<1x1x1xf32>
    %cst_46 = arith.constant 5.120000e+02 : f32
    %114 = arith.divf %108, %cst_46 : f32
    %cst_47 = arith.constant 5.120000e+02 : f32
    %115 = arith.divf %113, %cst_47 : f32
    %116 = arith.mulf %114, %114 : f32
    %117 = arith.subf %115, %116 : f32
    %cst_48 = arith.constant 0.000000e+00 : f32
    %118 = arith.maximumf %117, %cst_48 : f32
    %119 = vector.broadcast %114 : f32 to vector<32x16xf32>
    %120 = arith.subf %104, %119 : vector<32x16xf32>
    %cst_49 = arith.constant 9.99999974E-6 : f32
    %121 = arith.addf %118, %cst_49 : f32
    %122 = math.rsqrt %121 : f32
    %123 = vector.broadcast %122 : f32 to vector<32x16xf32>
    %124 = arith.mulf %120, %123 : vector<32x16xf32>
    %cst_50 = arith.constant 0.000000e+00 : f32
    %125 = vector.broadcast %cst_50 : f32 to vector<32x16xf32>
    %126 = arith.maximumf %124, %125 : vector<32x16xf32>
    %cst_51 = arith.constant dense<0.000000e+00> : vector<16x16xf32>
    %127 = tpu.matmul %84, %126, %cst_51 {dimension_numbers = #tpu.dot_dimension_numbers<[1], [0], [0], [1], [0, 0, 1, 1], [], []>} : vector<16x32xf32>, vector<32x16xf32>, vector<16x16xf32> -> vector<16x16xf32>
    %cst_52 = arith.constant dense<0.000000e+00> : vector<16x16xf32>
    %128 = tpu.matmul %91, %126, %cst_52 {dimension_numbers = #tpu.dot_dimension_numbers<[1], [0], [0], [1], [0, 0, 1, 1], [], []>} : vector<16x32xf32>, vector<32x16xf32>, vector<16x16xf32> -> vector<16x16xf32>
    %129 = arith.maximumf %127, %128 : vector<16x16xf32>
    %130 = tpu.iota {dimensions = array<i32: 0>} : vector<16x16xi32>
    %131 = tpu.iota {dimensions = array<i32: 1>} : vector<16x16xi32>
    %c1_i32_53 = arith.constant 1 : i32
    %132 = vector.broadcast %c1_i32_53 : i32 to vector<16x16xi32>
    %133 = arith.subi %130, %132 : vector<16x16xi32>
    %134 = arith.cmpi eq, %131, %133 : vector<16x16xi32>
    %135 = arith.extui %134 : vector<16x16xi1> to vector<16x16xi32>
    %136 = arith.sitofp %135 : vector<16x16xi32> to vector<16x16xf32>
    %c1_i32_54 = arith.constant 1 : i32
    %137 = vector.broadcast %c1_i32_54 : i32 to vector<16x16xi32>
    %138 = arith.addi %130, %137 : vector<16x16xi32>
    %139 = arith.cmpi eq, %131, %138 : vector<16x16xi32>
    %140 = arith.extui %139 : vector<16x16xi1> to vector<16x16xi32>
    %141 = arith.sitofp %140 : vector<16x16xi32> to vector<16x16xf32>
    %142 = tpu.iota {dimensions = array<i32: 0>} : vector<8x16xi32>
    %143 = tpu.iota {dimensions = array<i32: 1>} : vector<8x16xi32>
    %c2_i32_55 = arith.constant 2 : i32
    %144 = vector.broadcast %c2_i32_55 : i32 to vector<8x16xi32>
    %145 = arith.muli %144, %142 : vector<8x16xi32>
    %146 = arith.cmpi eq, %143, %145 : vector<8x16xi32>
    %147 = arith.extui %146 : vector<8x16xi1> to vector<8x16xi32>
    %148 = arith.sitofp %147 : vector<8x16xi32> to vector<8x16xf32>
    %c2_i32_56 = arith.constant 2 : i32
    %149 = vector.broadcast %c2_i32_56 : i32 to vector<8x16xi32>
    %150 = arith.muli %149, %142 : vector<8x16xi32>
    %c1_i32_57 = arith.constant 1 : i32
    %151 = vector.broadcast %c1_i32_57 : i32 to vector<8x16xi32>
    %152 = arith.addi %150, %151 : vector<8x16xi32>
    %153 = arith.cmpi eq, %143, %152 : vector<8x16xi32>
    %154 = arith.extui %153 : vector<8x16xi1> to vector<8x16xi32>
    %155 = arith.sitofp %154 : vector<8x16xi32> to vector<8x16xf32>
    %cst_58 = arith.constant dense<0.000000e+00> : vector<16x16xf32>
    %156 = tpu.matmul %136, %129, %cst_58 {dimension_numbers = #tpu.dot_dimension_numbers<[1], [0], [0], [1], [0, 0, 1, 1], [], []>} : vector<16x16xf32>, vector<16x16xf32>, vector<16x16xf32> -> vector<16x16xf32>
    %cst_59 = arith.constant dense<0.000000e+00> : vector<16x16xf32>
    %157 = tpu.matmul %141, %129, %cst_59 {dimension_numbers = #tpu.dot_dimension_numbers<[1], [0], [0], [1], [0, 0, 1, 1], [], []>} : vector<16x16xf32>, vector<16x16xf32>, vector<16x16xf32> -> vector<16x16xf32>
    %c0_60 = arith.constant 0 : index
    %c0_61 = arith.constant 0 : index
    %c0_62 = arith.constant 0 : index
    %158 = vector.load %arg4[%c0_60, %c0_61, %c0_62] : memref<3x16x32xf32, #tpu.memory_space<vmem>>, vector<1x16x32xf32>
    %159 = vector.shape_cast %158 : vector<1x16x32xf32> to vector<16x32xf32>
    %cst_63 = arith.constant dense<0.000000e+00> : vector<16x32xf32>
    %160 = tpu.matmul %156, %159, %cst_63 {dimension_numbers = #tpu.dot_dimension_numbers<[1], [0], [0], [1], [0, 0, 1, 1], [], []>} : vector<16x16xf32>, vector<16x32xf32>, vector<16x32xf32> -> vector<16x32xf32>
    %c1_64 = arith.constant 1 : index
    %c0_65 = arith.constant 0 : index
    %c0_66 = arith.constant 0 : index
    %161 = vector.load %arg4[%c1_64, %c0_65, %c0_66] : memref<3x16x32xf32, #tpu.memory_space<vmem>>, vector<1x16x32xf32>
    %162 = vector.shape_cast %161 : vector<1x16x32xf32> to vector<16x32xf32>
    %cst_67 = arith.constant dense<0.000000e+00> : vector<16x32xf32>
    %163 = tpu.matmul %129, %162, %cst_67 {dimension_numbers = #tpu.dot_dimension_numbers<[1], [0], [0], [1], [0, 0, 1, 1], [], []>} : vector<16x16xf32>, vector<16x32xf32>, vector<16x32xf32> -> vector<16x32xf32>
    %164 = arith.addf %160, %163 : vector<16x32xf32>
    %c2_68 = arith.constant 2 : index
    %c0_69 = arith.constant 0 : index
    %c0_70 = arith.constant 0 : index
    %165 = vector.load %arg4[%c2_68, %c0_69, %c0_70] : memref<3x16x32xf32, #tpu.memory_space<vmem>>, vector<1x16x32xf32>
    %166 = vector.shape_cast %165 : vector<1x16x32xf32> to vector<16x32xf32>
    %cst_71 = arith.constant dense<0.000000e+00> : vector<16x32xf32>
    %167 = tpu.matmul %157, %166, %cst_71 {dimension_numbers = #tpu.dot_dimension_numbers<[1], [0], [0], [1], [0, 0, 1, 1], [], []>} : vector<16x16xf32>, vector<16x32xf32>, vector<16x32xf32> -> vector<16x32xf32>
    %168 = arith.addf %164, %167 : vector<16x32xf32>
    %169 = vector.shape_cast %168 : vector<16x32xf32> to vector<1x16x32xf32>
    %cst_72 = arith.constant dense<0.000000e+00> : vector<1xf32>
    %170 = vector.multi_reduction <add>, %169, %cst_72 [1, 2] : vector<1x16x32xf32> to vector<1xf32>
    %171 = vector.shape_cast %170 : vector<1xf32> to vector<1x1x1xf32>
    %172 = vector.extract %171[0, 0, 0] : f32 from vector<1x1x1xf32>
    %173 = arith.mulf %168, %168 : vector<16x32xf32>
    %174 = vector.shape_cast %173 : vector<16x32xf32> to vector<1x16x32xf32>
    %cst_73 = arith.constant dense<0.000000e+00> : vector<1xf32>
    %175 = vector.multi_reduction <add>, %174, %cst_73 [1, 2] : vector<1x16x32xf32> to vector<1xf32>
    %176 = vector.shape_cast %175 : vector<1xf32> to vector<1x1x1xf32>
    %177 = vector.extract %176[0, 0, 0] : f32 from vector<1x1x1xf32>
    %cst_74 = arith.constant 5.120000e+02 : f32
    %178 = arith.divf %172, %cst_74 : f32
    %cst_75 = arith.constant 5.120000e+02 : f32
    %179 = arith.divf %177, %cst_75 : f32
    %180 = arith.mulf %178, %178 : f32
    %181 = arith.subf %179, %180 : f32
    %cst_76 = arith.constant 0.000000e+00 : f32
    %182 = arith.maximumf %181, %cst_76 : f32
    %183 = vector.broadcast %178 : f32 to vector<16x32xf32>
    %184 = arith.subf %168, %183 : vector<16x32xf32>
    %cst_77 = arith.constant 9.99999974E-6 : f32
    %185 = arith.addf %182, %cst_77 : f32
    %186 = math.rsqrt %185 : f32
    %187 = vector.broadcast %186 : f32 to vector<16x32xf32>
    %188 = arith.mulf %184, %187 : vector<16x32xf32>
    %cst_78 = arith.constant 0.000000e+00 : f32
    %189 = vector.broadcast %cst_78 : f32 to vector<16x32xf32>
    %190 = arith.maximumf %188, %189 : vector<16x32xf32>
    %cst_79 = arith.constant dense<0.000000e+00> : vector<16x32xf32>
    %191 = tpu.matmul %136, %190, %cst_79 {dimension_numbers = #tpu.dot_dimension_numbers<[1], [0], [0], [1], [0, 0, 1, 1], [], []>} : vector<16x16xf32>, vector<16x32xf32>, vector<16x32xf32> -> vector<16x32xf32>
    %cst_80 = arith.constant dense<0.000000e+00> : vector<16x32xf32>
    %192 = tpu.matmul %141, %190, %cst_80 {dimension_numbers = #tpu.dot_dimension_numbers<[1], [0], [0], [1], [0, 0, 1, 1], [], []>} : vector<16x16xf32>, vector<16x32xf32>, vector<16x32xf32> -> vector<16x32xf32>
    %c0_81 = arith.constant 0 : index
    %c0_82 = arith.constant 0 : index
    %c0_83 = arith.constant 0 : index
    %193 = vector.load %arg5[%c0_81, %c0_82, %c0_83] : memref<3x32x32xf32, #tpu.memory_space<vmem>>, vector<1x32x32xf32>
    %194 = vector.shape_cast %193 : vector<1x32x32xf32> to vector<32x32xf32>
    %cst_84 = arith.constant dense<0.000000e+00> : vector<16x32xf32>
    %195 = tpu.matmul %191, %194, %cst_84 {dimension_numbers = #tpu.dot_dimension_numbers<[1], [0], [0], [1], [0, 0, 1, 1], [], []>} : vector<16x32xf32>, vector<32x32xf32>, vector<16x32xf32> -> vector<16x32xf32>
    %c1_85 = arith.constant 1 : index
    %c0_86 = arith.constant 0 : index
    %c0_87 = arith.constant 0 : index
    %196 = vector.load %arg5[%c1_85, %c0_86, %c0_87] : memref<3x32x32xf32, #tpu.memory_space<vmem>>, vector<1x32x32xf32>
    %197 = vector.shape_cast %196 : vector<1x32x32xf32> to vector<32x32xf32>
    %cst_88 = arith.constant dense<0.000000e+00> : vector<16x32xf32>
    %198 = tpu.matmul %190, %197, %cst_88 {dimension_numbers = #tpu.dot_dimension_numbers<[1], [0], [0], [1], [0, 0, 1, 1], [], []>} : vector<16x32xf32>, vector<32x32xf32>, vector<16x32xf32> -> vector<16x32xf32>
    %199 = arith.addf %195, %198 : vector<16x32xf32>
    %c2_89 = arith.constant 2 : index
    %c0_90 = arith.constant 0 : index
    %c0_91 = arith.constant 0 : index
    %200 = vector.load %arg5[%c2_89, %c0_90, %c0_91] : memref<3x32x32xf32, #tpu.memory_space<vmem>>, vector<1x32x32xf32>
    %201 = vector.shape_cast %200 : vector<1x32x32xf32> to vector<32x32xf32>
    %cst_92 = arith.constant dense<0.000000e+00> : vector<16x32xf32>
    %202 = tpu.matmul %192, %201, %cst_92 {dimension_numbers = #tpu.dot_dimension_numbers<[1], [0], [0], [1], [0, 0, 1, 1], [], []>} : vector<16x32xf32>, vector<32x32xf32>, vector<16x32xf32> -> vector<16x32xf32>
    %203 = arith.addf %199, %202 : vector<16x32xf32>
    %204 = vector.shape_cast %203 : vector<16x32xf32> to vector<1x16x32xf32>
    %cst_93 = arith.constant dense<0.000000e+00> : vector<1xf32>
    %205 = vector.multi_reduction <add>, %204, %cst_93 [1, 2] : vector<1x16x32xf32> to vector<1xf32>
    %206 = vector.shape_cast %205 : vector<1xf32> to vector<1x1x1xf32>
    %207 = vector.extract %206[0, 0, 0] : f32 from vector<1x1x1xf32>
    %208 = arith.mulf %203, %203 : vector<16x32xf32>
    %209 = vector.shape_cast %208 : vector<16x32xf32> to vector<1x16x32xf32>
    %cst_94 = arith.constant dense<0.000000e+00> : vector<1xf32>
    %210 = vector.multi_reduction <add>, %209, %cst_94 [1, 2] : vector<1x16x32xf32> to vector<1xf32>
    %211 = vector.shape_cast %210 : vector<1xf32> to vector<1x1x1xf32>
    %212 = vector.extract %211[0, 0, 0] : f32 from vector<1x1x1xf32>
    %cst_95 = arith.constant 5.120000e+02 : f32
    %213 = arith.divf %207, %cst_95 : f32
    %cst_96 = arith.constant 5.120000e+02 : f32
    %214 = arith.divf %212, %cst_96 : f32
    %215 = arith.mulf %213, %213 : f32
    %216 = arith.subf %214, %215 : f32
    %cst_97 = arith.constant 0.000000e+00 : f32
    %217 = arith.maximumf %216, %cst_97 : f32
    %218 = vector.broadcast %213 : f32 to vector<16x32xf32>
    %219 = arith.subf %203, %218 : vector<16x32xf32>
    %cst_98 = arith.constant 9.99999974E-6 : f32
    %220 = arith.addf %217, %cst_98 : f32
    %221 = math.rsqrt %220 : f32
    %222 = vector.broadcast %221 : f32 to vector<16x32xf32>
    %223 = arith.mulf %219, %222 : vector<16x32xf32>
    %cst_99 = arith.constant 0.000000e+00 : f32
    %224 = vector.broadcast %cst_99 : f32 to vector<16x32xf32>
    %225 = arith.maximumf %223, %224 : vector<16x32xf32>
    %cst_100 = arith.constant dense<0.000000e+00> : vector<8x32xf32>
    %226 = tpu.matmul %148, %225, %cst_100 {dimension_numbers = #tpu.dot_dimension_numbers<[1], [0], [0], [1], [0, 0, 1, 1], [], []>} : vector<8x16xf32>, vector<16x32xf32>, vector<8x32xf32> -> vector<8x32xf32>
    %cst_101 = arith.constant dense<0.000000e+00> : vector<8x32xf32>
    %227 = tpu.matmul %155, %225, %cst_101 {dimension_numbers = #tpu.dot_dimension_numbers<[1], [0], [0], [1], [0, 0, 1, 1], [], []>} : vector<8x16xf32>, vector<16x32xf32>, vector<8x32xf32> -> vector<8x32xf32>
    %228 = arith.maximumf %226, %227 : vector<8x32xf32>
    %229 = tpu.iota {dimensions = array<i32: 0>} : vector<8x8xi32>
    %230 = tpu.iota {dimensions = array<i32: 1>} : vector<8x8xi32>
    %c1_i32_102 = arith.constant 1 : i32
    %231 = vector.broadcast %c1_i32_102 : i32 to vector<8x8xi32>
    %232 = arith.subi %229, %231 : vector<8x8xi32>
    %233 = arith.cmpi eq, %230, %232 : vector<8x8xi32>
    %234 = arith.extui %233 : vector<8x8xi1> to vector<8x8xi32>
    %235 = arith.sitofp %234 : vector<8x8xi32> to vector<8x8xf32>
    %c1_i32_103 = arith.constant 1 : i32
    %236 = vector.broadcast %c1_i32_103 : i32 to vector<8x8xi32>
    %237 = arith.addi %229, %236 : vector<8x8xi32>
    %238 = arith.cmpi eq, %230, %237 : vector<8x8xi32>
    %239 = arith.extui %238 : vector<8x8xi1> to vector<8x8xi32>
    %240 = arith.sitofp %239 : vector<8x8xi32> to vector<8x8xf32>
    %241 = tpu.iota {dimensions = array<i32: 0>} : vector<4x8xi32>
    %242 = tpu.iota {dimensions = array<i32: 1>} : vector<4x8xi32>
    %c2_i32_104 = arith.constant 2 : i32
    %243 = vector.broadcast %c2_i32_104 : i32 to vector<4x8xi32>
    %244 = arith.muli %243, %241 : vector<4x8xi32>
    %245 = arith.cmpi eq, %242, %244 : vector<4x8xi32>
    %246 = arith.extui %245 : vector<4x8xi1> to vector<4x8xi32>
    %247 = arith.sitofp %246 : vector<4x8xi32> to vector<4x8xf32>
    %c2_i32_105 = arith.constant 2 : i32
    %248 = vector.broadcast %c2_i32_105 : i32 to vector<4x8xi32>
    %249 = arith.muli %248, %241 : vector<4x8xi32>
    %c1_i32_106 = arith.constant 1 : i32
    %250 = vector.broadcast %c1_i32_106 : i32 to vector<4x8xi32>
    %251 = arith.addi %249, %250 : vector<4x8xi32>
    %252 = arith.cmpi eq, %242, %251 : vector<4x8xi32>
    %253 = arith.extui %252 : vector<4x8xi1> to vector<4x8xi32>
    %254 = arith.sitofp %253 : vector<4x8xi32> to vector<4x8xf32>
    %cst_107 = arith.constant dense<0.000000e+00> : vector<8x32xf32>
    %255 = tpu.matmul %235, %228, %cst_107 {dimension_numbers = #tpu.dot_dimension_numbers<[1], [0], [0], [1], [0, 0, 1, 1], [], []>} : vector<8x8xf32>, vector<8x32xf32>, vector<8x32xf32> -> vector<8x32xf32>
    %cst_108 = arith.constant dense<0.000000e+00> : vector<8x32xf32>
    %256 = tpu.matmul %240, %228, %cst_108 {dimension_numbers = #tpu.dot_dimension_numbers<[1], [0], [0], [1], [0, 0, 1, 1], [], []>} : vector<8x8xf32>, vector<8x32xf32>, vector<8x32xf32> -> vector<8x32xf32>
    %c0_109 = arith.constant 0 : index
    %c0_110 = arith.constant 0 : index
    %c0_111 = arith.constant 0 : index
    %257 = vector.load %arg6[%c0_109, %c0_110, %c0_111] : memref<3x32x64xf32, #tpu.memory_space<vmem>>, vector<1x32x64xf32>
    %258 = vector.shape_cast %257 : vector<1x32x64xf32> to vector<32x64xf32>
    %cst_112 = arith.constant dense<0.000000e+00> : vector<8x64xf32>
    %259 = tpu.matmul %255, %258, %cst_112 {dimension_numbers = #tpu.dot_dimension_numbers<[1], [0], [0], [1], [0, 0, 1, 1], [], []>} : vector<8x32xf32>, vector<32x64xf32>, vector<8x64xf32> -> vector<8x64xf32>
    %c1_113 = arith.constant 1 : index
    %c0_114 = arith.constant 0 : index
    %c0_115 = arith.constant 0 : index
    %260 = vector.load %arg6[%c1_113, %c0_114, %c0_115] : memref<3x32x64xf32, #tpu.memory_space<vmem>>, vector<1x32x64xf32>
    %261 = vector.shape_cast %260 : vector<1x32x64xf32> to vector<32x64xf32>
    %cst_116 = arith.constant dense<0.000000e+00> : vector<8x64xf32>
    %262 = tpu.matmul %228, %261, %cst_116 {dimension_numbers = #tpu.dot_dimension_numbers<[1], [0], [0], [1], [0, 0, 1, 1], [], []>} : vector<8x32xf32>, vector<32x64xf32>, vector<8x64xf32> -> vector<8x64xf32>
    %263 = arith.addf %259, %262 : vector<8x64xf32>
    %c2_117 = arith.constant 2 : index
    %c0_118 = arith.constant 0 : index
    %c0_119 = arith.constant 0 : index
    %264 = vector.load %arg6[%c2_117, %c0_118, %c0_119] : memref<3x32x64xf32, #tpu.memory_space<vmem>>, vector<1x32x64xf32>
    %265 = vector.shape_cast %264 : vector<1x32x64xf32> to vector<32x64xf32>
    %cst_120 = arith.constant dense<0.000000e+00> : vector<8x64xf32>
    %266 = tpu.matmul %256, %265, %cst_120 {dimension_numbers = #tpu.dot_dimension_numbers<[1], [0], [0], [1], [0, 0, 1, 1], [], []>} : vector<8x32xf32>, vector<32x64xf32>, vector<8x64xf32> -> vector<8x64xf32>
    %267 = arith.addf %263, %266 : vector<8x64xf32>
    %268 = vector.shape_cast %267 : vector<8x64xf32> to vector<1x8x64xf32>
    %cst_121 = arith.constant dense<0.000000e+00> : vector<1xf32>
    %269 = vector.multi_reduction <add>, %268, %cst_121 [1, 2] : vector<1x8x64xf32> to vector<1xf32>
    %270 = vector.shape_cast %269 : vector<1xf32> to vector<1x1x1xf32>
    %271 = vector.extract %270[0, 0, 0] : f32 from vector<1x1x1xf32>
    %272 = arith.mulf %267, %267 : vector<8x64xf32>
    %273 = vector.shape_cast %272 : vector<8x64xf32> to vector<1x8x64xf32>
    %cst_122 = arith.constant dense<0.000000e+00> : vector<1xf32>
    %274 = vector.multi_reduction <add>, %273, %cst_122 [1, 2] : vector<1x8x64xf32> to vector<1xf32>
    %275 = vector.shape_cast %274 : vector<1xf32> to vector<1x1x1xf32>
    %276 = vector.extract %275[0, 0, 0] : f32 from vector<1x1x1xf32>
    %cst_123 = arith.constant 5.120000e+02 : f32
    %277 = arith.divf %271, %cst_123 : f32
    %cst_124 = arith.constant 5.120000e+02 : f32
    %278 = arith.divf %276, %cst_124 : f32
    %279 = arith.mulf %277, %277 : f32
    %280 = arith.subf %278, %279 : f32
    %cst_125 = arith.constant 0.000000e+00 : f32
    %281 = arith.maximumf %280, %cst_125 : f32
    %282 = vector.broadcast %277 : f32 to vector<8x64xf32>
    %283 = arith.subf %267, %282 : vector<8x64xf32>
    %cst_126 = arith.constant 9.99999974E-6 : f32
    %284 = arith.addf %281, %cst_126 : f32
    %285 = math.rsqrt %284 : f32
    %286 = vector.broadcast %285 : f32 to vector<8x64xf32>
    %287 = arith.mulf %283, %286 : vector<8x64xf32>
    %cst_127 = arith.constant 0.000000e+00 : f32
    %288 = vector.broadcast %cst_127 : f32 to vector<8x64xf32>
    %289 = arith.maximumf %287, %288 : vector<8x64xf32>
    %cst_128 = arith.constant dense<0.000000e+00> : vector<8x64xf32>
    %290 = tpu.matmul %235, %289, %cst_128 {dimension_numbers = #tpu.dot_dimension_numbers<[1], [0], [0], [1], [0, 0, 1, 1], [], []>} : vector<8x8xf32>, vector<8x64xf32>, vector<8x64xf32> -> vector<8x64xf32>
    %cst_129 = arith.constant dense<0.000000e+00> : vector<8x64xf32>
    %291 = tpu.matmul %240, %289, %cst_129 {dimension_numbers = #tpu.dot_dimension_numbers<[1], [0], [0], [1], [0, 0, 1, 1], [], []>} : vector<8x8xf32>, vector<8x64xf32>, vector<8x64xf32> -> vector<8x64xf32>
    %c0_130 = arith.constant 0 : index
    %c0_131 = arith.constant 0 : index
    %c0_132 = arith.constant 0 : index
    %292 = vector.load %arg7[%c0_130, %c0_131, %c0_132] : memref<3x64x64xf32, #tpu.memory_space<vmem>>, vector<1x64x64xf32>
    %293 = vector.shape_cast %292 : vector<1x64x64xf32> to vector<64x64xf32>
    %cst_133 = arith.constant dense<0.000000e+00> : vector<8x64xf32>
    %294 = tpu.matmul %290, %293, %cst_133 {dimension_numbers = #tpu.dot_dimension_numbers<[1], [0], [0], [1], [0, 0, 1, 1], [], []>} : vector<8x64xf32>, vector<64x64xf32>, vector<8x64xf32> -> vector<8x64xf32>
    %c1_134 = arith.constant 1 : index
    %c0_135 = arith.constant 0 : index
    %c0_136 = arith.constant 0 : index
    %295 = vector.load %arg7[%c1_134, %c0_135, %c0_136] : memref<3x64x64xf32, #tpu.memory_space<vmem>>, vector<1x64x64xf32>
    %296 = vector.shape_cast %295 : vector<1x64x64xf32> to vector<64x64xf32>
    %cst_137 = arith.constant dense<0.000000e+00> : vector<8x64xf32>
    %297 = tpu.matmul %289, %296, %cst_137 {dimension_numbers = #tpu.dot_dimension_numbers<[1], [0], [0], [1], [0, 0, 1, 1], [], []>} : vector<8x64xf32>, vector<64x64xf32>, vector<8x64xf32> -> vector<8x64xf32>
    %298 = arith.addf %294, %297 : vector<8x64xf32>
    %c2_138 = arith.constant 2 : index
    %c0_139 = arith.constant 0 : index
    %c0_140 = arith.constant 0 : index
    %299 = vector.load %arg7[%c2_138, %c0_139, %c0_140] : memref<3x64x64xf32, #tpu.memory_space<vmem>>, vector<1x64x64xf32>
    %300 = vector.shape_cast %299 : vector<1x64x64xf32> to vector<64x64xf32>
    %cst_141 = arith.constant dense<0.000000e+00> : vector<8x64xf32>
    %301 = tpu.matmul %291, %300, %cst_141 {dimension_numbers = #tpu.dot_dimension_numbers<[1], [0], [0], [1], [0, 0, 1, 1], [], []>} : vector<8x64xf32>, vector<64x64xf32>, vector<8x64xf32> -> vector<8x64xf32>
    %302 = arith.addf %298, %301 : vector<8x64xf32>
    %303 = vector.shape_cast %302 : vector<8x64xf32> to vector<1x8x64xf32>
    %cst_142 = arith.constant dense<0.000000e+00> : vector<1xf32>
    %304 = vector.multi_reduction <add>, %303, %cst_142 [1, 2] : vector<1x8x64xf32> to vector<1xf32>
    %305 = vector.shape_cast %304 : vector<1xf32> to vector<1x1x1xf32>
    %306 = vector.extract %305[0, 0, 0] : f32 from vector<1x1x1xf32>
    %307 = arith.mulf %302, %302 : vector<8x64xf32>
    %308 = vector.shape_cast %307 : vector<8x64xf32> to vector<1x8x64xf32>
    %cst_143 = arith.constant dense<0.000000e+00> : vector<1xf32>
    %309 = vector.multi_reduction <add>, %308, %cst_143 [1, 2] : vector<1x8x64xf32> to vector<1xf32>
    %310 = vector.shape_cast %309 : vector<1xf32> to vector<1x1x1xf32>
    %311 = vector.extract %310[0, 0, 0] : f32 from vector<1x1x1xf32>
    %cst_144 = arith.constant 5.120000e+02 : f32
    %312 = arith.divf %306, %cst_144 : f32
    %cst_145 = arith.constant 5.120000e+02 : f32
    %313 = arith.divf %311, %cst_145 : f32
    %314 = arith.mulf %312, %312 : f32
    %315 = arith.subf %313, %314 : f32
    %cst_146 = arith.constant 0.000000e+00 : f32
    %316 = arith.maximumf %315, %cst_146 : f32
    %317 = vector.broadcast %312 : f32 to vector<8x64xf32>
    %318 = arith.subf %302, %317 : vector<8x64xf32>
    %cst_147 = arith.constant 9.99999974E-6 : f32
    %319 = arith.addf %316, %cst_147 : f32
    %320 = math.rsqrt %319 : f32
    %321 = vector.broadcast %320 : f32 to vector<8x64xf32>
    %322 = arith.mulf %318, %321 : vector<8x64xf32>
    %cst_148 = arith.constant 0.000000e+00 : f32
    %323 = vector.broadcast %cst_148 : f32 to vector<8x64xf32>
    %324 = arith.maximumf %322, %323 : vector<8x64xf32>
    %cst_149 = arith.constant dense<0.000000e+00> : vector<4x64xf32>
    %325 = tpu.matmul %247, %324, %cst_149 {dimension_numbers = #tpu.dot_dimension_numbers<[1], [0], [0], [1], [0, 0, 1, 1], [], []>} : vector<4x8xf32>, vector<8x64xf32>, vector<4x64xf32> -> vector<4x64xf32>
    %cst_150 = arith.constant dense<0.000000e+00> : vector<4x64xf32>
    %326 = tpu.matmul %254, %324, %cst_150 {dimension_numbers = #tpu.dot_dimension_numbers<[1], [0], [0], [1], [0, 0, 1, 1], [], []>} : vector<4x8xf32>, vector<8x64xf32>, vector<4x64xf32> -> vector<4x64xf32>
    %327 = arith.maximumf %325, %326 : vector<4x64xf32>
    %328 = tpu.iota {dimensions = array<i32: 0>} : vector<4x4xi32>
    %329 = tpu.iota {dimensions = array<i32: 1>} : vector<4x4xi32>
    %c1_i32_151 = arith.constant 1 : i32
    %330 = vector.broadcast %c1_i32_151 : i32 to vector<4x4xi32>
    %331 = arith.subi %328, %330 : vector<4x4xi32>
    %332 = arith.cmpi eq, %329, %331 : vector<4x4xi32>
    %333 = arith.extui %332 : vector<4x4xi1> to vector<4x4xi32>
    %334 = arith.sitofp %333 : vector<4x4xi32> to vector<4x4xf32>
    %c1_i32_152 = arith.constant 1 : i32
    %335 = vector.broadcast %c1_i32_152 : i32 to vector<4x4xi32>
    %336 = arith.addi %328, %335 : vector<4x4xi32>
    %337 = arith.cmpi eq, %329, %336 : vector<4x4xi32>
    %338 = arith.extui %337 : vector<4x4xi1> to vector<4x4xi32>
    %339 = arith.sitofp %338 : vector<4x4xi32> to vector<4x4xf32>
    %340 = tpu.iota {dimensions = array<i32: 0>} : vector<2x4xi32>
    %341 = tpu.iota {dimensions = array<i32: 1>} : vector<2x4xi32>
    %c2_i32_153 = arith.constant 2 : i32
    %342 = vector.broadcast %c2_i32_153 : i32 to vector<2x4xi32>
    %343 = arith.muli %342, %340 : vector<2x4xi32>
    %344 = arith.cmpi eq, %341, %343 : vector<2x4xi32>
    %345 = arith.extui %344 : vector<2x4xi1> to vector<2x4xi32>
    %346 = arith.sitofp %345 : vector<2x4xi32> to vector<2x4xf32>
    %c2_i32_154 = arith.constant 2 : i32
    %347 = vector.broadcast %c2_i32_154 : i32 to vector<2x4xi32>
    %348 = arith.muli %347, %340 : vector<2x4xi32>
    %c1_i32_155 = arith.constant 1 : i32
    %349 = vector.broadcast %c1_i32_155 : i32 to vector<2x4xi32>
    %350 = arith.addi %348, %349 : vector<2x4xi32>
    %351 = arith.cmpi eq, %341, %350 : vector<2x4xi32>
    %352 = arith.extui %351 : vector<2x4xi1> to vector<2x4xi32>
    %353 = arith.sitofp %352 : vector<2x4xi32> to vector<2x4xf32>
    %cst_156 = arith.constant dense<0.000000e+00> : vector<4x64xf32>
    %354 = tpu.matmul %334, %327, %cst_156 {dimension_numbers = #tpu.dot_dimension_numbers<[1], [0], [0], [1], [0, 0, 1, 1], [], []>} : vector<4x4xf32>, vector<4x64xf32>, vector<4x64xf32> -> vector<4x64xf32>
    %cst_157 = arith.constant dense<0.000000e+00> : vector<4x64xf32>
    %355 = tpu.matmul %339, %327, %cst_157 {dimension_numbers = #tpu.dot_dimension_numbers<[1], [0], [0], [1], [0, 0, 1, 1], [], []>} : vector<4x4xf32>, vector<4x64xf32>, vector<4x64xf32> -> vector<4x64xf32>
    %c0_158 = arith.constant 0 : index
    %c0_159 = arith.constant 0 : index
    %c0_160 = arith.constant 0 : index
    %356 = vector.load %arg8[%c0_158, %c0_159, %c0_160] : memref<3x64x64xf32, #tpu.memory_space<vmem>>, vector<1x64x64xf32>
    %357 = vector.shape_cast %356 : vector<1x64x64xf32> to vector<64x64xf32>
    %cst_161 = arith.constant dense<0.000000e+00> : vector<4x64xf32>
    %358 = tpu.matmul %354, %357, %cst_161 {dimension_numbers = #tpu.dot_dimension_numbers<[1], [0], [0], [1], [0, 0, 1, 1], [], []>} : vector<4x64xf32>, vector<64x64xf32>, vector<4x64xf32> -> vector<4x64xf32>
    %c1_162 = arith.constant 1 : index
    %c0_163 = arith.constant 0 : index
    %c0_164 = arith.constant 0 : index
    %359 = vector.load %arg8[%c1_162, %c0_163, %c0_164] : memref<3x64x64xf32, #tpu.memory_space<vmem>>, vector<1x64x64xf32>
    %360 = vector.shape_cast %359 : vector<1x64x64xf32> to vector<64x64xf32>
    %cst_165 = arith.constant dense<0.000000e+00> : vector<4x64xf32>
    %361 = tpu.matmul %327, %360, %cst_165 {dimension_numbers = #tpu.dot_dimension_numbers<[1], [0], [0], [1], [0, 0, 1, 1], [], []>} : vector<4x64xf32>, vector<64x64xf32>, vector<4x64xf32> -> vector<4x64xf32>
    %362 = arith.addf %358, %361 : vector<4x64xf32>
    %c2_166 = arith.constant 2 : index
    %c0_167 = arith.constant 0 : index
    %c0_168 = arith.constant 0 : index
    %363 = vector.load %arg8[%c2_166, %c0_167, %c0_168] : memref<3x64x64xf32, #tpu.memory_space<vmem>>, vector<1x64x64xf32>
    %364 = vector.shape_cast %363 : vector<1x64x64xf32> to vector<64x64xf32>
    %cst_169 = arith.constant dense<0.000000e+00> : vector<4x64xf32>
    %365 = tpu.matmul %355, %364, %cst_169 {dimension_numbers = #tpu.dot_dimension_numbers<[1], [0], [0], [1], [0, 0, 1, 1], [], []>} : vector<4x64xf32>, vector<64x64xf32>, vector<4x64xf32> -> vector<4x64xf32>
    %366 = arith.addf %362, %365 : vector<4x64xf32>
    %367 = vector.shape_cast %366 : vector<4x64xf32> to vector<1x4x64xf32>
    %cst_170 = arith.constant dense<0.000000e+00> : vector<1xf32>
    %368 = vector.multi_reduction <add>, %367, %cst_170 [1, 2] : vector<1x4x64xf32> to vector<1xf32>
    %369 = vector.shape_cast %368 : vector<1xf32> to vector<1x1x1xf32>
    %370 = vector.extract %369[0, 0, 0] : f32 from vector<1x1x1xf32>
    %371 = arith.mulf %366, %366 : vector<4x64xf32>
    %372 = vector.shape_cast %371 : vector<4x64xf32> to vector<1x4x64xf32>
    %cst_171 = arith.constant dense<0.000000e+00> : vector<1xf32>
    %373 = vector.multi_reduction <add>, %372, %cst_171 [1, 2] : vector<1x4x64xf32> to vector<1xf32>
    %374 = vector.shape_cast %373 : vector<1xf32> to vector<1x1x1xf32>
    %375 = vector.extract %374[0, 0, 0] : f32 from vector<1x1x1xf32>
    %cst_172 = arith.constant 2.560000e+02 : f32
    %376 = arith.divf %370, %cst_172 : f32
    %cst_173 = arith.constant 2.560000e+02 : f32
    %377 = arith.divf %375, %cst_173 : f32
    %378 = arith.mulf %376, %376 : f32
    %379 = arith.subf %377, %378 : f32
    %cst_174 = arith.constant 0.000000e+00 : f32
    %380 = arith.maximumf %379, %cst_174 : f32
    %381 = vector.broadcast %376 : f32 to vector<4x64xf32>
    %382 = arith.subf %366, %381 : vector<4x64xf32>
    %cst_175 = arith.constant 9.99999974E-6 : f32
    %383 = arith.addf %380, %cst_175 : f32
    %384 = math.rsqrt %383 : f32
    %385 = vector.broadcast %384 : f32 to vector<4x64xf32>
    %386 = arith.mulf %382, %385 : vector<4x64xf32>
    %cst_176 = arith.constant 0.000000e+00 : f32
    %387 = vector.broadcast %cst_176 : f32 to vector<4x64xf32>
    %388 = arith.maximumf %386, %387 : vector<4x64xf32>
    %cst_177 = arith.constant dense<0.000000e+00> : vector<4x64xf32>
    %389 = tpu.matmul %334, %388, %cst_177 {dimension_numbers = #tpu.dot_dimension_numbers<[1], [0], [0], [1], [0, 0, 1, 1], [], []>} : vector<4x4xf32>, vector<4x64xf32>, vector<4x64xf32> -> vector<4x64xf32>
    %cst_178 = arith.constant dense<0.000000e+00> : vector<4x64xf32>
    %390 = tpu.matmul %339, %388, %cst_178 {dimension_numbers = #tpu.dot_dimension_numbers<[1], [0], [0], [1], [0, 0, 1, 1], [], []>} : vector<4x4xf32>, vector<4x64xf32>, vector<4x64xf32> -> vector<4x64xf32>
    %c0_179 = arith.constant 0 : index
    %c0_180 = arith.constant 0 : index
    %c0_181 = arith.constant 0 : index
    %391 = vector.load %arg9[%c0_179, %c0_180, %c0_181] : memref<3x64x64xf32, #tpu.memory_space<vmem>>, vector<1x64x64xf32>
    %392 = vector.shape_cast %391 : vector<1x64x64xf32> to vector<64x64xf32>
    %cst_182 = arith.constant dense<0.000000e+00> : vector<4x64xf32>
    %393 = tpu.matmul %389, %392, %cst_182 {dimension_numbers = #tpu.dot_dimension_numbers<[1], [0], [0], [1], [0, 0, 1, 1], [], []>} : vector<4x64xf32>, vector<64x64xf32>, vector<4x64xf32> -> vector<4x64xf32>
    %c1_183 = arith.constant 1 : index
    %c0_184 = arith.constant 0 : index
    %c0_185 = arith.constant 0 : index
    %394 = vector.load %arg9[%c1_183, %c0_184, %c0_185] : memref<3x64x64xf32, #tpu.memory_space<vmem>>, vector<1x64x64xf32>
    %395 = vector.shape_cast %394 : vector<1x64x64xf32> to vector<64x64xf32>
    %cst_186 = arith.constant dense<0.000000e+00> : vector<4x64xf32>
    %396 = tpu.matmul %388, %395, %cst_186 {dimension_numbers = #tpu.dot_dimension_numbers<[1], [0], [0], [1], [0, 0, 1, 1], [], []>} : vector<4x64xf32>, vector<64x64xf32>, vector<4x64xf32> -> vector<4x64xf32>
    %397 = arith.addf %393, %396 : vector<4x64xf32>
    %c2_187 = arith.constant 2 : index
    %c0_188 = arith.constant 0 : index
    %c0_189 = arith.constant 0 : index
    %398 = vector.load %arg9[%c2_187, %c0_188, %c0_189] : memref<3x64x64xf32, #tpu.memory_space<vmem>>, vector<1x64x64xf32>
    %399 = vector.shape_cast %398 : vector<1x64x64xf32> to vector<64x64xf32>
    %cst_190 = arith.constant dense<0.000000e+00> : vector<4x64xf32>
    %400 = tpu.matmul %390, %399, %cst_190 {dimension_numbers = #tpu.dot_dimension_numbers<[1], [0], [0], [1], [0, 0, 1, 1], [], []>} : vector<4x64xf32>, vector<64x64xf32>, vector<4x64xf32> -> vector<4x64xf32>
    %401 = arith.addf %397, %400 : vector<4x64xf32>
    %402 = vector.shape_cast %401 : vector<4x64xf32> to vector<1x4x64xf32>
    %cst_191 = arith.constant dense<0.000000e+00> : vector<1xf32>
    %403 = vector.multi_reduction <add>, %402, %cst_191 [1, 2] : vector<1x4x64xf32> to vector<1xf32>
    %404 = vector.shape_cast %403 : vector<1xf32> to vector<1x1x1xf32>
    %405 = vector.extract %404[0, 0, 0] : f32 from vector<1x1x1xf32>
    %406 = arith.mulf %401, %401 : vector<4x64xf32>
    %407 = vector.shape_cast %406 : vector<4x64xf32> to vector<1x4x64xf32>
    %cst_192 = arith.constant dense<0.000000e+00> : vector<1xf32>
    %408 = vector.multi_reduction <add>, %407, %cst_192 [1, 2] : vector<1x4x64xf32> to vector<1xf32>
    %409 = vector.shape_cast %408 : vector<1xf32> to vector<1x1x1xf32>
    %410 = vector.extract %409[0, 0, 0] : f32 from vector<1x1x1xf32>
    %cst_193 = arith.constant 2.560000e+02 : f32
    %411 = arith.divf %405, %cst_193 : f32
    %cst_194 = arith.constant 2.560000e+02 : f32
    %412 = arith.divf %410, %cst_194 : f32
    %413 = arith.mulf %411, %411 : f32
    %414 = arith.subf %412, %413 : f32
    %cst_195 = arith.constant 0.000000e+00 : f32
    %415 = arith.maximumf %414, %cst_195 : f32
    %416 = vector.broadcast %411 : f32 to vector<4x64xf32>
    %417 = arith.subf %401, %416 : vector<4x64xf32>
    %cst_196 = arith.constant 9.99999974E-6 : f32
    %418 = arith.addf %415, %cst_196 : f32
    %419 = math.rsqrt %418 : f32
    %420 = vector.broadcast %419 : f32 to vector<4x64xf32>
    %421 = arith.mulf %417, %420 : vector<4x64xf32>
    %cst_197 = arith.constant 0.000000e+00 : f32
    %422 = vector.broadcast %cst_197 : f32 to vector<4x64xf32>
    %423 = arith.maximumf %421, %422 : vector<4x64xf32>
    %cst_198 = arith.constant dense<0.000000e+00> : vector<2x64xf32>
    %424 = tpu.matmul %346, %423, %cst_198 {dimension_numbers = #tpu.dot_dimension_numbers<[1], [0], [0], [1], [0, 0, 1, 1], [], []>} : vector<2x4xf32>, vector<4x64xf32>, vector<2x64xf32> -> vector<2x64xf32>
    %cst_199 = arith.constant dense<0.000000e+00> : vector<2x64xf32>
    %425 = tpu.matmul %353, %423, %cst_199 {dimension_numbers = #tpu.dot_dimension_numbers<[1], [0], [0], [1], [0, 0, 1, 1], [], []>} : vector<2x4xf32>, vector<4x64xf32>, vector<2x64xf32> -> vector<2x64xf32>
    %426 = arith.maximumf %424, %425 : vector<2x64xf32>
    %cst_200 = arith.constant dense<0.000000e+00> : vector<64xf32>
    %427 = vector.multi_reduction <add>, %426, %cst_200 [0] : vector<2x64xf32> to vector<64xf32>
    %428 = vector.shape_cast %427 : vector<64xf32> to vector<1x64xf32>
    %cst_201 = arith.constant 2.000000e+00 : f32
    %429 = vector.broadcast %cst_201 : f32 to vector<1x64xf32>
    %430 = arith.divf %428, %429 : vector<1x64xf32>
    %c0_202 = arith.constant 0 : index
    %c0_203 = arith.constant 0 : index
    %c0_204 = arith.constant 0 : index
    %431 = vector.load %arg10[%c0_202, %c0_203, %c0_204] : memref<1x1x64xf32, #tpu.memory_space<vmem>>, vector<1x1x64xf32>
    %432 = vector.shape_cast %431 : vector<1x1x64xf32> to vector<1x64xf32>
    %433 = vector.shape_cast %430 : vector<1x64xf32> to vector<1x1x64xf32>
    tpu.vector_store %arg10[%c0_202, %c0_203, %c0_204], %433 {strides = array<i32>} : memref<1x1x64xf32, #tpu.memory_space<vmem>>, vector<1x1x64xf32>,
    return
  }
  func.func @transform_0(%arg0: i32) -> (i32, i32, i32) {
    %c0_i32 = arith.constant 0 : i32
    %c0_i32_0 = arith.constant 0 : i32
    %c0_i32_1 = arith.constant 0 : i32
    return %arg0, %c0_i32, %c0_i32_0 : i32, i32, i32
  }
  func.func @transform_1(%arg0: i32) -> (i32, i32, i32) {
    %c0_i32 = arith.constant 0 : i32
    %c0_i32_0 = arith.constant 0 : i32
    %c0_i32_1 = arith.constant 0 : i32
    %c0_i32_2 = arith.constant 0 : i32
    return %c0_i32, %c0_i32_0, %c0_i32_1 : i32, i32, i32
  }
  func.func @transform_2(%arg0: i32) -> (i32, i32, i32) {
    %c0_i32 = arith.constant 0 : i32
    %c0_i32_0 = arith.constant 0 : i32
    %c0_i32_1 = arith.constant 0 : i32
    %c0_i32_2 = arith.constant 0 : i32
    return %c0_i32, %c0_i32_0, %c0_i32_1 : i32, i32, i32
  }
  func.func @transform_3(%arg0: i32) -> (i32, i32, i32) {
    %c0_i32 = arith.constant 0 : i32
    %c0_i32_0 = arith.constant 0 : i32
    %c0_i32_1 = arith.constant 0 : i32
    %c0_i32_2 = arith.constant 0 : i32
    return %c0_i32, %c0_i32_0, %c0_i32_1 : i32, i32, i32
  }
  func.func @transform_4(%arg0: i32) -> (i32, i32, i32) {
    %c0_i32 = arith.constant 0 : i32
    %c0_i32_0 = arith.constant 0 : i32
    %c0_i32_1 = arith.constant 0 : i32
    %c0_i32_2 = arith.constant 0 : i32
    return %c0_i32, %c0_i32_0, %c0_i32_1 : i32, i32, i32
  }
  func.func @transform_5(%arg0: i32) -> (i32, i32, i32) {
    %c0_i32 = arith.constant 0 : i32
    %c0_i32_0 = arith.constant 0 : i32
    %c0_i32_1 = arith.constant 0 : i32
    %c0_i32_2 = arith.constant 0 : i32
    return %c0_i32, %c0_i32_0, %c0_i32_1 : i32, i32, i32
  }
  func.func @transform_6(%arg0: i32) -> (i32, i32, i32) {
    %c0_i32 = arith.constant 0 : i32
    %c0_i32_0 = arith.constant 0 : i32
    %c0_i32_1 = arith.constant 0 : i32
    %c0_i32_2 = arith.constant 0 : i32
    return %c0_i32, %c0_i32_0, %c0_i32_1 : i32, i32, i32
  }
  func.func @transform_7(%arg0: i32) -> (i32, i32, i32) {
    %c0_i32 = arith.constant 0 : i32
    %c0_i32_0 = arith.constant 0 : i32
    %c0_i32_1 = arith.constant 0 : i32
    %c0_i32_2 = arith.constant 0 : i32
    return %c0_i32, %c0_i32_0, %c0_i32_1 : i32, i32, i32
  }
  func.func @transform_8(%arg0: i32) -> (i32, i32, i32) {
    %c0_i32 = arith.constant 0 : i32
    %c0_i32_0 = arith.constant 0 : i32
    %c0_i32_1 = arith.constant 0 : i32
    %c0_i32_2 = arith.constant 0 : i32
    return %c0_i32, %c0_i32_0, %c0_i32_1 : i32, i32, i32
  }
  func.func @transform_9(%arg0: i32) -> (i32, i32, i32) {
    %c0_i32 = arith.constant 0 : i32
    %c0_i32_0 = arith.constant 0 : i32
    %c0_i32_1 = arith.constant 0 : i32
    return %arg0, %c0_i32, %c0_i32_0 : i32, i32, i32
  }
}

</mosaic_0001>

<bundles_post_ra>
// kernel: vgg_core_forward.1
= control target key start
LH: loop header
LB: loop body
LE: loop exit
PB: predicated region body
PF: predicated region fallthrough
CT: control target
= control target key end

     0   :  { %s7789_s0 = inlined_call_operand.vmem [shape: f32[2,64,4], index: 0, kind: input, shape index: {}]   ;;  %s7790_s1 = inlined_call_operand.hbm [shape: f32[3,4,8], index: 1, kind: input, shape index: {}]   ;;  %s7791_s2 = inlined_call_operand.hbm [shape: f32[3,8,16], index: 2, kind: input, shape index: {}]   ;;  %s7792_s3 = inlined_call_operand.vmem [shape: f32[3,16,32], index: 3, kind: input, shape index: {}]   ;;  %s7793_s4 = inlined_call_operand.vmem [shape: f32[3,32,32], index: 4, kind: input, shape index: {}]   ;;  %s7794_s5 = inlined_call_operand.hbm [shape: f32[3,32,64], index: 5, kind: input, shape index: {}]   ;;  %s7795_s6 = inlined_call_operand.hbm [shape: f32[3,64,64], index: 6, kind: input, shape index: {}]   ;;  %s7796_s7 = inlined_call_operand.hbm [shape: f32[3,64,64], index: 7, kind: input, shape index: {}]   ;;  %s7797_s8 = inlined_call_operand.hbm [shape: f32[3,64,64], index: 8, kind: input, shape index: {}]   ;;  %s7798_s9 = inlined_call_operand.hbm [shape: f32[2,1,64], index: 9, kind: output, shape index: {}]  }
   0x1   :  { %7804 = sst [smem:[#allocation20_spill]] %s7791_s2 }
   0x2   :  { %14 = vsyncpa [#allocation3], 0 }
   0x3   :  { %15 = vsyncpa [#allocation6], 0 }
   0x4   :  { %16 = vsyncpa [#allocation9], 0 }
   0x5   :  { %17 = vsyncpa [#allocation12], 0 }
   0x6   :  { %18 = vsyncpa [#allocation4], 0 }
   0x7   :  { %20 = vsyncpa [#allocation4 + $0x1], 0  ;;  %s6937_s30 = smov 0   ;;  %s6939_s10 = smov 0  }
   0x8   :  { %s6941_s11 = smov 0   ;;  %s6943_s12 = smov 0  }
   0x9 LB: > { %s6958_s13 = sadd.s32 4294967295, %s6871_s12   ;;  %s5401_s14 = sadd.s32 4294967294, %s6871_s12   ;;  %s6871_s12 = sphi %s6943_s12, %s7826_s12   ;;  %s6867_s11 = sphi %s6941_s11, %s7825_s11   ;;  %s6863_s10 = sphi %s6939_s10, %s7824_s10   ;;  %s6859_s30 = sphi %s6937_s30, %s7823_s30  }
   0xa   : > { %s6962_s15 = sadd.s32 1, %s6871_s12   ;;  %s227_s16 = sadd.s32 1, %s6867_s11 }
   0xb   : > { %s224_s17 = ssub.s32 %s6871_s12, %s6962_s15  ;;  %p237_p0 = scmp.ne.s32.totalorder %s6867_s11, %s6863_s10 }
   0xc   : > { %p225_p1 = scmp.eq.s32.totalorder %s224_s17, 0  ;;  %p238_p2 = scmp.eq.s32.totalorder %s6958_s13, 1 }
   0xd   : > { %p243_p3 = scmp.ne.s32.totalorder %s6863_s10, %s6859_s30  ;;  %p244_p4 = scmp.eq.s32.totalorder %s5401_s14, 1 }
   0xe   : > { %s6973_s18 = scalar_select %p225_p1, %s6867_s11, %s227_s16  }
   0xf   : > { %p6975_p5 = por %p238_p2, %p237_p0  ;;  %p6979_p6 = por %p244_p4, %p243_p3 }
  0x10   : > { %7805 = sst [smem:[#allocation19_spill]] %s6973_s18  ;;  %p5402_p7 = scmp.ge.s32.totalorder %s6871_s12, 1 }
  0x11   : > { %p251_p8 = scmp.lt.s32.totalorder %s6871_s12, 3  ;;  %p7799_p9 = scmp.eq.s32.totalorder %s6958_s13, 0 }
  0x12   : > { %s6873_s22 = smov [#allocation5]   ;;  %s6874_s25 = smov [#allocation8]  }
  0x13   : > { %p6986_p10 = pnand %p5402_p7, %p251_p8  ;;  %s276_s23 = sshll.u32 %s6873_s22, 4  ;;  %s277_s23 = int_to_ptr.vmem [resolvable:$true] %s276_s23 }
  0x14   : > { %s308_s26 = sshll.u32 %s6874_s25, 4  ;;  %s6875_s27 = smov [#allocation2]   ;;  %s309_s26 = int_to_ptr.vmem [resolvable:$true] %s308_s26 }
  0x15   : > { %p6542_p11 = pneg %p6986_p10  ;;  %s263_s28 = sshll.u32 %s6875_s27, 4  ;;  %s264_s28 = int_to_ptr.vmem [resolvable:$true] %s263_s28 }
  0x16   : > { %s6650_s14 = scalar_lea.vmem %s277_s23, 384  ;;  %p6658_p3 = scmp.lt.s32.totalorder %s277_s23, %s277_s23 }
  0x17   : > { %p6994_p12 = pnand %p7799_p9, %p6542_p11  ;;  %p6651_p0 = scmp.ne.s32.totalorder %s277_s23, %s6650_s14 }
  0x18   : > { %p6659_p4 = scmp.lt.s32.totalorder %s6650_s14, %s6650_s14 }
  0x19   : > { %p7000_p13 = pneg %p6994_p12 }
  0x1a   : > { %p6660_p7 = por %p6659_p4, %p6658_p3 }
  0x1b   : > { %p6653_p1 = pnand %p6651_p0, %p7000_p13 }
  0x1d   : > { %p6654_p2 = pneg %p6653_p1 }
  0x1f   : > { %p6661_p8 = pnand %p6660_p7, %p6654_p2 }
  0x21   : > { %6664 = shalt.err (!%p6661_p8)
}
  0x22   : > { %s7800_s16 = smov 128   ;;  %s7802_s17 = smov 8  }
  0x23   : > { %s7811_s2 = sld [smem:[#allocation20_spill]]  ;;  %s6676_s27 = scalar_lea.vmem %s309_s26, 3072 }
  0x24   : > { %p6677_p11 = scmp.ne.s32.totalorder %s309_s26, %s6676_s27  ;;  %p6684_p3 = scmp.lt.s32.totalorder %s309_s26, %s309_s26 }
  0x25   : > { %p6685_p2 = scmp.lt.s32.totalorder %s6676_s27, %s6676_s27 }
  0x26   : > { %p6679_p0 = pnand %p6677_p11, %p7000_p13 }
  0x27   : > { %p6686_p4 = por %p6685_p2, %p6684_p3 }
  0x28   : > { %p6680_p1 = pneg %p6679_p0 }
  0x29   : > { %6548 = dma.hbm_to_vmem [thread:$0]  (!%p6994_p12), %s7811_s2, 384, %s277_s23, [#allocation6], %s7800_s16, %s7800_s16, %s7802_s17  }
  0x2a   : > { %p6687_p7 = pnand %p6686_p4, %p6680_p1 }
  0x2c   : > { %6690 = shalt.err (!%p6687_p7)
}
  0x2d   : > { %6554 = dma.hbm_to_vmem [thread:$0]  (!%p6994_p12), %s7795_s6, 3072, %s309_s26, [#allocation9], %s7800_s16, %s7800_s16, %s7802_s17  }
  0x2e   : > { %s6702_s23 = scalar_lea.vmem %s264_s28, 192  ;;  %p6710_p9 = scmp.lt.s32.totalorder %s264_s28, %s264_s28 }
  0x2f   : > { %p6703_p8 = scmp.ne.s32.totalorder %s264_s28, %s6702_s23  ;;  %p6711_p3 = scmp.lt.s32.totalorder %s6702_s23, %s6702_s23 }
  0x31   : > { %p6705_p11 = pnand %p6703_p8, %p7000_p13  ;;  %p6712_p1 = por %p6711_p3, %p6710_p9 }
  0x33   : > { %p6706_p0 = pneg %p6705_p11 }
  0x35   : > { %p6713_p2 = pnand %p6712_p1, %p6706_p0 }
  0x37   : > { %6716 = shalt.err (!%p6713_p2)
}
  0x38   : > { %s6878_s22 = smov 64   ;;  %s6879_s25 = smov 4  }
  0x39   : > { %6545 = dma.hbm_to_vmem [thread:$0]  (!%p6994_p12), %s7790_s1, 192, %s264_s28, [#allocation3], %s6878_s22, %s6878_s22, %s6879_s25  }
  0x3a   : > { %s6880_s26 = smov [#allocation7]   ;;  %s6881_s16 = smov [#allocation10]  }
  0x3b   : > { %s295_s14 = sshll.u32 %s6880_s26, 4  ;;  %s321_s17 = sshll.u32 %s6881_s16, 4  ;;  %s296_s14 = int_to_ptr.vmem [resolvable:$true] %s295_s14  ;;  %s322_s17 = int_to_ptr.vmem [resolvable:$true] %s321_s17 }
  0x3c   : > { %s6728_s2 = scalar_lea.vmem %s296_s14, 1536  ;;  %p6736_p8 = scmp.lt.s32.totalorder %s296_s14, %s296_s14 }
  0x3d   : > { %p6729_p4 = scmp.ne.s32.totalorder %s296_s14, %s6728_s2  ;;  %p6737_p11 = scmp.lt.s32.totalorder %s6728_s2, %s6728_s2 }
  0x3f   : > { %p6731_p9 = pnand %p6729_p4, %p7000_p13  ;;  %p6738_p0 = por %p6737_p11, %p6736_p8 }
  0x41   : > { %p6732_p7 = pneg %p6731_p9 }
  0x43   : > { %p6739_p3 = pnand %p6738_p0, %p6732_p7 }
  0x45   : > { %6742 = shalt.err (!%p6739_p3)
}
  0x46   : > { %s7812_s23 = smov 8   ;;  %s7813_s27 = smov 128  }
  0x47   : > { %6551 = dma.hbm_to_vmem [thread:$0]  (!%p6994_p12), %s7794_s5, 1536, %s296_s14, [#allocation6], %s7813_s27, %s7813_s27, %s7812_s23  }
  0x48   : > { %s6754_s16 = scalar_lea.vmem %s322_s17, 3072  ;;  %p6762_p9 = scmp.lt.s32.totalorder %s322_s17, %s322_s17 }
  0x49   : > { %p6755_p1 = scmp.ne.s32.totalorder %s322_s17, %s6754_s16  ;;  %p6763_p8 = scmp.lt.s32.totalorder %s6754_s16, %s6754_s16 }
  0x4b   : > { %p6757_p2 = pnand %p6755_p1, %p7000_p13  ;;  %p6764_p7 = por %p6763_p8, %p6762_p9 }
  0x4d   : > { %p6758_p4 = pneg %p6757_p2 }
  0x4f   : > { %p6765_p11 = pnand %p6764_p7, %p6758_p4 }
  0x51   : > { %6768 = shalt.err (!%p6765_p11)
}
  0x52   : > { %6557 = dma.hbm_to_vmem [thread:$0]  (!%p6994_p12), %s7796_s7, 3072, %s322_s17, [#allocation9], %s7813_s27, %s7813_s27, %s7812_s23  }
  0x53   : > { %s6882_s18 = smov [#allocation11]  }
  0x54   : > { %s334_s26 = sshll.u32 %s6882_s18, 4  ;;  %s335_s26 = int_to_ptr.vmem [resolvable:$true] %s334_s26 }
  0x55   : > { %s6780_s14 = scalar_lea.vmem %s335_s26, 3072  ;;  %p6788_p2 = scmp.lt.s32.totalorder %s335_s26, %s335_s26 }
  0x56   : > { %p6781_p0 = scmp.ne.s32.totalorder %s335_s26, %s6780_s14  ;;  %p6789_p4 = scmp.lt.s32.totalorder %s6780_s14, %s6780_s14 }
  0x58   : > { %p6783_p3 = pnand %p6781_p0, %p7000_p13  ;;  %p6790_p9 = por %p6789_p4, %p6788_p2 }
  0x5a   : > { %p6784_p1 = pneg %p6783_p3 }
  0x5c   : > { %p6791_p8 = pnand %p6790_p9, %p6784_p1 }
  0x5e   : > { %6794 = shalt.err (!%p6791_p8)
}
  0x5f   : > { %6560 = dma.hbm_to_vmem [thread:$0]  (!%p6994_p12), %s7797_s8, 3072, %s335_s26, [#allocation12], %s7813_s27, %s7813_s27, %s7812_s23  }
  0x60   : > { %358 = sbr.rel (%p6986_p10) target bundleno = 6636 (0x19ec), region = 56  ;;  %p7814_p13 = scmp.eq.s32.totalorder (!%p6986_p10), %s6958_s13, 0 }
  0x65   : > { %6838 = dma.done.wait (%p7814_p13), [#allocation3], 192   ;;  %p7815_p7 = pmov %p7814_p13 }
  0x67   : > { %6840 = vsyncadd (%p7815_p7), [#allocation3], 4294967104  ;;  %p7816_p11 = pmov %p7815_p7 }
  0x68   : > { %p7817_p0 = pmov %p7815_p7 }
  0x69   : > { %6842 = dma.done.wait (%p7816_p11), [#allocation6], 1920  }
  0x6a   : > { %6844 = vsyncadd (%p7817_p0), [#allocation6], 4294965376  ;;  %p7818_p3 = pmov %p7817_p0 }
  0x6b   : > { %p7819_p12 = pmov %p7817_p0 }
  0x6c   : > { %6846 = dma.done.wait (%p7818_p3), [#allocation9], 6144  }
  0x6d   : > { %6848 = vsyncadd (%p7819_p12), [#allocation9], 4294961152  ;;  %p7820_p10 = pmov %p7817_p0 }
  0x6e   : > { %p7821_p1 = pmov %p7817_p0 }
  0x6f   : > { %6850 = dma.done.wait (%p7820_p10), [#allocation12], 3072  }
  0x70   : > { %6852 = vsyncadd (%p7821_p1), [#allocation12], 4294964224  ;;  %p413_p2 = scmp.lt.s32.totalorder %s6958_s13, 1  ;;  %v426_v0 = vlaneseq  ;;  %v6883_v26 = vmov 0.0   ;;  %vm533_vm6 = vcmask 523264   ;;  %vm820_vm7 = vcmask 1043456  }
  0x71   : > { %v794_v39 = vld [vmem:[#allocation2 + $0x4] sm:$0xf]  ;;  %v792_v40 = vld [vmem:[#allocation2] sm:$0xf]  ;;  %v1062_v47 = vld [vmem:[#allocation2 + $0x8] sm:$0xf] }
  0x72   : > { %s414_s21 = scalar_select %p413_p2, %s6958_s13, 1  ;;  %v7086_v1 = vshrl.u32 %v426_v0, 7  ;;  %v7116_v8 = vand.u32 127, %v426_v0 }
  0x73   : > { %s6884_s14 = smov 0.0  }
  0x74   : > { %s5593_s24 = sshll.u32 %s414_s21, 6  ;;  %v7102_v5 = vadd.s32 8, %v7086_v1  ;;  %v7107_v6 = vadd.s32 16, %v7086_v1  ;;  %v5419_v9 = vadd.s32 4294967295, %v7086_v1  ;;  %v469_v11 = vadd.s32 1, %v7086_v1 }
  0x75   : > { %s7084_s27 = scalar_lea.vmem %s7789_s0, %s5593_s24  ;;  %v7131_v15 = vadd.s32 24, %v7086_v1  ;;  %v431_v16 = vadd.s32 32, %v7086_v1  ;;  %v432_v25 = vadd.s32 40, %v7086_v1  ;;  %v433_v28 = vadd.s32 48, %v7086_v1 }
  0x76   : > { %v7089_v2 = vld [vmem:[%s7084_s27 + $0x38] sm:$0xff]  ;;  %v7092_v3 = vld [vmem:[%s7084_s27 + $0x30] sm:$0xff]  ;;  %v7099_v4 = vld [vmem:[%s7084_s27 + $0x28] sm:$0xff]  ;;  %v5420_v12 = vadd.s32 4294967295, %v7102_v5  ;;  %v470_v13 = vadd.s32 1, %v7102_v5  ;;  %v5421_v14 = vadd.s32 4294967295, %v7107_v6  ;;  %vm445_vm0 = vcmp.eq.s32.totalorder %v7116_v8, %v5419_v9 }
  0x77   : > { %5892 = vmatprep.subr.mxu0 %v7089_v2  ;;  %5920 = vmatprep.subr.mxu1 %v7089_v2  ;;  %v7112_v7 = vld [vmem:[%s7084_s27 + $0x20] sm:$0xff]  ;;  %v7122_v10 = vld [vmem:[%s7084_s27 + $0x18] sm:$0xff]  ;;  %v7137_v17 = vld [vmem:[%s7084_s27 + $0x10] sm:$0xff]  ;;  %v471_v18 = vadd.s32 1, %v7107_v6  ;;  %vm477_vm1 = vcmp.eq.s32.totalorder %v7116_v8, %v469_v11  ;;  %v5422_v20 = vadd.s32 4294967295, %v7131_v15  ;;  %v472_v21 = vadd.s32 1, %v7131_v15 }
  0x78   : > { %5893 = vmatpush3.msra.mxu0 %v7089_v2  ;;  %5921 = vmatpush3.msra.mxu1 %v7089_v2  ;;  %v7146_v19 = vld [vmem:[%s7084_s27 + $0x8] sm:$0xff]  ;;  %vm446_vm2 = vcmp.eq.s32.totalorder %v7116_v8, %v5420_v12  ;;  %vm478_vm3 = vcmp.eq.s32.totalorder %v7116_v8, %v470_v13  ;;  %vm447_vm4 = vcmp.eq.s32.totalorder %v7116_v8, %v5421_v14  ;;  %v5423_v22 = vadd.s32 4294967295, %v431_v16  ;;  %v7159_v23 = vld [vmem:[%s7084_s27] sm:$0xff] }
  0x79   : > { %5894 = vmatprep.subr.mxu0 %v7092_v3  ;;  %5922 = vmatprep.subr.mxu1 %v7092_v3  ;;  %vm479_vm5 = vcmp.eq.s32.totalorder %v7116_v8, %v471_v18  ;;  %v473_v24 = vadd.s32 1, %v431_v16  ;;  %v7168_v27 = vsel %vm445_vm0, 1.0, %v6883_v26  ;;  %v7176_v29 = vsel %vm477_vm1, 1.0, %v6883_v26 }
  0x7a   : > { %5895 = vmatpush3.msra.mxu0 %v7092_v3  ;;  %5923 = vmatpush3.msra.mxu1 %v7092_v3  ;;  %v7181_v30 = vsel %vm446_vm2, 1.0, %v6883_v26  ;;  %v7186_v31 = vsel %vm478_vm3, 1.0, %v6883_v26  ;;  %v7191_v32 = vsel %vm447_vm4, 1.0, %v6883_v26  ;;  %v7198_v33 = vsel %vm479_vm5, 1.0, %v6883_v26 }
  0x7b   : > { %5896 = vmatprep.subr.mxu0 %v7099_v4  ;;  %5924 = vmatprep.subr.mxu1 %v7099_v4  ;;  %vm448_vm8 = vcmp.eq.s32.totalorder %v7116_v8, %v5422_v20  ;;  %vm480_vm9 = vcmp.eq.s32.totalorder %v7116_v8, %v472_v21  ;;  %vm449_vm10 = vcmp.eq.s32.totalorder %v7116_v8, %v5423_v22  ;;  %v5424_v34 = vadd.s32 4294967295, %v432_v25 }
  0x7c   : > { %5897 = vmatpush3.msra.mxu0 %v7099_v4  ;;  %5925 = vmatpush3.msra.mxu1 %v7099_v4  ;;  %vm481_vm11 = vcmp.eq.s32.totalorder %v7116_v8, %v473_v24  ;;  %v474_v35 = vadd.s32 1, %v432_v25  ;;  %v434_v36 = vadd.s32 56, %v7086_v1  ;;  %v5425_v37 = vadd.s32 4294967295, %v433_v28 }
  0x7d   : > { %5898 = vmatprep.subr.mxu0 %v7112_v7  ;;  %5926 = vmatprep.subr.mxu1 %v7112_v7  ;;  %v475_v38 = vadd.s32 1, %v433_v28  ;;  %v7222_v41 = vsel %vm448_vm8, 1.0, %v6883_v26  ;;  %v7227_v42 = vsel %vm480_vm9, 1.0, %v6883_v26  ;;  %v5431_v43 = vsel %vm449_vm10, 1.0, %v6883_v26 }
  0x7e   : > { %5899 = vmatpush3.msra.mxu0 %v7112_v7  ;;  %5927 = vmatpush3.msra.mxu1 %v7112_v7  ;;  %v5439_v44 = vsel %vm481_vm11, 1.0, %v6883_v26  ;;  %vm450_vm12 = vcmp.eq.s32.totalorder %v7116_v8, %v5424_v34  ;;  %vm482_vm13 = vcmp.eq.s32.totalorder %v7116_v8, %v474_v35  ;;  %v5426_v45 = vadd.s32 4294967295, %v434_v36 }
  0x7f   : > { %5900 = vmatprep.subr.mxu0 %v7122_v10  ;;  %5928 = vmatprep.subr.mxu1 %v7122_v10  ;;  %v476_v46 = vadd.s32 1, %v434_v36  ;;  %vm451_vm14 = vcmp.eq.s32.totalorder %v7116_v8, %v5425_v37  ;;  %vm483_vm15 = vcmp.eq.s32.totalorder %v7116_v8, %v475_v38  ;;  %v5432_v48 = vsel %vm450_vm12, 1.0, %v6883_v26 }
  0x80   : > { %5901 = vmatpush3.msra.mxu0 %v7122_v10  ;;  %5929 = vmatpush3.msra.mxu1 %v7122_v10  ;;  %v5440_v49 = vsel %vm482_vm13, 1.0, %v6883_v26  ;;  %v5433_v50 = vsel %vm451_vm14, 1.0, %v6883_v26  ;;  %v5441_v51 = vsel %vm483_vm15, 1.0, %v6883_v26  ;;  %vm452_vm0 = vcmp.eq.s32.totalorder %v7116_v8, %v5426_v45 }
  0x81   : > { %5902 = vmatprep.subr.mxu0 %v7137_v17  ;;  %5930 = vmatprep.subr.mxu1 %v7137_v17  ;;  %vm484_vm1 = vcmp.eq.s32.totalorder %v7116_v8, %v476_v46  ;;  %v5434_v52 = vsel %vm452_vm0, 1.0, %v6883_v26  ;;  %vm795_vm2 = vcmask 31744   ;;  %vm1203_vm3 = vcmask 64512  }
  0x82   : > { %5903 = vmatpush3.msra.mxu0 %v7137_v17  ;;  %5931 = vmatpush3.msra.mxu1 %v7137_v17  ;;  %v5442_v53 = vsel %vm484_vm1, 1.0, %v6883_v26  ;;  %vm1497_vm14 = vcmask 261120   ;;  %vm1984_vm15 = vcmask 130048   ;;  %vm6885_vm0 = vmmov 0  }
  0x83   : > { %5904 = vmatprep.subr.mxu0 %v7146_v19  ;;  %5932 = vmatprep.subr.mxu1 %v7146_v19  ;;  %vm4646_vm1 = vcmask 519168  }
  0x84   : > { %5905 = vmatpush3.msra.mxu0 %v7146_v19  ;;  %5933 = vmatpush3.msra.mxu1 %v7146_v19 }
  0x85   : > { %5906 = vmatprep.subr.mxu0 %v7159_v23  ;;  %5934 = vmatprep.subr.mxu1 %v7159_v23 }
  0x86   : > { %5907 = vmatpush3.msra.mxu0 %v7159_v23  ;;  %5908 = vmatprep.mubr.msk.f32.mxu0 %vm533_vm6, %v7168_v27 }
  0x87   : > { %5935 = vmatpush3.msra.mxu1 %v7159_v23  ;;  %5936 = vmatprep.mubr.msk.f32.mxu1 %vm533_vm6, %v7176_v29 }
  0x88   : > { %5909 = vmatmul.mubr.msk.f32.vlgmr.msra.gmra.mxu0 %vm533_vm6, %v7181_v30  ;;  %5937 = vmatmul.mubr.msk.f32.vlgmr.msra.gmra.mxu1 %vm533_vm6, %v7186_v31 }
  0x89   : > { %5911 = vmatprep.mubr.msk.f32.mxu0 %vm533_vm6, %v7191_v32  ;;  %5939 = vmatprep.mubr.msk.f32.mxu1 %vm533_vm6, %v7198_v33 }
  0x8a   : > { %5948 = vmatprep.subr.msk.mxu0 %vm820_vm7, %v794_v39  ;;  %5962 = vmatprep.subr.msk.mxu1 %vm820_vm7, %v792_v40 }
  0x8b   : > { %5949 = vmatpush3.msk.msra.mxu0 %vm820_vm7, %v794_v39  ;;  %5963 = vmatpush3.msk.msra.mxu1 %vm820_vm7, %v792_v40 }
  0x8c   : > { %5912 = vmatmul.mubr.msk.f32.gmra.mxu0 %vm533_vm6, %v7222_v41  ;;  %5940 = vmatmul.mubr.msk.f32.gmra.mxu1 %vm533_vm6, %v7227_v42 }
  0x8d   : > { %5914 = vmatprep.mubr.msk.f32.mxu0 %vm533_vm6, %v5431_v43  ;;  %5942 = vmatprep.mubr.msk.f32.mxu1 %vm533_vm6, %v5439_v44 }
  0x8e   : > { %5976 = vmatprep.subr.msk.mxu0 %vm820_vm7, %v1062_v47 }
  0x90   : > { %5915 = vmatmul.mubr.msk.f32.gmra.mxu0 %vm533_vm6, %v5432_v48  ;;  %5943 = vmatmul.mubr.msk.f32.gmra.mxu1 %vm533_vm6, %v5440_v49 }
  0x91   : > { %5917 = vmatprep.mubr.msk.f32.mxu0 %vm533_vm6, %v5433_v50  ;;  %5945 = vmatprep.mubr.msk.f32.mxu1 %vm533_vm6, %v5441_v51 }
  0x94   : > { %5918 = vmatmul.mubr.msk.f32.gmra.mxu0 %vm533_vm6, %v5434_v52  ;;  %5946 = vmatmul.mubr.msk.f32.gmra.mxu1 %vm533_vm6, %v5442_v53 }
  0x95   : > { %5950 = vmatprep.mubr.msk.f32.mxu0 %vm795_vm2, %v7159_v23 }
  0x98   : > { %5951 = vmatmul.mubr.msk.f32.vlgmr.msra.gmra.mxu0 %vm795_vm2, %v7146_v19 }
  0x99   : > { %5953 = vmatprep.mubr.msk.f32.mxu0 %vm795_vm2, %v7137_v17  ;;  %5977 = vmatpush3.msk.msra.mxu0 %vm820_vm7, %v1062_v47 }
  0x9c   : > { %5954 = vmatmul.mubr.msk.f32.gmra.mxu0 %vm795_vm2, %v7122_v10 }
  0x9d   : > { %5956 = vmatprep.mubr.msk.f32.mxu0 %vm795_vm2, %v7112_v7 }
  0xa0   : > { %5957 = vmatmul.mubr.msk.f32.gmra.mxu0 %vm795_vm2, %v7099_v4 }
  0xa1   : > { %5959 = vmatprep.mubr.msk.f32.mxu0 %vm795_vm2, %v7092_v3 }
  0xa4   : > { %5960 = vmatmul.mubr.msk.f32.gmra.mxu0 %vm795_vm2, %v7089_v2 }
 0x148   : > { %v5910_v54 = vpop.f32.mrf.mxu0  ;;  %v5938_v55 = vpop.f32.mrf.mxu1 }
 0x14a   : > { %v624_v56 = vpop.f32.mrf.mxu0  ;;  %v753_v57 = vpop.f32.mrf.mxu1 }
 0x14b   : > { %5964 = vmatprep.mubr.msk.f32.mxu1 %vm795_vm2, %v624_v56  ;;  %5978 = vmatprep.mubr.msk.f32.mxu0 %vm795_vm2, %v753_v57 }
 0x14c   : > { %v5913_v58 = vpop.f32.mrf.mxu0  ;;  %v5941_v59 = vpop.f32.mrf.mxu1  ;;  %5965 = vmatmul.mubr.msk.f32.vlgmr.msra.gmra.mxu1 %vm795_vm2, %v5910_v54  ;;  %5979 = vmatmul.mubr.msk.f32.vlgmr.msra.gmra.mxu0 %vm795_vm2, %v5938_v55 }
 0x14e   : > { %v634_v60 = vpop.f32.mrf.mxu0  ;;  %v763_v61 = vpop.f32.mrf.mxu1 }
 0x14f   : > { %5967 = vmatprep.mubr.msk.f32.mxu1 %vm795_vm2, %v634_v60  ;;  %5981 = vmatprep.mubr.msk.f32.mxu0 %vm795_vm2, %v763_v61 }
 0x150   : > { %v5916_v62 = vpop.f32.mrf.mxu0  ;;  %v5944_v63 = vpop.f32.mrf.mxu1  ;;  %5968 = vmatmul.mubr.msk.f32.gmra.mxu1 %vm795_vm2, %v5913_v58  ;;  %5982 = vmatmul.mubr.msk.f32.gmra.mxu0 %vm795_vm2, %v5941_v59 }
 0x152   : > { %v644_v0 = vpop.f32.mrf.mxu0  ;;  %v773_v2 = vpop.f32.mrf.mxu1 }
 0x153   : > { %5970 = vmatprep.mubr.msk.f32.mxu1 %vm795_vm2, %v644_v0  ;;  %5984 = vmatprep.mubr.msk.f32.mxu0 %vm795_vm2, %v773_v2 }
 0x154   : > { %v5919_v3 = vpop.f32.mrf.mxu0  ;;  %v5947_v4 = vpop.f32.mrf.mxu1  ;;  %5971 = vmatmul.mubr.msk.f32.gmra.mxu1 %vm795_vm2, %v5916_v62  ;;  %5985 = vmatmul.mubr.msk.f32.gmra.mxu0 %vm795_vm2, %v5944_v63 }
 0x156   : > { %v654_v7 = vpop.f32.mrf.mxu0  ;;  %v783_v9 = vpop.f32.mrf.mxu1 }
 0x157   : > { %5973 = vmatprep.mubr.msk.f32.mxu1 %vm795_vm2, %v654_v7  ;;  %5987 = vmatprep.mubr.msk.f32.mxu0 %vm795_vm2, %v783_v9 }
 0x158   : > { %5974 = vmatmul.mubr.msk.f32.gmra.mxu1 %vm795_vm2, %v5919_v3  ;;  %5988 = vmatmul.mubr.msk.f32.gmra.mxu0 %vm795_vm2, %v5947_v4  ;;  %v5952_v10 = vpop.f32.mrf.mxu0 }
 0x15a   : > { %v890_v11 = vpop.f32.mrf.mxu0 }
 0x15c   : > { %v5955_v12 = vpop.f32.mrf.mxu0 }
 0x15e   : > { %v900_v13 = vpop.f32.mrf.mxu0 }
 0x160   : > { %v5958_v14 = vpop.f32.mrf.mxu0 }
 0x162   : > { %v910_v16 = vpop.f32.mrf.mxu0 }
 0x164   : > { %v5961_v17 = vpop.f32.mrf.mxu0 }
 0x166   : > { %v920_v18 = vpop.f32.mrf.mxu0 }
 0x20c   : > { %v5966_v19 = vpop.f32.mrf.mxu1  ;;  %v5980_v20 = vpop.f32.mrf.mxu0 }
 0x20d   : > { %v1028_v21 = vadd.f32 %v5966_v19, %v5952_v10 }
 0x20e   : > { %v1022_v22 = vpop.f32.mrf.mxu1  ;;  %v1156_v23 = vpop.f32.mrf.mxu0 }
 0x20f   : > { %v7297_v24 = vadd.f32 %v5980_v20, %v1028_v21  ;;  %v1023_v25 = vadd.f32 %v1022_v22, %v890_v11 }
 0x210   : > { %v5969_v28 = vpop.f32.mrf.mxu1  ;;  %v5983_v34 = vpop.f32.mrf.mxu0 }
 0x211   : > { %v7299_v35 = vadd.f32 %v1156_v23, %v1023_v25  ;;  %v1038_v36 = vadd.f32 %v5969_v28, %v5955_v12  ;;  %v1229_v39 = vmul.f32 %v7297_v24, %v7297_v24  ;;  %v1205_v49 = vsel %vm1203_vm3, %v7297_v24, 0.0 }
 0x212   : > { %v1032_v37 = vpop.f32.mrf.mxu1  ;;  %v1166_v38 = vpop.f32.mrf.mxu0 }
 0x213   : > { %v1228_v40 = vmul.f32 %v7299_v35, %v7299_v35  ;;  %v1204_v43 = vsel %vm1203_vm3, %v7299_v35, 0.0  ;;  %v7307_v44 = vadd.f32 %v5983_v34, %v1038_v36  ;;  %v1033_v45 = vadd.f32 %v1032_v37, %v900_v13 }
 0x214   : > { %v5972_v46 = vpop.f32.mrf.mxu1  ;;  %v5986_v47 = vpop.f32.mrf.mxu0  ;;  %v1237_v54 = vsel %vm1203_vm3, %v1229_v39, 0.0  ;;  %v1206_v55 = vadd.f32 %v1205_v49, %v1204_v43 }
 0x215   : > { %v1048_v48 = vadd.f32 %v5972_v46, %v5958_v14  ;;  %v1236_v50 = vsel %vm1203_vm3, %v1228_v40, 0.0  ;;  %v7312_v51 = vadd.f32 %v1166_v38, %v1033_v45  ;;  %v1231_v57 = vmul.f32 %v7307_v44, %v7307_v44 }
 0x216   : > { %v1042_v52 = vpop.f32.mrf.mxu1  ;;  %v1176_v53 = vpop.f32.mrf.mxu0  ;;  %v1238_v62 = vadd.f32 %v1237_v54, %v1236_v50  ;;  %v1209_v3 = vsel %vm1203_vm3, %v7307_v44, 0.0 }
 0x217   : > { %v1043_v56 = vadd.f32 %v1042_v52, %v910_v16  ;;  %v1207_v58 = vsel %vm1203_vm3, %v7312_v51, 0.0  ;;  %v1230_v59 = vmul.f32 %v7312_v51, %v7312_v51  ;;  %v7321_v60 = vadd.f32 %v5986_v47, %v1048_v48 }
 0x218   : > { %v5975_v61 = vpop.f32.mrf.mxu1  ;;  %v1208_v63 = vadd.f32 %v1207_v58, %v1206_v55  ;;  %v5989_v2 = vpop.f32.mrf.mxu0  ;;  %v1241_v13 = vsel %vm1203_vm3, %v1231_v57, 0.0 }
 0x219   : > { %v7323_v0 = vadd.f32 %v1176_v53, %v1043_v56  ;;  %v1239_v4 = vsel %vm1203_vm3, %v1230_v59, 0.0  ;;  %v1058_v12 = vadd.f32 %v5975_v61, %v5961_v17  ;;  %v1233_v14 = vmul.f32 %v7321_v60, %v7321_v60 }
 0x21a   : > { %v1052_v7 = vpop.f32.mrf.mxu1  ;;  %v1240_v9 = vadd.f32 %v1239_v4, %v1238_v62  ;;  %v1210_v19 = vadd.f32 %v1209_v3, %v1208_v63  ;;  %v1186_v21 = vpop.f32.mrf.mxu0  ;;  %v1213_v34 = vsel %vm1203_vm3, %v7321_v60, 0.0 }
 0x21b   : > { %v1211_v10 = vsel %vm1203_vm3, %v7323_v0, 0.0  ;;  %v1232_v11 = vmul.f32 %v7323_v0, %v7323_v0  ;;  %v1053_v16 = vadd.f32 %v1052_v7, %v920_v18  ;;  %v1202_v28 = vadd.f32 %v5989_v2, %v1058_v12 }
 0x21c   : > { %v1242_v22 = vadd.f32 %v1241_v13, %v1240_v9  ;;  %v1212_v25 = vadd.f32 %v1211_v10, %v1210_v19  ;;  %v1245_v38 = vsel %vm1203_vm3, %v1233_v14, 0.0  ;;  %v501_v7 = vmul.u32 2, %v7086_v1 }
 0x21d   : > { %v1243_v20 = vsel %vm1203_vm3, %v1232_v11, 0.0  ;;  %v7336_v23 = vadd.f32 %v1186_v21, %v1053_v16  ;;  %v1217_v45 = vsel %vm1203_vm3, %v1202_v28, 0.0  ;;  %v1235_v46 = vmul.f32 %v1202_v28, %v1202_v28 }
 0x21e   : > { %v1244_v36 = vadd.f32 %v1243_v20, %v1242_v22  ;;  %v1214_v37 = vadd.f32 %v1213_v34, %v1212_v25  ;;  %v517_v9 = vadd.s32 1, %v501_v7  ;;  %vm505_vm4 = vcmp.eq.s32.totalorder %v7116_v8, %v501_v7 }
 0x21f   : > { %v1234_v17 = vmul.f32 %v7336_v23, %v7336_v23  ;;  %v1215_v18 = vsel %vm1203_vm3, %v7336_v23, 0.0  ;;  %v1249_v49 = vsel %vm1203_vm3, %v1235_v46, 0.0  ;;  %v7352_v10 = vsel %vm505_vm4, 1.0, %v6883_v26 }
 0x220   : > { %v1246_v39 = vadd.f32 %v1245_v38, %v1244_v36  ;;  %v1216_v40 = vadd.f32 %v1215_v18, %v1214_v37  ;;  %vm521_vm5 = vcmp.eq.s32.totalorder %v7116_v8, %v517_v9  ;;  %6006 = vmatprep.mubr.msk.f32.mxu1 %vm533_vm6, %v7352_v10 }
 0x221   : > { %v1247_v43 = vsel %vm1203_vm3, %v1234_v17, 0.0  ;;  %v7355_v11 = vsel %vm521_vm5, 1.0, %v6883_v26 }
 0x222   : > { %v1218_v47 = vadd.f32 %v1217_v45, %v1216_v40  ;;  %v1248_v48 = vadd.f32 %v1247_v43, %v1246_v39  ;;  %6028 = vmatprep.mubr.msk.f32.mxu0 %vm533_vm6, %v7355_v11 }
 0x224   : > { %1219 = vadd.xlane.f32.xlu0 %v1218_v47  ;;  %v1250_v50 = vadd.f32 %v1249_v49, %v1248_v48 }
 0x228   : > { %1251 = vadd.xlane.f32.xlu0 %v1250_v50 }
 0x2ad   : > { %v1220_v52 = vpop.xlane.xlu0 %1219 }
 0x2ae   : > { %v1221_v53 = vrot.slane %v1220_v52, 4 }
 0x2b0   : > { %v1222_v54 = vadd.f32 %v1221_v53, %v1220_v52 }
 0x2b1   : > { %v1252_v55 = vpop.xlane.xlu0 %1251 }
 0x2b2   : > { %v1223_v56 = vrot.slane %v1222_v54, 2  ;;  %v1253_v57 = vrot.slane %v1252_v55, 4 }
 0x2b4   : > { %v1254_v58 = vadd.f32 %v1253_v57, %v1252_v55  ;;  %v1224_v59 = vadd.f32 %v1223_v56, %v1222_v54 }
 0x2b6   : > { %v1255_v61 = vrot.slane %v1254_v58, 2  ;;  %v1225_v62 = vrot.slane %v1224_v59, 1 }
 0x2b8   : > { %v1226_v63 = vadd.f32 %v1225_v62, %v1224_v59  ;;  %v1256_v2 = vadd.f32 %v1255_v61, %v1254_v58 }
 0x2ba   : > { %6468 = vpush %v1226_v63  ;;  %v1257_v3 = vrot.slane %v1256_v2, 1 }
 0x2bc   : > { %v1258_v4 = vadd.f32 %v1257_v3, %v1256_v2 }
 0x2be   : > { %6470 = vpush %v1258_v4 }
 0x2eb   : > { %s6469_s22 = spop %6468 }
 0x2ec   : > { %s1262_s16 = smul.f32 0.001953125, %s6469_s22 }
 0x2ee   : > { %s1266_s2 = smul.f32 %s1262_s16, %s1262_s16  ;;  %v1269_v13 = vstv %s1262_s16 }
 0x2ef   : > { %s6471_s25 = spop %6470  ;;  %v1277_v14 = vsub.f32 %v1202_v28, %v1269_v13  ;;  %v1276_v16 = vsub.f32 %v7336_v23, %v1269_v13  ;;  %v1275_v22 = vsub.f32 %v7321_v60, %v1269_v13  ;;  %v1274_v36 = vsub.f32 %v7323_v0, %v1269_v13 }
 0x2f0   : > { %s1265_s18 = smul.f32 0.001953125, %s6471_s25  ;;  %v1273_v18 = vsub.f32 %v7307_v44, %v1269_v13  ;;  %v502_v28 = vmul.u32 2, %v7102_v5  ;;  %v1272_v60 = vsub.f32 %v7312_v51, %v1269_v13  ;;  %v503_v0 = vmul.u32 2, %v7107_v6 }
 0x2f1   : > { %v1271_v44 = vsub.f32 %v7297_v24, %v1269_v13  ;;  %v1270_v46 = vsub.f32 %v7299_v35, %v1269_v13  ;;  %v504_v51 = vmul.u32 2, %v7131_v15 }
 0x2f2   : > { %s1267_s26 = ssub.f32 %s1265_s18, %s1266_s2  ;;  %v518_v43 = vadd.s32 1, %v502_v28  ;;  %v519_v6 = vadd.s32 1, %v503_v0  ;;  %vm506_vm8 = vcmp.eq.s32.totalorder %v7116_v8, %v502_v28  ;;  %vm507_vm10 = vcmp.eq.s32.totalorder %v7116_v8, %v503_v0 }
 0x2f3   : > { %v520_v49 = vadd.s32 1, %v504_v51  ;;  %v7377_v35 = vsel %vm506_vm8, 1.0, %v6883_v26  ;;  %v5445_v52 = vsel %vm507_vm10, 1.0, %v6883_v26  ;;  %vm508_vm12 = vcmp.eq.s32.totalorder %v7116_v8, %v504_v51 }
 0x2f4   : > { %s1268_s28 = smax.f32 %s6884_s14, %s1267_s26  ;;  %vm522_vm9 = vcmp.eq.s32.totalorder %v7116_v8, %v518_v43  ;;  %vm523_vm11 = vcmp.eq.s32.totalorder %v7116_v8, %v519_v6  ;;  %v5446_v54 = vsel %vm508_vm12, 1.0, %v6883_v26 }
 0x2f5   : > { %s1278_s17 = sadd.f32 1e-05, %s1268_s28  ;;  %v7380_v50 = vsel %vm522_vm9, 1.0, %v6883_v26  ;;  %v5449_v53 = vsel %vm523_vm11, 1.0, %v6883_v26  ;;  %vm524_vm13 = vcmp.eq.s32.totalorder %v7116_v8, %v520_v49  ;;  %v1686_v8 = vld [vmem:[#allocation5 + $0x8] sm:$0xff] }
 0x2f6   : > { %v5450_v55 = vsel %vm524_vm13, 1.0, %v6883_v26 }
 0x2f7   : > { %v1279_v1 = vstv %s1278_s17 }
 0x2f8   : > { %6623 = vrsqrt.f32 %v1279_v1 }
 0x305   : > { %v6624_v12 = vpop.eup %6623 }
 0x306   : > { %6472 = vpush %v6624_v12 }
 0x337   : > { %s6473_s21 = spop %6472 }
 0x338   : > { %v1282_v19 = vstv %s6473_s21 }
 0x339   : > { %v1290_v20 = vmul.f32 %v1282_v19, %v1277_v14  ;;  %v1289_v21 = vmul.f32 %v1282_v19, %v1276_v16  ;;  %v1288_v34 = vmul.f32 %v1282_v19, %v1275_v22  ;;  %v1287_v37 = vmul.f32 %v1282_v19, %v1274_v36 }
 0x33a   : > { %v1286_v38 = vmul.f32 %v1282_v19, %v1273_v18  ;;  %v1285_v40 = vmul.f32 %v1282_v19, %v1272_v60  ;;  %v1284_v45 = vmul.f32 %v1282_v19, %v1271_v44  ;;  %v1283_v48 = vmul.f32 %v1282_v19, %v1270_v46 }
 0x33b   : > { %v1298_v25 = vmax.f32 %v1290_v20, 0.0  ;;  %v1297_v17 = vmax.f32 %v1289_v21, 0.0  ;;  %v1296_v23 = vmax.f32 %v1288_v34, 0.0  ;;  %v1295_v39 = vmax.f32 %v1287_v37, 0.0 }
 0x33c   : > { %v1294_v5 = vmax.f32 %v1286_v38, 0.0  ;;  %v1293_v47 = vmax.f32 %v1285_v40, 0.0  ;;  %v1292_v24 = vmax.f32 %v1284_v45, 0.0  ;;  %v1291_v15 = vmax.f32 %v1283_v48, 0.0 }
 0x33d   : > { %5990 = vmatprep.subr.mxu1 %v1298_v25  ;;  %6012 = vmatprep.subr.mxu0 %v1298_v25 }
 0x33e   : > { %5991 = vmatpush3.msra.mxu1 %v1298_v25  ;;  %6013 = vmatpush3.msra.mxu0 %v1298_v25 }
 0x33f   : > { %5992 = vmatprep.subr.mxu1 %v1297_v17  ;;  %6014 = vmatprep.subr.mxu0 %v1297_v17 }
 0x340   : > { %5993 = vmatpush3.msra.mxu1 %v1297_v17  ;;  %6015 = vmatpush3.msra.mxu0 %v1297_v17 }
 0x341   : > { %5994 = vmatprep.subr.mxu1 %v1296_v23  ;;  %6016 = vmatprep.subr.mxu0 %v1296_v23 }
 0x342   : > { %5995 = vmatpush3.msra.mxu1 %v1296_v23  ;;  %6017 = vmatpush3.msra.mxu0 %v1296_v23 }
 0x343   : > { %5996 = vmatprep.subr.mxu1 %v1295_v39  ;;  %6018 = vmatprep.subr.mxu0 %v1295_v39 }
 0x344   : > { %5997 = vmatpush3.msra.mxu1 %v1295_v39  ;;  %6019 = vmatpush3.msra.mxu0 %v1295_v39 }
 0x345   : > { %5998 = vmatprep.subr.mxu1 %v1294_v5  ;;  %6020 = vmatprep.subr.mxu0 %v1294_v5 }
 0x346   : > { %5999 = vmatpush3.msra.mxu1 %v1294_v5  ;;  %6021 = vmatpush3.msra.mxu0 %v1294_v5 }
 0x347   : > { %6000 = vmatprep.subr.mxu1 %v1293_v47  ;;  %6022 = vmatprep.subr.mxu0 %v1293_v47 }
 0x348   : > { %6001 = vmatpush3.msra.mxu1 %v1293_v47  ;;  %6023 = vmatpush3.msra.mxu0 %v1293_v47 }
 0x349   : > { %6002 = vmatprep.subr.mxu1 %v1292_v24  ;;  %6024 = vmatprep.subr.mxu0 %v1292_v24 }
 0x34a   : > { %6003 = vmatpush3.msra.mxu1 %v1292_v24  ;;  %6025 = vmatpush3.msra.mxu0 %v1292_v24 }
 0x34b   : > { %6004 = vmatprep.subr.mxu1 %v1291_v15  ;;  %6026 = vmatprep.subr.mxu0 %v1291_v15 }
 0x34c   : > { %6005 = vmatpush3.msra.mxu1 %v1291_v15  ;;  %6027 = vmatpush3.msra.mxu0 %v1291_v15 }
 0x34d   : > { %6007 = vmatmul.mubr.msk.f32.vlgmr.msra.gmra.mxu1 %vm533_vm6, %v7377_v35  ;;  %6029 = vmatmul.mubr.msk.f32.vlgmr.msra.gmra.mxu0 %vm533_vm6, %v7380_v50 }
 0x34e   : > { %6009 = vmatprep.mubr.msk.f32.mxu1 %vm533_vm6, %v5445_v52  ;;  %6031 = vmatprep.mubr.msk.f32.mxu0 %vm533_vm6, %v5449_v53 }
 0x34f   : > { %6062 = vmatprep.subr.mxu0 %v1686_v8 }
 0x350   : > { %6063 = vmatpush3.msra.mxu0 %v1686_v8 }
 0x351   : > { %6010 = vmatmul.mubr.msk.f32.gmra.mxu1 %vm533_vm6, %v5446_v54  ;;  %6032 = vmatmul.mubr.msk.f32.gmra.mxu0 %vm533_vm6, %v5450_v55 }
 0x352   : > { %6042 = vmatprep.mubr.msk.f32.mxu1 %vm1497_vm14, %v7168_v27 }
 0x40d   : > { %v6008_v56 = vpop.f32.mrf.mxu1  ;;  %v6030_v57 = vpop.f32.mrf.mxu0 }
 0x40e   : > { %v1494_v62 = vmax.f32 %v6008_v56, %v6030_v57 }
 0x40f   : > { %v1377_v58 = vpop.f32.mrf.mxu1  ;;  %v1474_v59 = vpop.f32.mrf.mxu0 }
 0x410   : > { %v1493_v61 = vmax.f32 %v1377_v58, %v1474_v59 }
 0x411   : > { %v6011_v63 = vpop.f32.mrf.mxu1  ;;  %v6033_v2 = vpop.f32.mrf.mxu0 }
 0x412   : > { %v1496_v3 = vmax.f32 %v6011_v63, %v6033_v2  ;;  %6064 = vmatprep.mubr.msk.f32.mxu0 %vm1203_vm3, %v1493_v61 }
 0x413   : > { %v1387_v4 = vpop.f32.mrf.mxu1  ;;  %v1484_v7 = vpop.f32.mrf.mxu0  ;;  %6065 = vmatmul.mubr.msk.f32.vlgmr.msra.gmra.mxu0 %vm1203_vm3, %v1494_v62 }
 0x414   : > { %v1495_v9 = vmax.f32 %v1387_v4, %v1484_v7  ;;  %6034 = vmatprep.subr.mxu1 %v1496_v3 }
 0x415   : > { %6035 = vmatpush3.msra.mxu1 %v1496_v3 }
 0x416   : > { %6036 = vmatprep.subr.mxu1 %v1495_v9  ;;  %6067 = vmatprep.mubr.msk.f32.mxu0 %vm1203_vm3, %v1495_v9 }
 0x417   : > { %6037 = vmatpush3.msra.mxu1 %v1495_v9  ;;  %6068 = vmatmul.mubr.msk.f32.gmra.mxu0 %vm1203_vm3, %v1496_v3 }
 0x418   : > { %6038 = vmatprep.subr.mxu1 %v1494_v62 }
 0x419   : > { %6039 = vmatpush3.msra.mxu1 %v1494_v62 }
 0x41a   : > { %6040 = vmatprep.subr.mxu1 %v1493_v61 }
 0x41b   : > { %6041 = vmatpush3.msra.mxu1 %v1493_v61 }
 0x41c   : > { %6043 = vmatmul.mubr.msk.f32.vlgmr.msra.gmra.mxu1 %vm1497_vm14, %v7181_v30  ;;  %6048 = vmatprep.subr.mxu1 %v1496_v3 }
 0x41d   : > { %6049 = vmatpush3.msra.mxu1 %v1496_v3  ;;  %6045 = vmatprep.mubr.msk.f32.mxu1 %vm1497_vm14, %v7191_v32  ;;  %v1684_v32 = vld [vmem:[#allocation5] sm:$0xff] }
 0x41e   : > { %6050 = vmatprep.subr.mxu1 %v1495_v9 }
 0x41f   : > { %6051 = vmatpush3.msra.mxu1 %v1495_v9 }
 0x420   : > { %6046 = vmatmul.mubr.msk.f32.gmra.mxu1 %vm1497_vm14, %v7222_v41  ;;  %6052 = vmatprep.subr.mxu1 %v1494_v62  ;;  %v1882_v41 = vld [vmem:[#allocation5 + $0x10] sm:$0xff] }
 0x421   : > { %6053 = vmatpush3.msra.mxu1 %v1494_v62  ;;  %6056 = vmatprep.mubr.msk.f32.mxu1 %vm1497_vm14, %v7176_v29 }
 0x422   : > { %6054 = vmatprep.subr.mxu1 %v1493_v61  ;;  %6078 = vmatprep.subr.mxu0 %v1882_v41 }
 0x423   : > { %6055 = vmatpush3.msra.mxu1 %v1493_v61  ;;  %6079 = vmatpush3.msra.mxu0 %v1882_v41 }
 0x424   : > { %6057 = vmatmul.mubr.msk.f32.vlgmr.msra.gmra.mxu1 %vm1497_vm14, %v7186_v31  ;;  %6070 = vmatprep.subr.mxu1 %v1684_v32 }
 0x425   : > { %6059 = vmatprep.mubr.msk.f32.mxu1 %vm1497_vm14, %v7198_v33  ;;  %6071 = vmatpush3.msra.mxu1 %v1684_v32 }
 0x428   : > { %6060 = vmatmul.mubr.msk.f32.gmra.mxu1 %vm1497_vm14, %v7227_v42 }
 0x4d3   : > { %v6066_v20 = vpop.f32.mrf.mxu0 }
 0x4d5   : > { %v1765_v21 = vpop.f32.mrf.mxu0 }
 0x4d7   : > { %v6069_v25 = vpop.f32.mrf.mxu0 }
 0x4d9   : > { %v1775_v36 = vpop.f32.mrf.mxu0 }
 0x4dc   : > { %v6044_v1 = vpop.f32.mrf.mxu1 }
 0x4de   : > { %v1572_v12 = vpop.f32.mrf.mxu1 }
 0x4df   : > { %6072 = vmatprep.mubr.msk.f32.mxu1 %vm1203_vm3, %v1572_v12 }
 0x4e0   : > { %v6047_v13 = vpop.f32.mrf.mxu1  ;;  %6073 = vmatmul.mubr.msk.f32.vlgmr.msra.gmra.mxu1 %vm1203_vm3, %v6044_v1 }
 0x4e2   : > { %v1582_v14 = vpop.f32.mrf.mxu1 }
 0x4e3   : > { %6075 = vmatprep.mubr.msk.f32.mxu1 %vm1203_vm3, %v1582_v14 }
 0x4e4   : > { %v6058_v33 = vpop.f32.mrf.mxu1  ;;  %6076 = vmatmul.mubr.msk.f32.gmra.mxu1 %vm1203_vm3, %v6047_v13 }
 0x4e5   : > { %6094 = vmatprep.mubr.msk.f32.mxu1 %vm1497_vm14, %v7352_v10 }
 0x4e6   : > { %v1665_v42 = vpop.f32.mrf.mxu1 }
 0x4e7   : > { %6080 = vmatprep.mubr.msk.f32.mxu0 %vm1203_vm3, %v1665_v42 }
 0x4e8   : > { %v6061_v16 = vpop.f32.mrf.mxu1  ;;  %6081 = vmatmul.mubr.msk.f32.vlgmr.msra.gmra.mxu0 %vm1203_vm3, %v6058_v33 }
 0x4ea   : > { %v1675_v19 = vpop.f32.mrf.mxu1 }
 0x4eb   : > { %6083 = vmatprep.mubr.msk.f32.mxu0 %vm1203_vm3, %v1675_v19 }
 0x4ec   : > { %6084 = vmatmul.mubr.msk.f32.gmra.mxu0 %vm1203_vm3, %v6061_v16 }
 0x4ed   : > { %6105 = vmatprep.mubr.msk.f32.mxu0 %vm1497_vm14, %v7355_v11 }
 0x5a0   : > { %v6074_v22 = vpop.f32.mrf.mxu1 }
 0x5a1   : > { %v1868_v37 = vadd.f32 %v6074_v22, %v6066_v20 }
 0x5a2   : > { %v1862_v34 = vpop.f32.mrf.mxu1 }
 0x5a3   : > { %v1863_v28 = vadd.f32 %v1862_v34, %v1765_v21 }
 0x5a4   : > { %v6077_v17 = vpop.f32.mrf.mxu1 }
 0x5a5   : > { %v1878_v39 = vadd.f32 %v6077_v17, %v6069_v25 }
 0x5a6   : > { %v1872_v38 = vpop.f32.mrf.mxu1 }
 0x5a7   : > { %v1873_v44 = vadd.f32 %v1872_v38, %v1775_v36 }
 0x5a8   : > { %v6082_v18 = vpop.f32.mrf.mxu0 }
 0x5a9   : > { %v7428_v23 = vadd.f32 %v6082_v18, %v1868_v37 }
 0x5aa   : > { %v1961_v60 = vpop.f32.mrf.mxu0 }
 0x5ab   : > { %v7430_v0 = vadd.f32 %v1961_v60, %v1863_v28  ;;  %v2002_v43 = vmul.f32 %v7428_v23, %v7428_v23  ;;  %v1986_v47 = vsel %vm1984_vm15, %v7428_v23, 0.0 }
 0x5ac   : > { %v6085_v40 = vpop.f32.mrf.mxu0 }
 0x5ad   : > { %v2001_v5 = vmul.f32 %v7430_v0, %v7430_v0  ;;  %v1985_v45 = vsel %vm1984_vm15, %v7430_v0, 0.0  ;;  %v1983_v51 = vadd.f32 %v6085_v40, %v1878_v39  ;;  %v2006_v52 = vsel %vm1984_vm15, %v2002_v43, 0.0 }
 0x5ae   : > { %v1971_v46 = vpop.f32.mrf.mxu0  ;;  %v1987_v24 = vadd.f32 %v1986_v47, %v1985_v45  ;;  %v2367_v45 = vld [vmem:[%s7792_s3 + $0x8] sm:$0xff] }
 0x5af   : > { %v1982_v6 = vadd.f32 %v1971_v46, %v1873_v44  ;;  %v2005_v48 = vsel %vm1984_vm15, %v2001_v5, 0.0  ;;  %v1990_v55 = vsel %vm1984_vm15, %v1983_v51, 0.0  ;;  %v2004_v8 = vmul.f32 %v1983_v51, %v1983_v51  ;;  %v2366_v46 = vld [vmem:[%s7792_s3] sm:$0xff] }
 0x5b0   : > { %v2007_v54 = vadd.f32 %v2006_v52, %v2005_v48 }
 0x5b1   : > { %v2003_v49 = vmul.f32 %v1982_v6, %v1982_v6  ;;  %v1988_v15 = vsel %vm1984_vm15, %v1982_v6, 0.0  ;;  %v2010_v59 = vsel %vm1984_vm15, %v2004_v8, 0.0 }
 0x5b2   : > { %v1989_v53 = vadd.f32 %v1988_v15, %v1987_v24 }
 0x5b3   : > { %v2008_v56 = vsel %vm1984_vm15, %v2003_v49, 0.0 }
 0x5b4   : > { %v1991_v57 = vadd.f32 %v1990_v55, %v1989_v53  ;;  %v2009_v58 = vadd.f32 %v2008_v56, %v2007_v54 }
 0x5b6   : > { %1992 = vadd.xlane.f32.xlu1 %v1991_v57  ;;  %v2011_v61 = vadd.f32 %v2010_v59, %v2009_v58 }
 0x5ba   : > { %2012 = vadd.xlane.f32.xlu1 %v2011_v61 }
 0x63f   : > { %v1993_v62 = vpop.xlane.xlu1 %1992 }
 0x640   : > { %v1994_v63 = vrot.slane %v1993_v62, 4 }
 0x642   : > { %v1995_v2 = vadd.f32 %v1994_v63, %v1993_v62 }
 0x643   : > { %v2013_v3 = vpop.xlane.xlu1 %2012 }
 0x644   : > { %v1996_v4 = vrot.slane %v1995_v2, 2  ;;  %v2014_v7 = vrot.slane %v2013_v3, 4 }
 0x646   : > { %v2015_v9 = vadd.f32 %v2014_v7, %v2013_v3  ;;  %v1997_v32 = vadd.f32 %v1996_v4, %v1995_v2 }
 0x648   : > { %v2016_v41 = vrot.slane %v2015_v9, 2  ;;  %v1998_v1 = vrot.slane %v1997_v32, 1 }
 0x64a   : > { %v1999_v12 = vadd.f32 %v1998_v1, %v1997_v32  ;;  %v2017_v13 = vadd.f32 %v2016_v41, %v2015_v9 }
 0x64c   : > { %6474 = vpush %v1999_v12  ;;  %v2018_v14 = vrot.slane %v2017_v13, 1 }
 0x64e   : > { %v2019_v33 = vadd.f32 %v2018_v14, %v2017_v13 }
 0x650   : > { %6476 = vpush %v2019_v33 }
 0x67d   : > { %s6475_s24 = spop %6474 }
 0x67e   : > { %s2023_s29 = smul.f32 0.001953125, %s6475_s24 }
 0x680   : > { %s2027_s23 = smul.f32 %s2023_s29, %s2023_s29  ;;  %v2030_v19 = vstv %s2023_s29 }
 0x681   : > { %s6477_s27 = spop %6476  ;;  %v2033_v20 = vsub.f32 %v1982_v6, %v2030_v19  ;;  %v2034_v21 = vsub.f32 %v1983_v51, %v2030_v19  ;;  %v2032_v25 = vsub.f32 %v7428_v23, %v2030_v19  ;;  %v2031_v17 = vsub.f32 %v7430_v0, %v2030_v19  ;;  %v5531_v23 = vld [vmem:[%s7792_s3 + $0x18] sm:$0xff]  ;;  %v5530_v0 = vld [vmem:[%s7792_s3 + $0x10] sm:$0xff]  ;;  %v5537_v51 = vld [vmem:[%s7792_s3 + $0x28] sm:$0xff] }
 0x682   : > { %s2026_s22 = smul.f32 0.001953125, %s6477_s27  ;;  %v5536_v6 = vld [vmem:[%s7792_s3 + $0x20] sm:$0xff] }
 0x684   : > { %s2028_s16 = ssub.f32 %s2026_s22, %s2027_s23 }
 0x686   : > { %s2029_s2 = smax.f32 %s6884_s14, %s2028_s16 }
 0x687   : > { %s2035_s25 = sadd.f32 1e-05, %s2029_s2 }
 0x689   : > { %v2036_v42 = vstv %s2035_s25 }
 0x68a   : > { %6625 = vrsqrt.f32 %v2036_v42 }
 0x697   : > { %v6626_v16 = vpop.eup %6625 }
 0x698   : > { %6478 = vpush %v6626_v16 }
 0x6c9   : > { %s6479_s18 = spop %6478 }
 0x6ca   : > { %v2039_v22 = vstv %s6479_s18 }
 0x6cb   : > { %v2042_v34 = vmul.f32 %v2039_v22, %v2033_v20  ;;  %v2043_v36 = vmul.f32 %v2039_v22, %v2034_v21  ;;  %v2041_v37 = vmul.f32 %v2039_v22, %v2032_v25  ;;  %v2040_v28 = vmul.f32 %v2039_v22, %v2031_v17 }
 0x6cd   : > { %v2047_v18 = vmax.f32 %v2043_v36, 0.0  ;;  %v2046_v38 = vmax.f32 %v2042_v34, 0.0  ;;  %v2045_v60 = vmax.f32 %v2041_v37, 0.0  ;;  %v2044_v39 = vmax.f32 %v2040_v28, 0.0 }
 0x6cf   : > { %6086 = vmatprep.subr.mxu1 %v2047_v18  ;;  %6097 = vmatprep.subr.mxu0 %v2047_v18 }
 0x6d0   : > { %6087 = vmatpush3.msra.mxu1 %v2047_v18  ;;  %6098 = vmatpush3.msra.mxu0 %v2047_v18 }
 0x6d1   : > { %6088 = vmatprep.subr.mxu1 %v2046_v38  ;;  %6099 = vmatprep.subr.mxu0 %v2046_v38 }
 0x6d2   : > { %6089 = vmatpush3.msra.mxu1 %v2046_v38  ;;  %6100 = vmatpush3.msra.mxu0 %v2046_v38 }
 0x6d3   : > { %6090 = vmatprep.subr.mxu1 %v2045_v60  ;;  %6101 = vmatprep.subr.mxu0 %v2045_v60 }
 0x6d4   : > { %6091 = vmatpush3.msra.mxu1 %v2045_v60  ;;  %6102 = vmatpush3.msra.mxu0 %v2045_v60 }
 0x6d5   : > { %6092 = vmatprep.subr.mxu1 %v2044_v39  ;;  %6103 = vmatprep.subr.mxu0 %v2044_v39 }
 0x6d6   : > { %6093 = vmatpush3.msra.mxu1 %v2044_v39  ;;  %6104 = vmatpush3.msra.mxu0 %v2044_v39 }
 0x6d7   : > { %6095 = vmatmul.mubr.msk.f32.vlgmr.msra.gmra.mxu1 %vm1497_vm14, %v7377_v35  ;;  %6106 = vmatmul.mubr.msk.f32.vlgmr.msra.gmra.mxu0 %vm1497_vm14, %v7380_v50 }
 0x6d8   : > { %6112 = vmatprep.mubr.msk.f32.mxu1 %vm1984_vm15, %v7168_v27  ;;  %6122 = vmatprep.subr.mxu0 %v5531_v23 }
 0x6d9   : > { %6123 = vmatpush3.msra.mxu0 %v5531_v23 }
 0x6da   : > { %6124 = vmatprep.subr.mxu0 %v5530_v0 }
 0x6db   : > { %6125 = vmatpush3.msra.mxu0 %v5530_v0  ;;  %v5547_v0 = vld [vmem:[%s7793_s4 + $0x38] sm:$0xff] }
 0x6dc   : > { %6136 = vmatprep.subr.mxu0 %v5537_v51 }
 0x797   : > { %v6096_v40 = vpop.f32.mrf.mxu1  ;;  %v6107_v35 = vpop.f32.mrf.mxu0 }
 0x798   : > { %v2207_v44 = vmax.f32 %v6096_v40, %v6107_v35  ;;  %v2819_v40 = vld [vmem:[%s7793_s4 + $0x18] sm:$0xff]  ;;  %v5546_v35 = vld [vmem:[%s7793_s4 + $0x30] sm:$0xff] }
 0x799   : > { %v2118_v43 = vpop.f32.mrf.mxu1  ;;  %v2197_v50 = vpop.f32.mrf.mxu0 }
 0x79a   : > { %v2206_v5 = vmax.f32 %v2118_v43, %v2197_v50  ;;  %6108 = vmatprep.subr.mxu1 %v2207_v44  ;;  %v5545_v43 = vld [vmem:[%s7793_s4 + $0x28] sm:$0xff]  ;;  %v5554_v50 = vld [vmem:[%s7793_s4 + $0x50] sm:$0xff] }
 0x79b   : > { %6109 = vmatpush3.msra.mxu1 %v2207_v44 }
 0x79c   : > { %6110 = vmatprep.subr.mxu1 %v2206_v5  ;;  %6126 = vmatprep.mubr.msk.f32.mxu0 %vm1984_vm15, %v2206_v5 }
 0x79d   : > { %6111 = vmatpush3.msra.mxu1 %v2206_v5  ;;  %6127 = vmatmul.mubr.msk.f32.vlgmr.msra.gmra.mxu0 %vm1984_vm15, %v2207_v44 }
 0x79e   : > { %6113 = vmatmul.mubr.msk.f32.vlgmr.msra.gmra.mxu1 %vm1984_vm15, %v7181_v30  ;;  %6115 = vmatprep.subr.mxu1 %v2207_v44 }
 0x79f   : > { %6116 = vmatpush3.msra.mxu1 %v2207_v44  ;;  %6119 = vmatprep.mubr.msk.f32.mxu1 %vm1984_vm15, %v7176_v29  ;;  %v2818_v44 = vld [vmem:[%s7793_s4 + $0x10] sm:$0xff] }
 0x7a0   : > { %6117 = vmatprep.subr.mxu1 %v2206_v5  ;;  %6137 = vmatpush3.msra.mxu0 %v5537_v51  ;;  %v5552_v51 = vld [vmem:[%s7793_s4 + $0x40] sm:$0xff] }
 0x7a1   : > { %6118 = vmatpush3.msra.mxu1 %v2206_v5  ;;  %6138 = vmatprep.subr.mxu0 %v5536_v6  ;;  %v2817_v5 = vld [vmem:[%s7793_s4 + $0x8] sm:$0xff] }
 0x7a2   : > { %6120 = vmatmul.mubr.msk.f32.vlgmr.msra.gmra.mxu1 %vm1984_vm15, %v7186_v31  ;;  %6129 = vmatprep.subr.mxu1 %v2367_v45 }
 0x7a3   : > { %6130 = vmatpush3.msra.mxu1 %v2367_v45  ;;  %6139 = vmatpush3.msra.mxu0 %v5536_v6  ;;  %v5553_v45 = vld [vmem:[%s7793_s4 + $0x48] sm:$0xff] }
 0x7a4   : > { %6131 = vmatprep.subr.mxu1 %v2366_v46 }
 0x7a5   : > { %6132 = vmatpush3.msra.mxu1 %v2366_v46  ;;  %v2816_v46 = vld [vmem:[%s7793_s4] sm:$0xff] }
 0x85d   : > { %v6128_v15 = vpop.f32.mrf.mxu0 }
 0x85e   : > { %v6114_v47 = vpop.f32.mrf.mxu1 }
 0x85f   : > { %v2443_v53 = vpop.f32.mrf.mxu0 }
 0x860   : > { %v2278_v48 = vpop.f32.mrf.mxu1 }
 0x861   : > { %6133 = vmatprep.mubr.msk.f32.mxu1 %vm1984_vm15, %v2278_v48 }
 0x862   : > { %v6121_v24 = vpop.f32.mrf.mxu1  ;;  %6134 = vmatmul.mubr.msk.f32.vlgmr.msra.gmra.mxu1 %vm1984_vm15, %v6114_v47 }
 0x863   : > { %6147 = vmatprep.mubr.msk.f32.mxu1 %vm1984_vm15, %v7168_v27 }
 0x864   : > { %v2357_v49 = vpop.f32.mrf.mxu1 }
 0x865   : > { %6140 = vmatprep.mubr.msk.f32.mxu0 %vm1984_vm15, %v2357_v49 }
 0x866   : > { %6141 = vmatmul.mubr.msk.f32.vlgmr.msra.gmra.mxu0 %vm1984_vm15, %v6121_v24 }
 0x867   : > { %6154 = vmatprep.mubr.msk.f32.mxu0 %vm1984_vm15, %v7176_v29 }
 0x922   : > { %v6135_v52 = vpop.f32.mrf.mxu1 }
 0x923   : > { %v2530_v55 = vadd.f32 %v6135_v52, %v6128_v15 }
 0x924   : > { %v2524_v54 = vpop.f32.mrf.mxu1 }
 0x925   : > { %v2525_v56 = vadd.f32 %v2524_v54, %v2443_v53 }
 0x926   : > { %v6142_v8 = vpop.f32.mrf.mxu0 }
 0x927   : > { %v2618_v57 = vadd.f32 %v6142_v8, %v2530_v55 }
 0x928   : > { %v2608_v58 = vpop.f32.mrf.mxu0 }
 0x929   : > { %v2617_v59 = vadd.f32 %v2608_v58, %v2525_v56  ;;  %v2632_v61 = vmul.f32 %v2618_v57, %v2618_v57  ;;  %v2620_v63 = vsel %vm1497_vm14, %v2618_v57, 0.0 }
 0x92b   : > { %v2619_v62 = vsel %vm1497_vm14, %v2617_v59, 0.0  ;;  %v2631_v2 = vmul.f32 %v2617_v59, %v2617_v59  ;;  %v2634_v7 = vsel %vm1497_vm14, %v2632_v61, 0.0 }
 0x92c   : > { %v2621_v3 = vadd.f32 %v2620_v63, %v2619_v62 }
 0x92d   : > { %v2633_v4 = vsel %vm1497_vm14, %v2631_v2, 0.0 }
 0x92e   : > { %2622 = vadd.xlane.f32.xlu0 %v2621_v3  ;;  %v2635_v9 = vadd.f32 %v2634_v7, %v2633_v4 }
 0x930   : > { %2636 = vadd.xlane.f32.xlu1 %v2635_v9 }
 0x9b7   : > { %v2623_v32 = vpop.xlane.xlu0 %2622 }
 0x9b8   : > { %v2624_v41 = vrot.slane %v2623_v32, 4 }
 0x9b9   : > { %v2637_v1 = vpop.xlane.xlu1 %2636 }
 0x9ba   : > { %v2625_v12 = vadd.f32 %v2624_v41, %v2623_v32  ;;  %v2638_v13 = vrot.slane %v2637_v1, 4 }
 0x9bc   : > { %v2626_v14 = vrot.slane %v2625_v12, 2  ;;  %v2639_v33 = vadd.f32 %v2638_v13, %v2637_v1 }
 0x9be   : > { %v2640_v42 = vrot.slane %v2639_v33, 2  ;;  %v2627_v16 = vadd.f32 %v2626_v14, %v2625_v12 }
 0x9c0   : > { %v2628_v19 = vrot.slane %v2627_v16, 1  ;;  %v2641_v20 = vadd.f32 %v2640_v42, %v2639_v33 }
 0x9c2   : > { %v2629_v21 = vadd.f32 %v2628_v19, %v2627_v16  ;;  %v2642_v22 = vrot.slane %v2641_v20, 1 }
 0x9c4   : > { %6480 = vpush %v2629_v21  ;;  %v2643_v25 = vadd.f32 %v2642_v22, %v2641_v20 }
 0x9c6   : > { %6482 = vpush %v2643_v25 }
 0x9f5   : > { %s6481_s18 = spop %6480 }
 0x9f6   : > { %s2647_s26 = smul.f32 0.001953125, %s6481_s18 }
 0x9f7   : > { %s6483_s28 = spop %6482 }
 0x9f8   : > { %s2651_s17 = smul.f32 %s2647_s26, %s2647_s26  ;;  %v2654_v17 = vstv %s2647_s26 }
 0x9f9   : > { %s2650_s21 = smul.f32 0.001953125, %s6483_s28  ;;  %v2655_v37 = vsub.f32 %v2617_v59, %v2654_v17  ;;  %v2656_v18 = vsub.f32 %v2618_v57, %v2654_v17 }
 0x9fb   : > { %s2652_s24 = ssub.f32 %s2650_s21, %s2651_s17 }
 0x9fd   : > { %s2653_s29 = smax.f32 %s6884_s14, %s2652_s24 }
 0x9fe   : > { %s2657_s23 = sadd.f32 1e-05, %s2653_s29 }
 0xa00   : > { %v2658_v34 = vstv %s2657_s23 }
 0xa01   : > { %6627 = vrsqrt.f32 %v2658_v34 }
 0xa0e   : > { %v6628_v36 = vpop.eup %6627 }
 0xa0f   : > { %6484 = vpush %v6628_v36 }
 0xa40   : > { %s6485_s27 = spop %6484 }
 0xa41   : > { %v2661_v28 = vstv %s6485_s27 }
 0xa42   : > { %v2662_v38 = vmul.f32 %v2661_v28, %v2655_v37  ;;  %v2663_v60 = vmul.f32 %v2661_v28, %v2656_v18 }
 0xa44   : > { %v2665_v39 = vmax.f32 %v2663_v60, 0.0  ;;  %v2664_v23 = vmax.f32 %v2662_v38, 0.0 }
 0xa46   : > { %6143 = vmatprep.subr.mxu1 %v2665_v39  ;;  %6150 = vmatprep.subr.mxu0 %v2665_v39 }
 0xa47   : > { %6144 = vmatpush3.msra.mxu1 %v2665_v39  ;;  %6151 = vmatpush3.msra.mxu0 %v2665_v39 }
 0xa48   : > { %6145 = vmatprep.subr.mxu1 %v2664_v23  ;;  %6152 = vmatprep.subr.mxu0 %v2664_v23 }
 0xa49   : > { %6146 = vmatpush3.msra.mxu1 %v2664_v23  ;;  %6153 = vmatpush3.msra.mxu0 %v2664_v23 }
 0xa4a   : > { %6148 = vmatmul.mubr.msk.f32.vlgmr.msra.gmra.mxu1 %vm1984_vm15, %v7181_v30  ;;  %6155 = vmatmul.mubr.msk.f32.vlgmr.msra.gmra.mxu0 %vm1984_vm15, %v7186_v31  ;;  %v5544_v30 = vld [vmem:[%s7793_s4 + $0x20] sm:$0xff]  ;;  %v5555_v31 = vld [vmem:[%s7793_s4 + $0x58] sm:$0xff] }
 0xa4b   : > { %6157 = vmatprep.subr.mxu1 %v5547_v0  ;;  %6165 = vmatprep.mubr.msk.f32.mxu1 %vm1497_vm14, %v2664_v23 }
 0xa4c   : > { %6158 = vmatpush3.msra.mxu1 %v5547_v0  ;;  %6168 = vmatprep.subr.mxu0 %v2819_v40 }
 0xa4d   : > { %6159 = vmatprep.subr.mxu1 %v5546_v35  ;;  %6169 = vmatpush3.msra.mxu0 %v2819_v40 }
 0xa4e   : > { %6160 = vmatpush3.msra.mxu1 %v5546_v35  ;;  %6170 = vmatprep.subr.mxu0 %v2818_v44 }
 0xa4f   : > { %6161 = vmatprep.subr.mxu1 %v5545_v43  ;;  %6171 = vmatpush3.msra.mxu0 %v2818_v44 }
 0xa50   : > { %6162 = vmatpush3.msra.mxu1 %v5545_v43  ;;  %6172 = vmatprep.subr.mxu0 %v2817_v5  ;;  %v3419_v43 = vld [vmem:[#allocation7 + $0x38] sm:$0xff] }
 0xa51   : > { %6163 = vmatprep.subr.mxu1 %v5544_v30  ;;  %6173 = vmatpush3.msra.mxu0 %v2817_v5  ;;  %v3417_v5 = vld [vmem:[#allocation7 + $0x28] sm:$0xff] }
 0xa52   : > { %6164 = vmatpush3.msra.mxu1 %v5544_v30  ;;  %6174 = vmatprep.subr.mxu0 %v2816_v46  ;;  %v3414_v30 = vld [vmem:[#allocation7 + $0x18] sm:$0xff] }
 0xa53   : > { %6166 = vmatmul.mubr.msk.f32.vlgmr.msra.gmra.mxu1 %vm1497_vm14, %v2665_v39  ;;  %6179 = vmatprep.subr.mxu1 %v5555_v31 }
 0xa54   : > { %6180 = vmatpush3.msra.mxu1 %v5555_v31  ;;  %6175 = vmatpush3.msra.mxu0 %v2816_v46  ;;  %v3418_v31 = vld [vmem:[#allocation7 + $0x30] sm:$0xff]  ;;  %v3416_v46 = vld [vmem:[#allocation7 + $0x20] sm:$0xff] }
 0xa55   : > { %6181 = vmatprep.subr.mxu1 %v5554_v50  ;;  %6190 = vmatprep.subr.mxu0 %v6883_v26 }
 0xa56   : > { %6182 = vmatpush3.msra.mxu1 %v5554_v50  ;;  %v3413_v50 = vld [vmem:[#allocation7 + $0x10] sm:$0xff] }
 0xa57   : > { %6183 = vmatprep.subr.mxu1 %v5553_v45 }
 0xa58   : > { %6184 = vmatpush3.msra.mxu1 %v5553_v45  ;;  %v3412_v45 = vld [vmem:[#allocation7 + $0x8] sm:$0xff] }
 0xa59   : > { %6185 = vmatprep.subr.mxu1 %v5552_v51 }
 0xa5a   : > { %6186 = vmatpush3.msra.mxu1 %v5552_v51  ;;  %v3570_v51 = vld [vmem:[#allocation7 + $0x58] sm:$0xff] }
 0xa5b   : > { %6204 = vmatprep.subr.mxu1 %v6883_v26 }
 0xb0a   : > { %v6149_v6 = vpop.f32.mrf.mxu1  ;;  %v6156_v47 = vpop.f32.mrf.mxu0 }
 0xb0c   : > { %v2732_v48 = vpop.f32.mrf.mxu1  ;;  %v2807_v24 = vpop.f32.mrf.mxu0 }
 0xb0d   : > { %6176 = vmatprep.mubr.msk.f32.mxu0 %vm1497_vm14, %v2732_v48  ;;  %6187 = vmatprep.mubr.msk.f32.mxu1 %vm1497_vm14, %v2807_v24  ;;  %v3411_v48 = vld [vmem:[#allocation7] sm:$0xff] }
 0xb0e   : > { %6177 = vmatmul.mubr.msk.f32.vlgmr.msra.gmra.mxu0 %vm1497_vm14, %v6149_v6  ;;  %6188 = vmatmul.mubr.msk.f32.vlgmr.msra.gmra.mxu1 %vm1497_vm14, %v6156_v47  ;;  %v3569_v6 = vld [vmem:[#allocation7 + $0x50] sm:$0xff]  ;;  %v3568_v47 = vld [vmem:[#allocation7 + $0x48] sm:$0xff]  ;;  %v3567_v24 = vld [vmem:[#allocation7 + $0x40] sm:$0xff] }
 0xb0f   : > { %6194 = vmatprep.mubr.msk.f32.mxu0 %vm6885_vm0, %v6883_v26  ;;  %6206 = vmatprep.mubr.msk.f32.mxu1 %vm6885_vm0, %v6883_v26 }
 0xb13   : > { %v6167_v49 = vpop.f32.mrf.mxu1 }
 0xb15   : > { %v2897_v15 = vpop.f32.mrf.mxu1 }
 0xbce   : > { %v6178_v52 = vpop.f32.mrf.mxu0  ;;  %v6189_v53 = vpop.f32.mrf.mxu1 }
 0xbcf   : > { %v2984_v54 = vadd.f32 %v6178_v52, %v6167_v49 }
 0xbd0   : > { %v2978_v55 = vpop.f32.mrf.mxu0  ;;  %v3064_v57 = vpop.f32.mrf.mxu1 }
 0xbd1   : > { %v3074_v8 = vadd.f32 %v6189_v53, %v2984_v54  ;;  %v2979_v56 = vadd.f32 %v2978_v55, %v2897_v15 }
 0xbd3   : > { %v3073_v58 = vadd.f32 %v3064_v57, %v2979_v56  ;;  %v3088_v59 = vmul.f32 %v3074_v8, %v3074_v8  ;;  %v3076_v62 = vsel %vm1497_vm14, %v3074_v8, 0.0 }
 0xbd5   : > { %v3075_v61 = vsel %vm1497_vm14, %v3073_v58, 0.0  ;;  %v3087_v63 = vmul.f32 %v3073_v58, %v3073_v58  ;;  %v3090_v4 = vsel %vm1497_vm14, %v3088_v59, 0.0 }
 0xbd6   : > { %v3077_v2 = vadd.f32 %v3076_v62, %v3075_v61 }
 0xbd7   : > { %v3089_v3 = vsel %vm1497_vm14, %v3087_v63, 0.0 }
 0xbd8   : > { %3078 = vadd.xlane.f32.xlu0 %v3077_v2  ;;  %v3091_v7 = vadd.f32 %v3090_v4, %v3089_v3  ;;  %v3840_v3 = vld [vmem:[#allocation8 + $0x78] sm:$0xff]  ;;  %v3839_v4 = vld [vmem:[#allocation8 + $0x70] sm:$0xff] }
 0xbda   : > { %3092 = vadd.xlane.f32.xlu1 %v3091_v7  ;;  %v3838_v7 = vld [vmem:[#allocation8 + $0x68] sm:$0xff] }
 0xc61   : > { %v3079_v9 = vpop.xlane.xlu0 %3078 }
 0xc62   : > { %v3080_v32 = vrot.slane %v3079_v9, 4 }
 0xc63   : > { %v3093_v41 = vpop.xlane.xlu1 %3092 }
 0xc64   : > { %v3081_v1 = vadd.f32 %v3080_v32, %v3079_v9  ;;  %v3094_v12 = vrot.slane %v3093_v41, 4  ;;  %v3837_v9 = vld [vmem:[#allocation8 + $0x60] sm:$0xff]  ;;  %v3836_v32 = vld [vmem:[#allocation8 + $0x58] sm:$0xff] }
 0xc66   : > { %v3082_v13 = vrot.slane %v3081_v1, 2  ;;  %v3095_v14 = vadd.f32 %v3094_v12, %v3093_v41 }
 0xc68   : > { %v3096_v33 = vrot.slane %v3095_v14, 2  ;;  %v3083_v42 = vadd.f32 %v3082_v13, %v3081_v1 }
 0xc6a   : > { %v3084_v16 = vrot.slane %v3083_v42, 1  ;;  %v3097_v19 = vadd.f32 %v3096_v33, %v3095_v14 }
 0xc6c   : > { %v3085_v20 = vadd.f32 %v3084_v16, %v3083_v42  ;;  %v3098_v21 = vrot.slane %v3097_v19, 1 }
 0xc6e   : > { %6486 = vpush %v3085_v20  ;;  %v3099_v22 = vadd.f32 %v3098_v21, %v3097_v19 }
 0xc70   : > { %6488 = vpush %v3099_v22  ;;  %v3835_v22 = vld [vmem:[#allocation8 + $0x50] sm:$0xff] }
 0xc9f   : > { %s6487_s23 = spop %6486 }
 0xca0   : > { %s3103_s27 = smul.f32 0.001953125, %s6487_s23 }
 0xca1   : > { %s6489_s22 = spop %6488 }
 0xca2   : > { %s3107_s16 = smul.f32 %s3103_s27, %s3103_s27  ;;  %v3110_v36 = vstv %s3103_s27 }
 0xca3   : > { %s3106_s2 = smul.f32 0.001953125, %s6489_s22  ;;  %v3111_v17 = vsub.f32 %v3073_v58, %v3110_v36  ;;  %v3112_v37 = vsub.f32 %v3074_v8, %v3110_v36  ;;  %v3834_v36 = vld [vmem:[#allocation8 + $0x48] sm:$0xff] }
 0xca5   : > { %s3108_s25 = ssub.f32 %s3106_s2, %s3107_s16 }
 0xca7   : > { %s3109_s18 = smax.f32 %s6884_s14, %s3108_s25 }
 0xca8   : > { %s3113_s26 = sadd.f32 1e-05, %s3109_s18 }
 0xcaa   : > { %v3114_v25 = vstv %s3113_s26 }
 0xcab   : > { %6629 = vrsqrt.f32 %v3114_v25 }
 0xcb8   : > { %v6630_v34 = vpop.eup %6629 }
 0xcb9   : > { %6490 = vpush %v6630_v34 }
 0xcea   : > { %s6491_s28 = spop %6490 }
 0xceb   : > { %v3117_v18 = vstv %s6491_s28 }
 0xcec   : > { %v3118_v28 = vmul.f32 %v3117_v18, %v3111_v17  ;;  %v3119_v38 = vmul.f32 %v3117_v18, %v3112_v37  ;;  %v3833_v37 = vld [vmem:[#allocation8 + $0x40] sm:$0xff] }
 0xcee   : > { %v3121_v60 = vmax.f32 %v3119_v38, 0.0  ;;  %v3120_v39 = vmax.f32 %v3118_v28, 0.0 }
 0xcf0   : > { %6191 = vmatpush3.msra.mxu0 %v3121_v60 }
 0xcf1   : > { %6192 = vmatprep.subr.mxu0 %v6883_v26 }
 0xcf2   : > { %6193 = vmatpush3.msra.mxu0 %v3120_v39 }
 0xcf3   : > { %6195 = vmatmul.mubr.msk.f32.vlgmr.msra.gmra.mxu0 %vm1984_vm15, %v7352_v10  ;;  %6197 = vmatprep.subr.mxu0 %v6883_v26 }
 0xcf4   : > { %6198 = vmatpush3.msra.mxu0 %v3121_v60  ;;  %6201 = vmatprep.mubr.msk.f32.mxu0 %vm6885_vm0, %v6883_v26 }
 0xcf5   : > { %6199 = vmatprep.subr.mxu0 %v6883_v26 }
 0xcf6   : > { %6200 = vmatpush3.msra.mxu0 %v3120_v39 }
 0xcf7   : > { %6202 = vmatmul.mubr.msk.f32.vlgmr.msra.gmra.mxu0 %vm1984_vm15, %v7355_v11  ;;  %6209 = vmatprep.subr.mxu0 %v6883_v26 }
 0xcf8   : > { %6211 = vmatprep.mubr.msk.f32.mxu0 %vm6885_vm0, %v6883_v26 }
 0xdb3   : > { %v3190_v23 = vpop.f32.mrf.mxu0 }
 0xdb5   : > { %v6196_v0 = vpop.f32.mrf.mxu0 }
 0xdb7   : > { %v3262_v40 = vpop.f32.mrf.mxu0 }
 0xdb8   : > { %v3266_v35 = vmax.f32 %v3190_v23, %v3262_v40  ;;  %v3995_v40 = vld [vmem:[#allocation8 + $0xb8] sm:$0xff] }
 0xdb9   : > { %v6203_v44 = vpop.f32.mrf.mxu0 }
 0xdba   : > { %6205 = vmatpush3.msra.mxu1 %v3266_v35  ;;  %6210 = vmatpush3.msra.mxu0 %v3266_v35  ;;  %v3831_v44 = vld [vmem:[#allocation8 + $0x38] sm:$0xff] }
 0xdbb   : > { %6207 = vmatmul.mubr.msk.f32.vlgmr.msra.gmra.mxu1 %vm1203_vm3, %v7168_v27  ;;  %6212 = vmatmul.mubr.msk.f32.vlgmr.msra.gmra.mxu0 %vm1203_vm3, %v7176_v29 }
 0xdbc   : > { %6214 = vmatprep.subr.mxu1 %v6883_v26  ;;  %6222 = vmatprep.mubr.msk.f32.mxu1 %vm6885_vm0, %v6883_v26 }
 0xdbd   : > { %6215 = vmatpush3.msra.mxu1 %v3419_v43  ;;  %6225 = vmatprep.subr.mxu0 %v6883_v26  ;;  %v3993_v43 = vld [vmem:[#allocation8 + $0xa8] sm:$0xff] }
 0xdbe   : > { %6216 = vmatprep.subr.mxu1 %v6883_v26  ;;  %6226 = vmatpush3.msra.mxu0 %v3414_v30  ;;  %v3830_v30 = vld [vmem:[#allocation8 + $0x30] sm:$0xff] }
 0xdbf   : > { %6217 = vmatpush3.msra.mxu1 %v3418_v31  ;;  %6227 = vmatprep.subr.mxu0 %v6883_v26  ;;  %v3992_v31 = vld [vmem:[#allocation8 + $0xa0] sm:$0xff] }
 0xdc0   : > { %6218 = vmatprep.subr.mxu1 %v6883_v26  ;;  %6228 = vmatpush3.msra.mxu0 %v3413_v50  ;;  %v3829_v50 = vld [vmem:[#allocation8 + $0x28] sm:$0xff] }
 0xdc1   : > { %6219 = vmatpush3.msra.mxu1 %v3417_v5  ;;  %6229 = vmatprep.subr.mxu0 %v6883_v26  ;;  %v3991_v5 = vld [vmem:[#allocation8 + $0x98] sm:$0xff] }
 0xdc2   : > { %6220 = vmatprep.subr.mxu1 %v6883_v26  ;;  %6230 = vmatpush3.msra.mxu0 %v3412_v45  ;;  %v3828_v45 = vld [vmem:[#allocation8 + $0x20] sm:$0xff] }
 0xdc3   : > { %6221 = vmatpush3.msra.mxu1 %v3416_v46  ;;  %6231 = vmatprep.subr.mxu0 %v6883_v26  ;;  %v3827_v46 = vld [vmem:[#allocation8 + $0x18] sm:$0xff] }
 0xdc4   : > { %6223 = vmatmul.mubr.msk.f32.vlgmr.msra.gmra.mxu1 %vm1497_vm14, %v3266_v35  ;;  %6236 = vmatprep.subr.mxu1 %v6883_v26  ;;  %v3994_v35 = vld [vmem:[#allocation8 + $0xb0] sm:$0xff] }
 0xdc5   : > { %6237 = vmatpush3.msra.mxu1 %v3570_v51  ;;  %6233 = vmatprep.mubr.msk.f32.mxu0 %vm6885_vm0, %v6883_v26  ;;  %v3826_v51 = vld [vmem:[#allocation8 + $0x10] sm:$0xff] }
 0xdc6   : > { %6238 = vmatprep.subr.mxu1 %v6883_v26  ;;  %6244 = vmatprep.mubr.msk.f32.mxu1 %vm6885_vm0, %v6883_v26 }
 0xdc7   : > { %6239 = vmatpush3.msra.mxu1 %v3569_v6  ;;  %6232 = vmatpush3.msra.mxu0 %v3411_v48  ;;  %v3825_v6 = vld [vmem:[#allocation8 + $0x8] sm:$0xff]  ;;  %v3990_v48 = vld [vmem:[#allocation8 + $0x90] sm:$0xff] }
 0xdc8   : > { %6240 = vmatprep.subr.mxu1 %v6883_v26  ;;  %6247 = vmatprep.subr.mxu0 %v6883_v26 }
 0xdc9   : > { %6241 = vmatpush3.msra.mxu1 %v3568_v47  ;;  %v3824_v47 = vld [vmem:[#allocation8] sm:$0xff] }
 0xdca   : > { %6242 = vmatprep.subr.mxu1 %v6883_v26 }
 0xdcb   : > { %6243 = vmatpush3.msra.mxu1 %v3567_v24  ;;  %v3989_v24 = vld [vmem:[#allocation8 + $0x88] sm:$0xff] }
 0xdcc   : > { %6257 = vmatprep.subr.mxu1 %v6883_v26 }
 0xe7b   : > { %v3335_v49 = vpop.f32.mrf.mxu1  ;;  %v3407_v15 = vpop.f32.mrf.mxu0 }
 0xe7c   : > { %6234 = vmatmul.mubr.msk.f32.vlgmr.msra.gmra.mxu0 %vm1497_vm14, %v3335_v49  ;;  %6245 = vmatmul.mubr.msk.f32.vlgmr.msra.gmra.mxu1 %vm1497_vm14, %v3407_v15  ;;  %v3988_v49 = vld [vmem:[#allocation8 + $0x80] sm:$0xff] }
 0xe7d   : > { %v6208_v52 = vpop.f32.mrf.mxu1  ;;  %v6213_v53 = vpop.f32.mrf.mxu0  ;;  %6273 = vmatprep.mubr.msk.f32.mxu1 %vm6885_vm0, %v6883_v26  ;;  %6249 = vmatprep.mubr.msk.f32.mxu0 %vm6885_vm0, %v6883_v26 }
 0xe7e   : > { %6258 = vmatpush3.msra.mxu1 %v3840_v3 }
 0xe7f   : > { %6259 = vmatprep.subr.mxu1 %v6883_v26 }
 0xe80   : > { %6260 = vmatpush3.msra.mxu1 %v3839_v4 }
 0xe81   : > { %6261 = vmatprep.subr.mxu1 %v6883_v26 }
 0xe82   : > { %6262 = vmatpush3.msra.mxu1 %v3838_v7 }
 0xe83   : > { %6263 = vmatprep.subr.mxu1 %v6883_v26 }
 0xe84   : > { %v3489_v54 = vpop.f32.mrf.mxu1  ;;  %6264 = vmatpush3.msra.mxu1 %v3837_v9 }
 0xe85   : > { %6265 = vmatprep.subr.mxu1 %v6883_v26 }
 0xe86   : > { %v6224_v55 = vpop.f32.mrf.mxu1  ;;  %6266 = vmatpush3.msra.mxu1 %v3836_v32 }
 0xe87   : > { %6267 = vmatprep.subr.mxu1 %v6883_v26 }
 0xe88   : > { %6268 = vmatpush3.msra.mxu1 %v3835_v22  ;;  %v4416_v22 = vld [vmem:[#allocation10 + $0x70] sm:$0xff] }
 0xe89   : > { %6269 = vmatprep.subr.mxu1 %v6883_v26 }
 0xe8a   : > { %6270 = vmatpush3.msra.mxu1 %v3834_v36 }
 0xe8b   : > { %6271 = vmatprep.subr.mxu1 %v6883_v26 }
 0xe8c   : > { %6272 = vmatpush3.msra.mxu1 %v3833_v37 }
 0xe8d   : > { %6295 = vmatprep.subr.mxu1 %v6883_v26 }
 0xf3c   : > { %v3562_v8 = vpop.f32.mrf.mxu0  ;;  %v3640_v56 = vpop.f32.mrf.mxu1 }
 0xf3d   : > { %v3563_v57 = vadd.f32 %v3562_v8, %v3489_v54 }
 0xf3e   : > { %v6235_v58 = vpop.f32.mrf.mxu0  ;;  %v6246_v59 = vpop.f32.mrf.mxu1 }
 0xf3f   : > { %v3644_v61 = vadd.f32 %v3640_v56, %v3563_v57 }
 0xf41   : > { %v3645_v62 = vsel %vm533_vm6, %v3644_v61, 0.0  ;;  %v3655_v63 = vmul.f32 %v3644_v61, %v3644_v61 }
 0xf42   : > { %3646 = vadd.xlane.f32.xlu0 %v3645_v62 }
 0xf43   : > { %v3656_v2 = vsel %vm533_vm6, %v3655_v63, 0.0 }
 0xf44   : > { %3657 = vadd.xlane.f32.xlu1 %v3656_v2 }
 0xfcb   : > { %v3647_v41 = vpop.xlane.xlu0 %3646 }
 0xfcc   : > { %v3648_v1 = vrot.slane %v3647_v41, 4 }
 0xfcd   : > { %v3658_v12 = vpop.xlane.xlu1 %3657 }
 0xfce   : > { %v3649_v13 = vadd.f32 %v3648_v1, %v3647_v41  ;;  %v3659_v14 = vrot.slane %v3658_v12, 4 }
 0xfd0   : > { %v3650_v33 = vrot.slane %v3649_v13, 2  ;;  %v3660_v42 = vadd.f32 %v3659_v14, %v3658_v12 }
 0xfd2   : > { %v3661_v16 = vrot.slane %v3660_v42, 2  ;;  %v3651_v19 = vadd.f32 %v3650_v33, %v3649_v13 }
 0xfd4   : > { %v3652_v20 = vrot.slane %v3651_v19, 1  ;;  %v3662_v21 = vadd.f32 %v3661_v16, %v3660_v42 }
 0xfd6   : > { %v3653_v25 = vadd.f32 %v3652_v20, %v3651_v19  ;;  %v3663_v34 = vrot.slane %v3662_v21, 1 }
 0xfd8   : > { %6492 = vpush %v3653_v25  ;;  %v3664_v17 = vadd.f32 %v3663_v34, %v3662_v21  ;;  %v4417_v21 = vld [vmem:[#allocation10 + $0x78] sm:$0xff]  ;;  %v4415_v25 = vld [vmem:[#allocation10 + $0x68] sm:$0xff]  ;;  %v4414_v34 = vld [vmem:[#allocation10 + $0x60] sm:$0xff] }
 0xfda   : > { %6494 = vpush %v3664_v17 }
0x1009   : > { %s6493_s17 = spop %6492 }
0x100a   : > { %s3668_s21 = smul.f32 0.001953125, %s6493_s17 }
0x100b   : > { %s6495_s24 = spop %6494 }
0x100c   : > { %s3672_s29 = smul.f32 %s3668_s21, %s3668_s21  ;;  %v3675_v38 = vstv %s3668_s21 }
0x100d   : > { %s3671_s23 = smul.f32 0.001953125, %s6495_s24  ;;  %v3676_v60 = vsub.f32 %v3644_v61, %v3675_v38 }
0x100f   : > { %s3673_s27 = ssub.f32 %s3671_s23, %s3672_s29 }
0x1011   : > { %s3674_s22 = smax.f32 %s6884_s14, %s3673_s27 }
0x1012   : > { %s3677_s16 = sadd.f32 1e-05, %s3674_s22 }
0x1014   : > { %v3678_v18 = vstv %s3677_s16 }
0x1015   : > { %6631 = vrsqrt.f32 %v3678_v18 }
0x1022   : > { %v6632_v28 = vpop.eup %6631 }
0x1023   : > { %6496 = vpush %v6632_v28 }
0x1054   : > { %s6497_s2 = spop %6496 }
0x1055   : > { %v3681_v39 = vstv %s6497_s2 }
0x1056   : > { %v3682_v23 = vmul.f32 %v3681_v39, %v3676_v60  ;;  %v4413_v39 = vld [vmem:[#allocation10 + $0x58] sm:$0xff] }
0x1058   : > { %v3683_v0 = vmax.f32 %v3682_v23, 0.0  ;;  %v4412_v23 = vld [vmem:[#allocation10 + $0x50] sm:$0xff] }
0x105a   : > { %6248 = vmatpush3.msra.mxu0 %v3683_v0  ;;  %6274 = vmatmul.mubr.msk.f32.vlgmr.msra.gmra.mxu1 %vm533_vm6, %v3683_v0 }
0x105b   : > { %6250 = vmatmul.mubr.msk.f32.vlgmr.msra.gmra.mxu0 %vm1203_vm3, %v7168_v27  ;;  %6252 = vmatprep.subr.mxu0 %v6883_v26 }
0x105c   : > { %6253 = vmatpush3.msra.mxu0 %v3683_v0  ;;  %6254 = vmatprep.mubr.msk.f32.mxu0 %vm6885_vm0, %v6883_v26  ;;  %v4411_v0 = vld [vmem:[#allocation10 + $0x48] sm:$0xff] }
0x105d   : > { %6276 = vmatprep.subr.mxu0 %v6883_v26  ;;  %6296 = vmatpush3.msra.mxu1 %v3995_v40  ;;  %v4410_v40 = vld [vmem:[#allocation10 + $0x40] sm:$0xff] }
0x105e   : > { %6297 = vmatprep.subr.mxu1 %v6883_v26  ;;  %6311 = vmatprep.mubr.msk.f32.mxu1 %vm6885_vm0, %v6883_v26 }
0x105f   : > { %6255 = vmatmul.mubr.msk.f32.vlgmr.msra.gmra.mxu0 %vm1203_vm3, %v7176_v29  ;;  %6298 = vmatpush3.msra.mxu1 %v3994_v35 }
0x1060   : > { %6277 = vmatpush3.msra.mxu0 %v3831_v44  ;;  %6299 = vmatprep.subr.mxu1 %v6883_v26 }
0x1061   : > { %6278 = vmatprep.subr.mxu0 %v6883_v26  ;;  %6300 = vmatpush3.msra.mxu1 %v3993_v43 }
0x1062   : > { %6279 = vmatpush3.msra.mxu0 %v3830_v30  ;;  %6301 = vmatprep.subr.mxu1 %v6883_v26 }
0x1063   : > { %6280 = vmatprep.subr.mxu0 %v6883_v26  ;;  %6302 = vmatpush3.msra.mxu1 %v3992_v31 }
0x1064   : > { %6281 = vmatpush3.msra.mxu0 %v3829_v50  ;;  %6303 = vmatprep.subr.mxu1 %v6883_v26  ;;  %v4571_v50 = vld [vmem:[#allocation10 + $0xb8] sm:$0xff] }
0x1065   : > { %6282 = vmatprep.subr.mxu0 %v6883_v26  ;;  %6304 = vmatpush3.msra.mxu1 %v3991_v5  ;;  %v4570_v5 = vld [vmem:[#allocation10 + $0xb0] sm:$0xff] }
0x1066   : > { %6283 = vmatpush3.msra.mxu0 %v3828_v45  ;;  %6305 = vmatprep.subr.mxu1 %v6883_v26  ;;  %v4408_v45 = vld [vmem:[#allocation10 + $0x38] sm:$0xff] }
0x1067   : > { %6284 = vmatprep.subr.mxu0 %v6883_v26  ;;  %6292 = vmatprep.mubr.msk.f32.mxu0 %vm6885_vm0, %v6883_v26 }
0x1068   : > { %6285 = vmatpush3.msra.mxu0 %v3827_v46  ;;  %6306 = vmatpush3.msra.mxu1 %v3990_v48  ;;  %v4569_v46 = vld [vmem:[#allocation10 + $0xa8] sm:$0xff]  ;;  %v4567_v48 = vld [vmem:[#allocation10 + $0x98] sm:$0xff] }
0x1069   : > { %6286 = vmatprep.subr.mxu0 %v6883_v26  ;;  %6307 = vmatprep.subr.mxu1 %v6883_v26 }
0x106a   : > { %6287 = vmatpush3.msra.mxu0 %v3826_v51  ;;  %6308 = vmatpush3.msra.mxu1 %v3989_v24  ;;  %v4407_v51 = vld [vmem:[#allocation10 + $0x30] sm:$0xff]  ;;  %v4405_v24 = vld [vmem:[#allocation10 + $0x20] sm:$0xff] }
0x106b   : > { %6288 = vmatprep.subr.mxu0 %v6883_v26  ;;  %6309 = vmatprep.subr.mxu1 %v6883_v26 }
0x106c   : > { %6289 = vmatpush3.msra.mxu0 %v3825_v6  ;;  %6310 = vmatpush3.msra.mxu1 %v3988_v49  ;;  %v4568_v6 = vld [vmem:[#allocation10 + $0xa0] sm:$0xff]  ;;  %v4404_v49 = vld [vmem:[#allocation10 + $0x18] sm:$0xff] }
0x106d   : > { %6290 = vmatprep.subr.mxu0 %v6883_v26  ;;  %6334 = vmatprep.subr.mxu1 %v6883_v26 }
0x106e   : > { %6291 = vmatpush3.msra.mxu0 %v3824_v47  ;;  %v4406_v47 = vld [vmem:[#allocation10 + $0x28] sm:$0xff] }
0x106f   : > { %6314 = vmatprep.subr.mxu0 %v6883_v26 }
0x111a   : > { %v3910_v15 = vpop.f32.mrf.mxu1 }
0x111b   : > { %v3750_v52 = vpop.f32.mrf.mxu0 }
0x111c   : > { %v6275_v53 = vpop.f32.mrf.mxu1  ;;  %6293 = vmatmul.mubr.msk.f32.vlgmr.msra.gmra.mxu0 %vm533_vm6, %v3750_v52  ;;  %v4402_v52 = vld [vmem:[#allocation10 + $0x8] sm:$0xff] }
0x111d   : > { %v6251_v54 = vpop.f32.mrf.mxu0  ;;  %6316 = vmatprep.mubr.msk.f32.mxu0 %vm6885_vm0, %v6883_v26  ;;  %v4401_v53 = vld [vmem:[#allocation10] sm:$0xff] }
0x111e   : > { %v4566_v54 = vld [vmem:[#allocation10 + $0x90] sm:$0xff] }
0x111f   : > { %v3820_v55 = vpop.f32.mrf.mxu0 }
0x1120   : > { %6312 = vmatmul.mubr.msk.f32.vlgmr.msra.gmra.mxu1 %vm533_vm6, %v3820_v55  ;;  %v4565_v55 = vld [vmem:[#allocation10 + $0x88] sm:$0xff] }
0x1121   : > { %v6256_v8 = vpop.f32.mrf.mxu0  ;;  %6350 = vmatprep.mubr.msk.f32.mxu1 %vm6885_vm0, %v6883_v26  ;;  %6335 = vmatpush3.msra.mxu1 %v4417_v21 }
0x1122   : > { %6336 = vmatprep.subr.mxu1 %v6883_v26  ;;  %v4564_v8 = vld [vmem:[#allocation10 + $0x80] sm:$0xff] }
0x1123   : > { %6337 = vmatpush3.msra.mxu1 %v4416_v22 }
0x1124   : > { %6338 = vmatprep.subr.mxu1 %v6883_v26 }
0x1125   : > { %6339 = vmatpush3.msra.mxu1 %v4415_v25 }
0x1126   : > { %6340 = vmatprep.subr.mxu1 %v6883_v26 }
0x1127   : > { %6341 = vmatpush3.msra.mxu1 %v4414_v34 }
0x1128   : > { %6342 = vmatprep.subr.mxu1 %v6883_v26 }
0x1129   : > { %6343 = vmatpush3.msra.mxu1 %v4413_v39  ;;  %v4831_v39 = vld [vmem:[#allocation11 + $0x10] sm:$0xff] }
0x112a   : > { %6344 = vmatprep.subr.mxu1 %v6883_v26 }
0x112b   : > { %6345 = vmatpush3.msra.mxu1 %v4412_v23  ;;  %v4830_v23 = vld [vmem:[#allocation11 + $0x8] sm:$0xff] }
0x112c   : > { %6346 = vmatprep.subr.mxu1 %v6883_v26 }
0x112d   : > { %6347 = vmatpush3.msra.mxu1 %v4411_v0 }
0x112e   : > { %6348 = vmatprep.subr.mxu1 %v6883_v26 }
0x112f   : > { %6349 = vmatpush3.msra.mxu1 %v4410_v40 }
0x1130   : > { %6372 = vmatprep.subr.mxu1 %v6883_v26 }
0x11dc   : > { %v3983_v56 = vpop.f32.mrf.mxu0 }
0x11dd   : > { %v3984_v58 = vadd.f32 %v3983_v56, %v3910_v15  ;;  %v4403_v15 = vld [vmem:[#allocation10 + $0x10] sm:$0xff] }
0x11de   : > { %v6294_v57 = vpop.f32.mrf.mxu0 }
0x11e0   : > { %v4065_v59 = vpop.f32.mrf.mxu1 }
0x11e1   : > { %v4069_v61 = vadd.f32 %v4065_v59, %v3984_v58 }
0x11e2   : > { %v6313_v62 = vpop.f32.mrf.mxu1 }
0x11e3   : > { %v4070_v63 = vsel %vm533_vm6, %v4069_v61, 0.0  ;;  %v4080_v2 = vmul.f32 %v4069_v61, %v4069_v61 }
0x11e4   : > { %4071 = vadd.xlane.f32.xlu0 %v4070_v63 }
0x11e5   : > { %v4081_v3 = vsel %vm533_vm6, %v4080_v2, 0.0 }
0x11e6   : > { %4082 = vadd.xlane.f32.xlu1 %v4081_v3 }
0x126d   : > { %v4072_v4 = vpop.xlane.xlu0 %4071 }
0x126e   : > { %v4073_v7 = vrot.slane %v4072_v4, 4 }
0x126f   : > { %v4083_v9 = vpop.xlane.xlu1 %4082 }
0x1270   : > { %v4074_v32 = vadd.f32 %v4073_v7, %v4072_v4  ;;  %v4084_v41 = vrot.slane %v4083_v9, 4 }
0x1272   : > { %v4075_v1 = vrot.slane %v4074_v32, 2  ;;  %v4085_v12 = vadd.f32 %v4084_v41, %v4083_v9 }
0x1274   : > { %v4086_v13 = vrot.slane %v4085_v12, 2  ;;  %v4076_v14 = vadd.f32 %v4075_v1, %v4074_v32 }
0x1276   : > { %v4077_v33 = vrot.slane %v4076_v14, 1  ;;  %v4087_v42 = vadd.f32 %v4086_v13, %v4085_v12 }
0x1278   : > { %v4078_v16 = vadd.f32 %v4077_v33, %v4076_v14  ;;  %v4088_v19 = vrot.slane %v4087_v42, 1 }
0x127a   : > { %6498 = vpush %v4078_v16  ;;  %v4089_v20 = vadd.f32 %v4088_v19, %v4087_v42 }
0x127c   : > { %6500 = vpush %v4089_v20 }
0x12ab   : > { %s6499_s25 = spop %6498 }
0x12ac   : > { %s4093_s18 = smul.f32 0.001953125, %s6499_s25 }
0x12ad   : > { %s6501_s26 = spop %6500 }
0x12ae   : > { %s4097_s28 = smul.f32 %s4093_s18, %s4093_s18  ;;  %v4100_v37 = vstv %s4093_s18 }
0x12af   : > { %s4096_s17 = smul.f32 0.001953125, %s6501_s26  ;;  %v4101_v18 = vsub.f32 %v4069_v61, %v4100_v37  ;;  %v4836_v37 = vld [vmem:[#allocation11 + $0x38] sm:$0xff] }
0x12b1   : > { %s4098_s21 = ssub.f32 %s4096_s17, %s4097_s28 }
0x12b3   : > { %s4099_s24 = smax.f32 %s6884_s14, %s4098_s21 }
0x12b4   : > { %s4102_s29 = sadd.f32 1e-05, %s4099_s24 }
0x12b6   : > { %v4103_v36 = vstv %s4102_s29 }
0x12b7   : > { %6633 = vrsqrt.f32 %v4103_v36 }
0x12c4   : > { %v6634_v17 = vpop.eup %6633 }
0x12c5   : > { %6502 = vpush %v6634_v17 }
0x12f6   : > { %s6503_s23 = spop %6502 }
0x12f7   : > { %v4106_v28 = vstv %s6503_s23 }
0x12f8   : > { %v4107_v38 = vmul.f32 %v4106_v28, %v4101_v18  ;;  %v4835_v18 = vld [vmem:[#allocation11 + $0x30] sm:$0xff]  ;;  %v4834_v28 = vld [vmem:[#allocation11 + $0x28] sm:$0xff] }
0x12fa   : > { %v4108_v60 = vmax.f32 %v4107_v38, 0.0  ;;  %v4833_v38 = vld [vmem:[#allocation11 + $0x20] sm:$0xff] }
0x12fc   : > { %6315 = vmatpush3.msra.mxu0 %v4108_v60 }
0x12fd   : > { %6317 = vmatmul.mubr.msk.f32.vlgmr.msra.gmra.mxu0 %vm1203_vm3, %v7352_v10  ;;  %6319 = vmatprep.subr.mxu0 %v6883_v26 }
0x12fe   : > { %6320 = vmatpush3.msra.mxu0 %v4108_v60  ;;  %6321 = vmatprep.mubr.msk.f32.mxu0 %vm6885_vm0, %v6883_v26  ;;  %v4832_v60 = vld [vmem:[#allocation11 + $0x18] sm:$0xff] }
0x12ff   : > { %6324 = vmatprep.subr.mxu0 %v6883_v26 }
0x1301   : > { %6322 = vmatmul.mubr.msk.f32.vlgmr.msra.gmra.mxu0 %vm1203_vm3, %v7355_v11 }
0x1302   : > { %6326 = vmatprep.mubr.msk.f32.mxu0 %vm6885_vm0, %v6883_v26 }
0x13bd   : > { %v4177_v35 = vpop.f32.mrf.mxu0 }
0x13bf   : > { %v6318_v44 = vpop.f32.mrf.mxu0 }
0x13c1   : > { %v4249_v43 = vpop.f32.mrf.mxu0 }
0x13c2   : > { %v4253_v30 = vmax.f32 %v4177_v35, %v4249_v43 }
0x13c3   : > { %v6323_v31 = vpop.f32.mrf.mxu0 }
0x13c4   : > { %6325 = vmatpush3.msk.msra.mxu0 %vm820_vm7, %v4253_v30  ;;  %6351 = vmatmul.mubr.msk.f32.vlgmr.msra.gmra.mxu1 %vm533_vm6, %v4253_v30 }
0x13c5   : > { %6327 = vmatmul.mubr.msk.f32.vlgmr.msra.gmra.mxu0 %vm795_vm2, %v7168_v27  ;;  %6329 = vmatprep.subr.mxu0 %v6883_v26 }
0x13c6   : > { %6330 = vmatpush3.msk.msra.mxu0 %vm820_vm7, %v4253_v30  ;;  %6331 = vmatprep.mubr.msk.f32.mxu0 %vm6885_vm0, %v6883_v26 }
0x13c7   : > { %6353 = vmatprep.subr.mxu0 %v6883_v26  ;;  %6373 = vmatpush3.msra.mxu1 %v4571_v50  ;;  %v4845_v50 = vld [vmem:[#allocation11 + $0x78] sm:$0xff] }
0x13c8   : > { %6374 = vmatprep.subr.mxu1 %v6883_v26  ;;  %6388 = vmatprep.mubr.msk.f32.mxu1 %vm6885_vm0, %v6883_v26 }
0x13c9   : > { %6332 = vmatmul.mubr.msk.f32.vlgmr.msra.gmra.mxu0 %vm795_vm2, %v7176_v29  ;;  %6375 = vmatpush3.msra.mxu1 %v4570_v5  ;;  %v4844_v5 = vld [vmem:[#allocation11 + $0x70] sm:$0xff] }
0x13ca   : > { %6354 = vmatpush3.msra.mxu0 %v4408_v45  ;;  %6376 = vmatprep.subr.mxu1 %v6883_v26  ;;  %v4842_v45 = vld [vmem:[#allocation11 + $0x60] sm:$0xff] }
0x13cb   : > { %6355 = vmatprep.subr.mxu0 %v6883_v26  ;;  %6377 = vmatpush3.msra.mxu1 %v4569_v46  ;;  %v4841_v46 = vld [vmem:[#allocation11 + $0x58] sm:$0xff] }
0x13cc   : > { %6356 = vmatpush3.msra.mxu0 %v4407_v51  ;;  %6378 = vmatprep.subr.mxu1 %v6883_v26  ;;  %v4839_v51 = vld [vmem:[#allocation11 + $0x48] sm:$0xff] }
0x13cd   : > { %6357 = vmatprep.subr.mxu0 %v6883_v26  ;;  %6379 = vmatpush3.msra.mxu1 %v4568_v6  ;;  %v4838_v6 = vld [vmem:[#allocation11 + $0x40] sm:$0xff] }
0x13ce   : > { %6358 = vmatpush3.msra.mxu0 %v4406_v47  ;;  %6380 = vmatprep.subr.mxu1 %v6883_v26  ;;  %v4999_v47 = vld [vmem:[#allocation11 + $0xb8] sm:$0xff] }
0x13cf   : > { %6359 = vmatprep.subr.mxu0 %v6883_v26  ;;  %6381 = vmatpush3.msra.mxu1 %v4567_v48  ;;  %v4998_v48 = vld [vmem:[#allocation11 + $0xb0] sm:$0xff] }
0x13d0   : > { %6360 = vmatpush3.msra.mxu0 %v4405_v24  ;;  %6382 = vmatprep.subr.mxu1 %v6883_v26  ;;  %v4997_v24 = vld [vmem:[#allocation11 + $0xa8] sm:$0xff] }
0x13d1   : > { %6361 = vmatprep.subr.mxu0 %v6883_v26  ;;  %6369 = vmatprep.mubr.msk.f32.mxu0 %vm6885_vm0, %v6883_v26 }
0x13d2   : > { %6362 = vmatpush3.msra.mxu0 %v4404_v49  ;;  %6383 = vmatpush3.msra.mxu1 %v4566_v54  ;;  %v4996_v49 = vld [vmem:[#allocation11 + $0xa0] sm:$0xff]  ;;  %v4993_v54 = vld [vmem:[#allocation11 + $0x88] sm:$0xff] }
0x13d3   : > { %6363 = vmatprep.subr.mxu0 %v6883_v26  ;;  %6384 = vmatprep.subr.mxu1 %v6883_v26 }
0x13d4   : > { %6364 = vmatpush3.msra.mxu0 %v4403_v15  ;;  %6385 = vmatpush3.msra.mxu1 %v4565_v55  ;;  %v4995_v15 = vld [vmem:[#allocation11 + $0x98] sm:$0xff]  ;;  %v4992_v55 = vld [vmem:[#allocation11 + $0x80] sm:$0xff] }
0x13d5   : > { %6365 = vmatprep.subr.mxu0 %v6883_v26  ;;  %6386 = vmatprep.subr.mxu1 %v6883_v26 }
0x13d6   : > { %6366 = vmatpush3.msra.mxu0 %v4402_v52  ;;  %6387 = vmatpush3.msra.mxu1 %v4564_v8  ;;  %v4829_v52 = vld [vmem:[#allocation11] sm:$0xff] }
0x13d7   : > { %6367 = vmatprep.subr.mxu0 %v6883_v26  ;;  %6420 = vmatprep.subr.mxu1 %v6883_v26 }
0x13d8   : > { %6368 = vmatpush3.msra.mxu0 %v4401_v53  ;;  %v4994_v53 = vld [vmem:[#allocation11 + $0x90] sm:$0xff] }
0x13d9   : > { %6391 = vmatprep.subr.mxu0 %v6883_v26 }
0x1484   : > { %v4486_v56 = vpop.f32.mrf.mxu1 }
0x1485   : > { %v4325_v57 = vpop.f32.mrf.mxu0 }
0x1486   : > { %v6352_v58 = vpop.f32.mrf.mxu1  ;;  %6370 = vmatmul.mubr.msk.f32.vlgmr.msra.gmra.mxu0 %vm533_vm6, %v4325_v57 }
0x1487   : > { %v6328_v59 = vpop.f32.mrf.mxu0  ;;  %6393 = vmatprep.mubr.msk.f32.mxu0 %vm6885_vm0, %v6883_v26 }
0x1489   : > { %v4397_v61 = vpop.f32.mrf.mxu0 }
0x148a   : > { %6389 = vmatmul.mubr.msk.f32.vlgmr.msra.gmra.mxu1 %vm533_vm6, %v4397_v61 }
0x148b   : > { %v6333_v62 = vpop.f32.mrf.mxu0  ;;  %6436 = vmatprep.mubr.msk.f32.mxu1 %vm6885_vm0, %v6883_v26  ;;  %6421 = vmatpush3.msra.mxu1 %v4836_v37 }
0x148c   : > { %6422 = vmatprep.subr.mxu1 %v6883_v26 }
0x148d   : > { %6423 = vmatpush3.msra.mxu1 %v4835_v18 }
0x148e   : > { %6424 = vmatprep.subr.mxu1 %v6883_v26 }
0x148f   : > { %6425 = vmatpush3.msra.mxu1 %v4834_v28 }
0x1490   : > { %6426 = vmatprep.subr.mxu1 %v6883_v26 }
0x1491   : > { %6427 = vmatpush3.msra.mxu1 %v4833_v38 }
0x1492   : > { %6428 = vmatprep.subr.mxu1 %v6883_v26 }
0x1493   : > { %6429 = vmatpush3.msra.mxu1 %v4832_v60 }
0x1494   : > { %6430 = vmatprep.subr.mxu1 %v6883_v26 }
0x1495   : > { %6431 = vmatpush3.msra.mxu1 %v4831_v39 }
0x1496   : > { %6432 = vmatprep.subr.mxu1 %v6883_v26 }
0x1497   : > { %6433 = vmatpush3.msra.mxu1 %v4830_v23 }
0x1498   : > { %6434 = vmatprep.subr.mxu1 %v6883_v26 }
0x1499   : > { %6435 = vmatpush3.msra.mxu1 %v4829_v52 }
0x149a   : > { %6458 = vmatprep.subr.mxu1 %v6883_v26 }
0x1546   : > { %v4559_v63 = vpop.f32.mrf.mxu0 }
0x1547   : > { %v4560_v3 = vadd.f32 %v4559_v63, %v4486_v56 }
0x1548   : > { %v6371_v2 = vpop.f32.mrf.mxu0 }
0x154a   : > { %v4641_v4 = vpop.f32.mrf.mxu1 }
0x154b   : > { %v4645_v7 = vadd.f32 %v4641_v4, %v4560_v3 }
0x154c   : > { %v6390_v9 = vpop.f32.mrf.mxu1 }
0x154d   : > { %v4647_v32 = vsel %vm4646_vm1, %v4645_v7, 0.0  ;;  %v4657_v41 = vmul.f32 %v4645_v7, %v4645_v7 }
0x154e   : > { %4648 = vadd.xlane.f32.xlu0 %v4647_v32 }
0x154f   : > { %v4658_v1 = vsel %vm4646_vm1, %v4657_v41, 0.0 }
0x1550   : > { %4659 = vadd.xlane.f32.xlu1 %v4658_v1 }
0x15d7   : > { %v4649_v12 = vpop.xlane.xlu0 %4648 }
0x15d8   : > { %v4650_v13 = vrot.slane %v4649_v12, 4 }
0x15d9   : > { %v4660_v14 = vpop.xlane.xlu1 %4659 }
0x15da   : > { %v4651_v33 = vadd.f32 %v4650_v13, %v4649_v12  ;;  %v4661_v42 = vrot.slane %v4660_v14, 4 }
0x15dc   : > { %v4652_v16 = vrot.slane %v4651_v33, 2  ;;  %v4662_v19 = vadd.f32 %v4661_v42, %v4660_v14 }
0x15de   : > { %v4663_v20 = vrot.slane %v4662_v19, 2  ;;  %v4653_v21 = vadd.f32 %v4652_v16, %v4651_v33 }
0x15e0   : > { %v4654_v22 = vrot.slane %v4653_v21, 1  ;;  %v4664_v25 = vadd.f32 %v4663_v20, %v4662_v19 }
0x15e2   : > { %v4655_v34 = vadd.f32 %v4654_v22, %v4653_v21  ;;  %v4665_v36 = vrot.slane %v4664_v25, 1 }
0x15e4   : > { %6504 = vpush %v4655_v34  ;;  %v4666_v17 = vadd.f32 %v4665_v36, %v4664_v25 }
0x15e6   : > { %6506 = vpush %v4666_v17 }
0x1615   : > { %s6505_s27 = spop %6504 }
0x1616   : > { %s4670_s22 = smul.f32 0.00390625, %s6505_s27 }
0x1617   : > { %s6507_s16 = spop %6506 }
0x1618   : > { %s4674_s2 = smul.f32 %s4670_s22, %s4670_s22  ;;  %v4677_v35 = vstv %s4670_s22 }
0x1619   : > { %s4673_s25 = smul.f32 0.00390625, %s6507_s16  ;;  %v4678_v44 = vsub.f32 %v4645_v7, %v4677_v35 }
0x161b   : > { %s4675_s18 = ssub.f32 %s4673_s25, %s4674_s2 }
0x161d   : > { %s4676_s26 = smax.f32 %s6884_s14, %s4675_s18  ;;  %s5590_s18 = sshll.u32 %s6958_s13, 4 }
0x161e   : > { %s4679_s28 = sadd.f32 1e-05, %s4676_s26 }
0x1620   : > { %v4680_v0 = vstv %s4679_s28 }
0x1621   : > { %6635 = vrsqrt.f32 %v4680_v0 }
0x162e   : > { %v6636_v40 = vpop.eup %6635 }
0x162f   : > { %6508 = vpush %v6636_v40 }
0x1660   : > { %s6509_s17 = spop %6508 }
0x1661   : > { %v4683_v43 = vstv %s6509_s17 }
0x1662   : > { %v4684_v30 = vmul.f32 %v4683_v43, %v4678_v44 }
0x1664   : > { %v4685_v31 = vmax.f32 %v4684_v30, 0.0 }
0x1666   : > { %6392 = vmatpush3.msk.msra.mxu0 %vm820_vm7, %v4685_v31 }
0x1667   : > { %6394 = vmatmul.mubr.msk.f32.vlgmr.msra.gmra.mxu0 %vm795_vm2, %v7168_v27  ;;  %6396 = vmatprep.subr.mxu0 %v6883_v26  ;;  %v4843_v27 = vld [vmem:[#allocation11 + $0x68] sm:$0xff] }
0x1668   : > { %6397 = vmatpush3.msk.msra.mxu0 %vm820_vm7, %v4685_v31  ;;  %6398 = vmatprep.mubr.msk.f32.mxu0 %vm6885_vm0, %v6883_v26 }
0x1669   : > { %6401 = vmatprep.subr.mxu0 %v6883_v26 }
0x166b   : > { %6399 = vmatmul.mubr.msk.f32.vlgmr.msra.gmra.mxu0 %vm795_vm2, %v7176_v29  ;;  %v4840_v29 = vld [vmem:[#allocation11 + $0x50] sm:$0xff] }
0x166c   : > { %6402 = vmatpush3.msra.mxu0 %v4845_v50  ;;  %6417 = vmatprep.mubr.msk.f32.mxu0 %vm6885_vm0, %v6883_v26 }
0x166d   : > { %6403 = vmatprep.subr.mxu0 %v6883_v26 }
0x166e   : > { %6404 = vmatpush3.msra.mxu0 %v4844_v5 }
0x166f   : > { %6405 = vmatprep.subr.mxu0 %v6883_v26 }
0x1670   : > { %6406 = vmatpush3.msra.mxu0 %v4843_v27 }
0x1671   : > { %6407 = vmatprep.subr.mxu0 %v6883_v26 }
0x1672   : > { %6408 = vmatpush3.msra.mxu0 %v4842_v45 }
0x1673   : > { %6409 = vmatprep.subr.mxu0 %v6883_v26 }
0x1674   : > { %6410 = vmatpush3.msra.mxu0 %v4841_v46 }
0x1675   : > { %6411 = vmatprep.subr.mxu0 %v6883_v26 }
0x1676   : > { %6412 = vmatpush3.msra.mxu0 %v4840_v29 }
0x1677   : > { %6413 = vmatprep.subr.mxu0 %v6883_v26 }
0x1678   : > { %6414 = vmatpush3.msra.mxu0 %v4839_v51 }
0x1679   : > { %6415 = vmatprep.subr.mxu0 %v6883_v26 }
0x167a   : > { %6416 = vmatpush3.msra.mxu0 %v4838_v6 }
0x167b   : > { %6418 = vmatmul.mubr.msk.f32.vlgmr.msra.gmra.mxu0 %vm533_vm6, %v4685_v31  ;;  %6439 = vmatprep.subr.mxu0 %v6883_v26 }
0x167c   : > { %6440 = vmatpush3.msra.mxu0 %v4999_v47  ;;  %6455 = vmatprep.mubr.msk.f32.mxu0 %vm6885_vm0, %v6883_v26 }
0x167d   : > { %6441 = vmatprep.subr.mxu0 %v6883_v26 }
0x167e   : > { %6442 = vmatpush3.msra.mxu0 %v4998_v48 }
0x167f   : > { %6443 = vmatprep.subr.mxu0 %v6883_v26 }
0x1680   : > { %6444 = vmatpush3.msra.mxu0 %v4997_v24 }
0x1681   : > { %6445 = vmatprep.subr.mxu0 %v6883_v26 }
0x1682   : > { %6446 = vmatpush3.msra.mxu0 %v4996_v49 }
0x1683   : > { %6447 = vmatprep.subr.mxu0 %v6883_v26 }
0x1684   : > { %6448 = vmatpush3.msra.mxu0 %v4995_v15 }
0x1685   : > { %6449 = vmatprep.subr.mxu0 %v6883_v26 }
0x1686   : > { %6450 = vmatpush3.msra.mxu0 %v4994_v53 }
0x1687   : > { %6451 = vmatprep.subr.mxu0 %v6883_v26 }
0x1688   : > { %6452 = vmatpush3.msra.mxu0 %v4993_v54 }
0x1689   : > { %6453 = vmatprep.subr.mxu0 %v6883_v26 }
0x168a   : > { %6454 = vmatpush3.msra.mxu0 %v4992_v55 }
0x1727   : > { %v4755_v8 = vpop.f32.mrf.mxu0 }
0x1728   : > { %6437 = vmatmul.mubr.msk.f32.vlgmr.msra.gmra.mxu1 %vm533_vm6, %v4755_v8 }
0x1729   : > { %v6395_v56 = vpop.f32.mrf.mxu0  ;;  %6460 = vmatprep.mubr.msk.f32.mxu1 %vm6885_vm0, %v6883_v26 }
0x172b   : > { %v4825_v57 = vpop.f32.mrf.mxu0 }
0x172c   : > { %6456 = vmatmul.mubr.msk.f32.vlgmr.msra.gmra.mxu0 %vm533_vm6, %v4825_v57  ;;  %vm5261_vm6 = vcmask 517120  }
0x172d   : > { %v6400_v58 = vpop.f32.mrf.mxu0 }
0x173b   : > { %v4914_v59 = vpop.f32.mrf.mxu0 }
0x173d   : > { %v6419_v61 = vpop.f32.mrf.mxu0 }
0x17e8   : > { %v4987_v62 = vpop.f32.mrf.mxu1 }
0x17e9   : > { %v4988_v2 = vadd.f32 %v4987_v62, %v4914_v59 }
0x17ea   : > { %v6438_v63 = vpop.f32.mrf.mxu1 }
0x17ec   : > { %v5069_v3 = vpop.f32.mrf.mxu0 }
0x17ed   : > { %v5073_v4 = vadd.f32 %v5069_v3, %v4988_v2 }
0x17ee   : > { %v6457_v7 = vpop.f32.mrf.mxu0 }
0x17ef   : > { %v5074_v9 = vsel %vm4646_vm1, %v5073_v4, 0.0  ;;  %v5084_v32 = vmul.f32 %v5073_v4, %v5073_v4 }
0x17f0   : > { %5075 = vadd.xlane.f32.xlu0 %v5074_v9 }
0x17f1   : > { %v5085_v41 = vsel %vm4646_vm1, %v5084_v32, 0.0 }
0x17f2   : > { %5086 = vadd.xlane.f32.xlu1 %v5085_v41 }
0x1879   : > { %v5076_v1 = vpop.xlane.xlu0 %5075 }
0x187a   : > { %v5077_v12 = vrot.slane %v5076_v1, 4 }
0x187b   : > { %v5087_v13 = vpop.xlane.xlu1 %5086 }
0x187c   : > { %v5078_v14 = vadd.f32 %v5077_v12, %v5076_v1  ;;  %v5088_v33 = vrot.slane %v5087_v13, 4 }
0x187e   : > { %v5079_v42 = vrot.slane %v5078_v14, 2  ;;  %v5089_v16 = vadd.f32 %v5088_v33, %v5087_v13 }
0x1880   : > { %v5080_v19 = vadd.f32 %v5079_v42, %v5078_v14  ;;  %v5090_v20 = vrot.slane %v5089_v16, 2 }
0x1882   : > { %v5091_v21 = vadd.f32 %v5090_v20, %v5089_v16  ;;  %v5081_v22 = vrot.slane %v5080_v19, 1 }
0x1884   : > { %v5082_v25 = vadd.f32 %v5081_v22, %v5080_v19  ;;  %v5092_v34 = vrot.slane %v5091_v21, 1 }
0x1886   : > { %6510 = vpush %v5082_v25  ;;  %v5093_v36 = vadd.f32 %v5092_v34, %v5091_v21 }
0x1888   : > { %6512 = vpush %v5093_v36 }
0x18b7   : > { %s6511_s21 = spop %6510 }
0x18b8   : > { %s5097_s24 = smul.f32 0.00390625, %s6511_s21 }
0x18b9   : > { %s6513_s29 = spop %6512 }
0x18ba   : > { %s5101_s23 = smul.f32 %s5097_s24, %s5097_s24  ;;  %v5104_v18 = vstv %s5097_s24  ;;  %s5284_s24 = scalar_lea.hbm %s7798_s9, %s5590_s18 }
0x18bb   : > { %s5100_s27 = smul.f32 0.00390625, %s6513_s29  ;;  %v5105_v28 = vsub.f32 %v5073_v4, %v5104_v18 }
0x18bd   : > { %s5102_s22 = ssub.f32 %s5100_s27, %s5101_s23  ;;  %s6886_s27 = smov [#allocation13]  }
0x18bf   : > { %s5103_s16 = smax.f32 %s6884_s14, %s5102_s22  ;;  %s411_s14 = sand.u32 1, %s6863_s10  }
0x18c0   : > { %s5106_s2 = sadd.f32 1e-05, %s5103_s16  ;;  %s412_s26 = scalar_lea.vmem [#allocation13], %s411_s14 }
0x18c1   : > { %s5286_s28 = sshll.u32 %s412_s26, 4  ;;  %s5274_s29 = scalar_lea.sflag [#allocation4], %s411_s14  ;;  %s5287_s28 = int_to_ptr.vmem [resolvable:$true] %s5286_s28 }
0x18c2   : > { %v5107_v17 = vstv %s5106_s2  ;;  %s6795_s23 = scalar_lea.vmem %s5287_s28, 16  ;;  %s6799_s22 = sshll.u32 %s6886_s27, 4  ;;  %s6800_s22 = int_to_ptr.vmem [resolvable:$false] %s6799_s22 }
0x18c3   : > { %6637 = vrsqrt.f32 %v5107_v17  ;;  %p6796_p4 = scmp.ne.s32.totalorder %s5287_s28, %s6795_s23  ;;  %s6801_s13 = scalar_lea.vmem %s6800_s22, 32 }
0x18c4   : > { %p6802_p13 = scmp.lt.s32.totalorder %s5287_s28, %s6800_s22  ;;  %p6803_p7 = scmp.lt.s32.totalorder %s6801_s13, %s6795_s23 }
0x18c5   : > { %p6797_p9 = pnand %p6796_p4, %p6975_p5 }
0x18c6   : > { %p6804_p11 = por %p6803_p7, %p6802_p13 }
0x18c7   : > { %p6798_p8 = pneg %p6797_p9 }
0x18c9   : > { %p6805_p0 = pnand %p6804_p11, %p6798_p8 }
0x18d0   : > { %v6638_v37 = vpop.eup %6637 }
0x18d1   : > { %6514 = vpush %v6638_v37 }
0x1902   : > { %s6515_s25 = spop %6514 }
0x1903   : > { %v5110_v38 = vstv %s6515_s25 }
0x1904   : > { %v5111_v60 = vmul.f32 %v5110_v38, %v5105_v28 }
0x1906   : > { %v5112_v39 = vmax.f32 %v5111_v60, 0.0 }
0x1908   : > { %6459 = vmatpush3.msk.msra.mxu1 %vm820_vm7, %v5112_v39 }
0x1909   : > { %6461 = vmatmul.mubr.msk.f32.vlgmr.msra.gmra.mxu1 %vm795_vm2, %v7352_v10  ;;  %6463 = vmatprep.subr.mxu1 %v6883_v26 }
0x190a   : > { %6464 = vmatpush3.msk.msra.mxu1 %vm820_vm7, %v5112_v39  ;;  %6465 = vmatprep.mubr.msk.f32.mxu1 %vm6885_vm0, %v6883_v26  ;;  %vm5271_vm7 = vcmask 516096  }
0x190d   : > { %6466 = vmatmul.mubr.msk.f32.vlgmr.msra.gmra.mxu1 %vm795_vm2, %v7355_v11 }
0x19c9   : > { %v5184_v23 = vpop.f32.mrf.mxu1 }
0x19cb   : > { %v6462_v0 = vpop.f32.mrf.mxu1 }
0x19cd   : > { %v5256_v40 = vpop.f32.mrf.mxu1 }
0x19ce   : > { %v5260_v35 = vmax.f32 %v5184_v23, %v5256_v40 }
0x19cf   : > { %v6467_v44 = vpop.f32.mrf.mxu1 }
0x19d0   : > { %v5262_v43 = vsel %vm5261_vm6, %v5260_v35, 0.0 }
0x19d1   : > { %v5263_v30 = vrot.slane %v5262_v43, 4 }
0x19d3   : > { %v5264_v10 = vadd.f32 %v5263_v30, %v5262_v43 }
0x19d5   : > { %v5265_v31 = vrot.slane %v5264_v10, 2 }
0x19d7   : > { %v5266_v50 = vadd.f32 %v5265_v31, %v5264_v10 }
0x19d9   : > { %v5267_v5 = vrot.slane %v5266_v50, 1 }
0x19db   : > { %v5268_v26 = vadd.f32 %v5267_v5, %v5266_v50 }
0x19dd   : > { %v5270_v11 = vmul.f32 0.5, %v5268_v26 }
0x19df   : > { %5272 = vst.msk [vmem:[%s412_s26] sm:$0x1] %vm5271_vm7, %v5270_v11 }
0x19e0   : > { %6808 = shalt.err (!%p6805_p0)
}
0x19e1   : > { %s6809_s16 = scalar_lea.hbm %s5284_s24, 16  ;;  %s6813_s14 = scalar_lea.hbm %s7798_s9, 32 }
0x19e2   : > { %p6810_p3 = scmp.ne.s32.totalorder %s5284_s24, %s6809_s16  ;;  %p6814_p1 = scmp.lt.s32.totalorder %s5284_s24, %s7798_s9 }
0x19e3   : > { %p6815_p2 = scmp.lt.s32.totalorder %s6813_s14, %s6809_s16 }
0x19e4   : > { %p6811_p12 = pnand %p6810_p3, %p6975_p5 }
0x19e5   : > { %p6816_p4 = por %p6815_p2, %p6814_p1 }
0x19e6   : > { %p6812_p10 = pneg %p6811_p12 }
0x19e8   : > { %p6817_p9 = pnand %p6816_p4, %p6812_p10 }
0x19ea   : > { %6820 = shalt.err (!%p6817_p9)
}
0x19eb   : > { %6540 = dma.vmem_to_hbm [thread:$0]  (%p6975_p5), %s5287_s28, 16, %s5284_s24, %s5274_s29  }
0x19ec PF: > { %p6577_p8 = scmp.ge.s32.totalorder %s6871_s12, 2  ;;  %s5298_s17 = sand.u32 1, %s6859_s30  }
0x19ed   : > { %s5299_s21 = scalar_lea.sflag [#allocation4], %s5298_s17 }
0x19ee   : > { %p6562_p13 = pnand %p6577_p8, %p6979_p6 }
0x19f0   : > { %p6563_p7 = pneg %p6562_p13 }
0x19f2   : > { %6854 = dma.done.wait (%p6563_p7), %s5299_s21, 16  }
0x19f3   : > { %6856 = vsyncadd (%p6563_p7), %s5299_s21, 4294967280  ;;  %s7822_s23 = sld [smem:[#allocation19_spill]]  ;;  %p23_p11 = scmp.ge.s32.totalorder %s6962_s15, 4  }
0x19f4   : > { %s7823_s30 = smov %s6863_s10  ;;  %s7824_s10 = smov %s6867_s11 }
0x19f5   : > { %s7826_s12 = smov %s6962_s15  ;;  %25 = sbr.rel (!%p23_p11) target bundleno = 9 (0x9), region = 132 }
0x19f9   : > { %s7825_s11 = smov %s7822_s23 }
0x19fa   :  { %5303 = vsyncpa [#allocation3], 1 }
0x19fb   :  { %5305 = vsyncpa [#allocation3 + $0x1], 1 }
0x19fc   :  { %5306 = vsyncpa [#allocation6], 1 }
0x19fd   :  { %5307 = vsyncpa [#allocation9], 1 }
0x19fe   :  { %5308 = vsyncpa [#allocation12], 1 }
0x19ff   :  { %5309 = vsyncpa [#allocation4], 1 }
0x1a00   :  { %5311 = vsyncpa [#allocation4 + $0x1], 1 }

</bundles_post_ra>
